<compile_context>
chip_gen: v6e
topology: v6e:2x2x1
jax: 0.10.0
libtpu: 0.0.40
codegen_flags: <defaults>
</compile_context>

<pallas_src>
import numpy as np

import jax
import jax.numpy as jnp
from jax import lax
from jax.experimental import pallas as pl
from jax.experimental.pallas import tpu as pltpu


# ----------------------------- helpers ----------------------------------------
def _dot(a, b):
    return jnp.dot(a, b, preferred_element_type=jnp.float32)


def _slab_layout(C, H, L):
    """Row offsets of each weight block inside the packed weight slab.
    Every block starts on an 8-row (sublane) boundary."""
    layout = {}
    r = 0

    def add(name, rows):
        nonlocal r
        layout[name] = (r, rows)
        r += ((rows + 7) // 8) * 8

    add("e0x", C)        # encoder L0 input  weights  [C,   4H]
    add("e0h", H)        # encoder L0 hidden weights  [H,   4H]
    add("e1", 2 * H)     # encoder L1 fused  weights  [2H,  4H]
    add("d0", C + H)     # decoder L0 fused  weights  [C+H, 4H]
    add("d1", 2 * H)     # decoder L1 fused  weights  [2H,  4H]
    add("wb", 2 * H)     # bottleneck                 [2H,  L ]
    add("wsm", L)        # future-state (latent part) [L,   2H]
    add("wfc", H)        # fc_diff                    [H,   C ]
    return layout, r


# bias-slab row indices
_B_E0, _B_E1, _B_D0, _B_D1, _B_BB, _B_BS, _B_FC, _B_WSZ = range(8)


# ----------------------------- fused DVMS kernel ------------------------------
def _build_dvms_kernel(*, M, B, C, H, L, T, n, layout):
    def rep_rows(x):
        # repeat_interleave(x, n, axis=0) as sublane broadcast + concat (no MXU)
        parts = [jnp.broadcast_to(x[i:i + 1, :], (n, x.shape[1])) for i in range(B)]
        return parts[0] if B == 1 else jnp.concatenate(parts, axis=0)

    def gru_gates(g, b, h):
        # g: [rows, 4H] fused pre-activations [r | z | n_x | n_h]; b: [1, 4H]
        rz = jax.nn.sigmoid(g[:, 0:2 * H] + b[:, 0:2 * H])     # one EUP push for r & z
        r, zg = rz[:, 0:H], rz[:, H:2 * H]
        nn_ = jnp.tanh(g[:, 2 * H:3 * H] + b[:, 2 * H:3 * H]
                       + r * (g[:, 3 * H:4 * H] + b[:, 3 * H:4 * H]))
        return (1.0 - zg) * nn_ + zg * h

    def kernel(past_ref, current_ref, z_ref, w_ref, b_ref, out_ref):
        # ---- static parameter views out of the two slabs (one-time cost) ----
        def wview(name, width):
            r0, rows = layout[name]
            return w_ref[r0:r0 + rows, 0:width]

        Wx0, Wh0 = wview("e0x", 4 * H), wview("e0h", 4 * H)
        We1, Wd0, Wd1 = wview("e1", 4 * H), wview("d0", 4 * H), wview("d1", 4 * H)
        Wb, Wsm, Wfc = wview("wb", L), wview("wsm", 2 * H), wview("wfc", C)
        b_e0 = b_ref[_B_E0:_B_E0 + 1, :]
        b_e1 = b_ref[_B_E1:_B_E1 + 1, :]
        b_d0 = b_ref[_B_D0:_B_D0 + 1, :]
        b_d1 = b_ref[_B_D1:_B_D1 + 1, :]
        bb = b_ref[_B_BB:_B_BB + 1, 0:L]
        bs = b_ref[_B_BS:_B_BS + 1, 0:2 * H]
        bfc = b_ref[_B_FC:_B_FC + 1, 0:C]
        wsz = b_ref[_B_WSZ:_B_WSZ + 1, 0:2 * H]

        # ---------------- encoder (2-layer GRU, fully unrolled) ---------------
        # layer-0 input projection hoisted off the serial chain (x independent of h)
        gi_all = _dot(past_ref[...], Wx0)                      # [M*B, 4H]
        h0 = jnp.zeros((B, H), jnp.float32)
        h1 = jnp.zeros((B, H), jnp.float32)
        for t in range(M):
            g0 = gi_all[t * B:(t + 1) * B, :] + _dot(h0, Wh0)  # one matmul on the chain
            h0 = gru_gates(g0, b_e0, h0)
            g1 = _dot(jnp.concatenate([h0, h1], axis=1), We1)  # fused [x|h] matmul
            h1 = gru_gates(g1, b_e1, h1)

        # ------------- bottleneck + future-state init + in-kernel repeat ------
        hcat = jnp.concatenate([h0, h1], axis=1)               # [B, 2H]
        bott = _dot(hcat, Wb) + bb                             # [B, L]
        base = _dot(bott, Wsm) + bs                            # [B, 2H]
        hid = rep_rows(base) + z_ref[...] * wsz                # [BN, 2H]
        h0d, h1d = hid[:, 0:H], hid[:, H:2 * H]
        x = rep_rows(current_ref[...])                         # [BN, C]

        # ------------------------- decoder rollout ----------------------------
        outs = []
        for _ in range(T):
            g0 = _dot(jnp.concatenate([x, h0d], axis=1), Wd0)
            h0d = gru_gates(g0, b_d0, h0d)
            g1 = _dot(jnp.concatenate([h0d, h1d], axis=1), Wd1)
            h1d = gru_gates(g1, b_d1, h1d)
            pos = x + _dot(h1d, Wfc) + bfc                     # orientation + motion
            # 3-wide squared norm as explicit lane MACs (no XLU lane-reduce)
            ss = pos[:, 0:1] * pos[:, 0:1]
            for c in range(1, C):
                ss = ss + pos[:, c:c + 1] * pos[:, c:c + 1]
            # TODO(synk): no epsilon guard on the norm (matches PyTorch exactly).
            pos = pos * lax.rsqrt(ss)
            outs.append(pos)
            x = pos
        out_ref[...] = jnp.concatenate(outs, axis=1)           # single lane-dense write

    return kernel


# ----------------------------- parameter packing ------------------------------
def prepare_kernel_params(p):
    """Repack PyTorch-layout parameters into two kernel-friendly f32 slabs."""
    H, L, C = p["hidden_dim"], p["latent_dim"], p["in_channels"]
    W = max(4 * H, L)
    layout, rows = _slab_layout(C, H, L)

    def ih_cols(wih):
        # [3H, I] -> [I, 4H]  columns [Wr | Wz | Wn | 0]
        wt = wih.T
        return jnp.concatenate([wt, jnp.zeros((wt.shape[0], H), jnp.float32)], axis=1)

    def hh_cols(whh):
        # [3H, H] -> [H, 4H]  columns [Wr | Wz | 0 | Wn]
        wt = whh.T
        return jnp.concatenate(
            [wt[:, :2 * H], jnp.zeros((H, H), jnp.float32), wt[:, 2 * H:]], axis=1)

    def fused_bias(bih, bhh):
        # [4H] = [bih_r+bhh_r | bih_z+bhh_z | bih_n | bhh_n]
        return jnp.concatenate([bih[:2 * H] + bhh[:2 * H], bih[2 * H:], bhh[2 * H:]])

    blocks = {
        "e0x": ih_cols(p["enc_wih0"]),
        "e0h": hh_cols(p["enc_whh0"]),
        "e1": jnp.concatenate([ih_cols(p["enc_wih1"]), hh_cols(p["enc_whh1"])], axis=0),
        "d0": jnp.concatenate([ih_cols(p["dec_wih0"]), hh_cols(p["dec_whh0"])], axis=0),
        "d1": jnp.concatenate([ih_cols(p["dec_wih1"]), hh_cols(p["dec_whh1"])], axis=0),
        "wb": p["bottleneck_w"].T,            # [2H, L]
        "wsm": p["dec_state_w"].T[:L],        # [L, 2H]
        "wfc": p["fc_diff_w"].T,              # [H, C]
    }
    wslab = jnp.zeros((rows, W), jnp.float32)
    for name, arr in blocks.items():
        r0, _ = layout[name]
        wslab = wslab.at[r0:r0 + arr.shape[0], 0:arr.shape[1]].set(arr.astype(jnp.float32))

    bslab = jnp.zeros((8, W), jnp.float32)
    bslab = bslab.at[_B_E0, 0:4 * H].set(fused_bias(p["enc_bih0"], p["enc_bhh0"]))
    bslab = bslab.at[_B_E1, 0:4 * H].set(fused_bias(p["enc_bih1"], p["enc_bhh1"]))
    bslab = bslab.at[_B_D0, 0:4 * H].set(fused_bias(p["dec_bih0"], p["dec_bhh0"]))
    bslab = bslab.at[_B_D1, 0:4 * H].set(fused_bias(p["dec_bih1"], p["dec_bhh1"]))
    bslab = bslab.at[_B_BB, 0:L].set(p["bottleneck_b"])
    bslab = bslab.at[_B_BS, 0:2 * H].set(p["dec_state_b"])
    bslab = bslab.at[_B_FC, 0:C].set(p["fc_diff_b"])
    bslab = bslab.at[_B_WSZ, 0:2 * H].set(p["dec_state_w"].T[L])

    # NOTE: optional bf16 operand cast (single MXU pass / matmul) is left out
    # pending an accuracy sign-off against the 1e-4 f32 reference tolerance.
    return {"wslab": wslab, "bslab": bslab, "layout": layout}


# ----------------------------- wrapper -----------------------------------------
_VMEM = pl.BlockSpec(memory_space=pltpu.MemorySpace.VMEM)


def dvms_forward(p, past, current, future, kp=None):
    """Mirrors DVMS.forward([past, current], future) with one fused pallas_call."""
    if kp is None:
        kp = prepare_kernel_params(p)
    B, M, C = past.shape
    n, T = p["n_samples_train"], p["h_window"]
    H, L = p["hidden_dim"], p["latent_dim"]
    BN = B * n

    # time-major, batch-minor flattening so the hoisted input projection is one matmul
    past_flat = jnp.transpose(past, (1, 0, 2)).reshape(M * B, C).astype(jnp.float32)
    current2 = current[:, 0, :].astype(jnp.float32)                 # [B, C]
    z = jnp.tile(p["fixed_points"], (B, 1)).astype(jnp.float32)     # [BN, 1]

    kernel = _build_dvms_kernel(M=M, B=B, C=C, H=H, L=L, T=T, n=n, layout=kp["layout"])
    # TODO(synk): on v7x (2 TensorCores) split the BN decoder rollouts across a
    # grid=(2,) "parallel" axis; kept grid=() here since v5e/v6e are single-core
    # and extra grid steps only add per-step overhead on them.
    flat = pl.pallas_call(
        kernel,
        out_shape=jax.ShapeDtypeStruct((BN, T * C), jnp.float32),
        in_specs=[_VMEM] * 5,
        out_specs=_VMEM,
    )(past_flat, current2, z, kp["wslab"], kp["bslab"])
    decoded = flat.reshape(BN, T, C)
    future_r = jnp.repeat(future, n, axis=0)
    return [decoded, future_r]


# ----------------------------- pure-JAX reference -----------------------------
def _gru_cell_ref(x, h, w_ih, w_hh, b_ih, b_hh):
    H = h.shape[-1]
    gx = x @ w_ih.T + b_ih
    gh = h @ w_hh.T + b_hh
    r = jax.nn.sigmoid(gx[:, :H] + gh[:, :H])
    z = jax.nn.sigmoid(gx[:, H:2 * H] + gh[:, H:2 * H])
    nn = jnp.tanh(gx[:, 2 * H:] + r * gh[:, 2 * H:])
    return (1.0 - z) * nn + z * h


def dvms_forward_ref(p, past, current, future):
    B, M, _ = past.shape
    H, L, n, T = p["hidden_dim"], p["latent_dim"], p["n_samples_train"], p["h_window"]
    h0 = jnp.zeros((B, H)); h1 = jnp.zeros((B, H))
    for t in range(M):
        h0 = _gru_cell_ref(past[:, t], h0, p["enc_wih0"], p["enc_whh0"],
                           p["enc_bih0"], p["enc_bhh0"])
        h1 = _gru_cell_ref(h0, h1, p["enc_wih1"], p["enc_whh1"],
                           p["enc_bih1"], p["enc_bhh1"])
    past_state = jnp.concatenate([h0, h1], axis=-1)
    past_state = jnp.repeat(past_state, n, axis=0)
    current_r = jnp.repeat(current, n, axis=0)
    future_r = jnp.repeat(future, n, axis=0)
    z = jnp.tile(p["fixed_points"], (B, 1))
    bott = past_state @ p["bottleneck_w"].T + p["bottleneck_b"]
    combined = jnp.concatenate([bott, z], axis=-1)
    hid = combined @ p["dec_state_w"].T + p["dec_state_b"]
    d0, d1 = hid[:, :H], hid[:, H:2 * H]
    x = current_r[:, 0, :]
    outs = []
    for _ in range(T):
        d0 = _gru_cell_ref(x, d0, p["dec_wih0"], p["dec_whh0"], p["dec_bih0"], p["dec_bhh0"])
        d1 = _gru_cell_ref(d0, d1, p["dec_wih1"], p["dec_whh1"], p["dec_bih1"], p["dec_bhh1"])
        delta = d1 @ p["fc_diff_w"].T + p["fc_diff_b"]
        pos = x + delta
        pos = pos / jnp.linalg.norm(pos, axis=-1, keepdims=True)
        outs.append(pos)
        x = pos
    return [jnp.stack(outs, axis=1), future_r]


# ----------------------------- parameter init ---------------------------------
def init_params(key, in_channels, h_window, latent_dim, n_hidden, hidden_dim, n_samples):
    assert n_hidden == 2, "kernel is written for the default n_hidden=2"
    assert in_channels == 3, "to_position_normalized assumes 3-D coordinates"
    H, C, L = hidden_dim, in_channels, latent_dim
    keys = iter(jax.random.split(key, 32))

    def u(shape, fan_in):
        bound = 1.0 / np.sqrt(fan_in)
        return jax.random.uniform(next(keys), shape, jnp.float32, -bound, bound)

    p = dict(
        in_channels=C, h_window=h_window, latent_dim=L,
        hidden_dim=H, n_samples_train=n_samples,
        fixed_points=jnp.array([[-(n_samples - 1) / 2 + i] for i in range(n_samples)],
                               dtype=jnp.float32),
        # past_encoder GRU (2 layers)
        enc_wih0=u((3 * H, C), H), enc_whh0=u((3 * H, H), H),
        enc_bih0=u((3 * H,), H), enc_bhh0=u((3 * H,), H),
        enc_wih1=u((3 * H, H), H), enc_whh1=u((3 * H, H), H),
        enc_bih1=u((3 * H,), H), enc_bhh1=u((3 * H,), H),
        # past_decoder_bottleneck: Linear(2H -> L)
        bottleneck_w=u((L, 2 * H), 2 * H), bottleneck_b=u((L,), 2 * H),
        # decoder_future_state: Linear(L+1 -> 2H)
        dec_state_w=u((2 * H, L + 1), L + 1), dec_state_b=u((2 * H,), L + 1),
        # decoder_future GRU (2 layers)
        dec_wih0=u((3 * H, C), H), dec_whh0=u((3 * H, H), H),
        dec_bih0=u((3 * H,), H), dec_bhh0=u((3 * H,), H),
        dec_wih1=u((3 * H, H), H), dec_whh1=u((3 * H, H), H),
        dec_bih1=u((3 * H,), H), dec_bhh1=u((3 * H,), H),
        # fc_diff: Linear(H -> C)
        fc_diff_w=u((C, H), H), fc_diff_b=u((C,), H),
    )
    return p


# ----------------------------- main --------------------------------------------
if __name__ == "__main__":
    # small, forward-consistent shapes
    B, M, C = 2, 8, 3
    H_WINDOW, LATENT, N_HIDDEN, HIDDEN, N_SAMPLES = 5, 16, 2, 16, 5

    key = jax.random.PRNGKey(0)
    kp_, kpast, kcur, kfut = jax.random.split(key, 4)
    params = init_params(kp_, C, H_WINDOW, LATENT, N_HIDDEN, HIDDEN, N_SAMPLES)

    past = jax.random.normal(kpast, (B, M, C), jnp.float32)
    current = jax.random.normal(kcur, (B, 1, C), jnp.float32)
    # normalize current onto the unit sphere (these are orientations)
    current = current / jnp.linalg.norm(current, axis=-1, keepdims=True)
    future = jax.random.normal(kfut, (B, H_WINDOW, C), jnp.float32)

    kernel_params = prepare_kernel_params(params)
    decoded, future_rep = dvms_forward(params, past, current, future, kp=kernel_params)
    decoded = jax.block_until_ready(decoded)
    future_rep = jax.block_until_ready(future_rep)

    # check against pure-JAX reference
    ref_decoded, ref_future = dvms_forward_ref(params, past, current, future)
    assert decoded.shape == (B * N_SAMPLES, H_WINDOW, C)
    assert future_rep.shape == (B * N_SAMPLES, H_WINDOW, C)
    np.testing.assert_allclose(np.asarray(decoded), np.asarray(ref_decoded),
                               rtol=1e-4, atol=1e-4)
    np.testing.assert_allclose(np.asarray(future_rep), np.asarray(ref_future),
                               rtol=1e-5, atol=1e-5)

    print("KERNEL_OK")
</pallas_src>

<mosaic_0001>
module attributes {stable_mosaic.version = 11 : i64} {
  func.func @kernel(%arg0: memref<16x3xf32, #tpu.memory_space<vmem>>, %arg1: memref<2x3xf32, #tpu.memory_space<vmem>>, %arg2: memref<10x1xf32, #tpu.memory_space<vmem>>, %arg3: memref<176x64xf32, #tpu.memory_space<vmem>>, %arg4: memref<8x64xf32, #tpu.memory_space<vmem>>, %arg5: memref<10x15xf32, #tpu.memory_space<vmem>>) attributes {dimension_semantics = [], scalar_prefetch = 0 : i64, scratch_operands = 0 : i64, tpu.core_type = #tpu.core_type<tc>} {
    %c0 = arith.constant 0 : index
    %c0_0 = arith.constant 0 : index
    %0 = vector.load %arg3[%c0, %c0_0] : memref<176x64xf32, #tpu.memory_space<vmem>>, vector<3x64xf32>
    %c8 = arith.constant 8 : index
    %c0_1 = arith.constant 0 : index
    %1 = vector.load %arg3[%c8, %c0_1] : memref<176x64xf32, #tpu.memory_space<vmem>>, vector<16x64xf32>
    %c24 = arith.constant 24 : index
    %c0_2 = arith.constant 0 : index
    %2 = vector.load %arg3[%c24, %c0_2] : memref<176x64xf32, #tpu.memory_space<vmem>>, vector<32x64xf32>
    %c56 = arith.constant 56 : index
    %c0_3 = arith.constant 0 : index
    %3 = vector.load %arg3[%c56, %c0_3] : memref<176x64xf32, #tpu.memory_space<vmem>>, vector<19x64xf32>
    %c80 = arith.constant 80 : index
    %c0_4 = arith.constant 0 : index
    %4 = vector.load %arg3[%c80, %c0_4] : memref<176x64xf32, #tpu.memory_space<vmem>>, vector<32x64xf32>
    %c112 = arith.constant 112 : index
    %c0_5 = arith.constant 0 : index
    %5 = vector.load %arg3[%c112, %c0_5] : memref<176x64xf32, #tpu.memory_space<vmem>>, vector<32x16xf32>
    %c144 = arith.constant 144 : index
    %c0_6 = arith.constant 0 : index
    %6 = vector.load %arg3[%c144, %c0_6] : memref<176x64xf32, #tpu.memory_space<vmem>>, vector<16x32xf32>
    %c160 = arith.constant 160 : index
    %c0_7 = arith.constant 0 : index
    %7 = vector.load %arg3[%c160, %c0_7] : memref<176x64xf32, #tpu.memory_space<vmem>>, vector<16x3xf32>
    %c0_8 = arith.constant 0 : index
    %c0_9 = arith.constant 0 : index
    %8 = vector.load %arg4[%c0_8, %c0_9] : memref<8x64xf32, #tpu.memory_space<vmem>>, vector<1x64xf32>
    %c1 = arith.constant 1 : index
    %c0_10 = arith.constant 0 : index
    %9 = vector.load %arg4[%c1, %c0_10] : memref<8x64xf32, #tpu.memory_space<vmem>>, vector<1x64xf32>
    %c2 = arith.constant 2 : index
    %c0_11 = arith.constant 0 : index
    %10 = vector.load %arg4[%c2, %c0_11] : memref<8x64xf32, #tpu.memory_space<vmem>>, vector<1x64xf32>
    %c3 = arith.constant 3 : index
    %c0_12 = arith.constant 0 : index
    %11 = vector.load %arg4[%c3, %c0_12] : memref<8x64xf32, #tpu.memory_space<vmem>>, vector<1x64xf32>
    %c4 = arith.constant 4 : index
    %c0_13 = arith.constant 0 : index
    %12 = vector.load %arg4[%c4, %c0_13] : memref<8x64xf32, #tpu.memory_space<vmem>>, vector<1x16xf32>
    %c5 = arith.constant 5 : index
    %c0_14 = arith.constant 0 : index
    %13 = vector.load %arg4[%c5, %c0_14] : memref<8x64xf32, #tpu.memory_space<vmem>>, vector<1x32xf32>
    %c6 = arith.constant 6 : index
    %c0_15 = arith.constant 0 : index
    %14 = vector.load %arg4[%c6, %c0_15] : memref<8x64xf32, #tpu.memory_space<vmem>>, vector<1x3xf32>
    %c7 = arith.constant 7 : index
    %c0_16 = arith.constant 0 : index
    %15 = vector.load %arg4[%c7, %c0_16] : memref<8x64xf32, #tpu.memory_space<vmem>>, vector<1x32xf32>
    %c0_17 = arith.constant 0 : index
    %c0_18 = arith.constant 0 : index
    %16 = vector.load %arg0[%c0_17, %c0_18] : memref<16x3xf32, #tpu.memory_space<vmem>>, vector<16x3xf32>
    %cst = arith.constant dense<0.000000e+00> : vector<16x64xf32>
    %17 = tpu.matmul %16, %0, %cst {dimension_numbers = #tpu.dot_dimension_numbers<[1], [0], [0], [1], [0, 0, 1, 1], [], []>} : vector<16x3xf32>, vector<3x64xf32>, vector<16x64xf32> -> vector<16x64xf32>
    %cst_19 = arith.constant 0.000000e+00 : f32
    %18 = vector.broadcast %cst_19 : f32 to vector<2x16xf32>
    %cst_20 = arith.constant 0.000000e+00 : f32
    %19 = vector.broadcast %cst_20 : f32 to vector<2x16xf32>
    %20 = vector.extract_strided_slice %17 {offsets = [0, 0], sizes = [2, 64], strides = [1, 1]} : vector<16x64xf32> to vector<2x64xf32>
    %cst_21 = arith.constant dense<0.000000e+00> : vector<2x64xf32>
    %21 = tpu.matmul %18, %1, %cst_21 {dimension_numbers = #tpu.dot_dimension_numbers<[1], [0], [0], [1], [0, 0, 1, 1], [], []>} : vector<2x16xf32>, vector<16x64xf32>, vector<2x64xf32> -> vector<2x64xf32>
    %22 = arith.addf %20, %21 : vector<2x64xf32>
    %23 = vector.extract_strided_slice %22 {offsets = [0, 0], sizes = [2, 32], strides = [1, 1]} : vector<2x64xf32> to vector<2x32xf32>
    %24 = vector.extract_strided_slice %8 {offsets = [0, 0], sizes = [1, 32], strides = [1, 1]} : vector<1x64xf32> to vector<1x32xf32>
    %25 = vector.broadcast %24 : vector<1x32xf32> to vector<2x32xf32>
    %26 = arith.addf %23, %25 : vector<2x32xf32>
    %27 = arith.negf %26 : vector<2x32xf32>
    %28 = math.exp %27 : vector<2x32xf32>
    %cst_22 = arith.constant 1.000000e+00 : f32
    %29 = vector.broadcast %cst_22 : f32 to vector<2x32xf32>
    %30 = arith.addf %29, %28 : vector<2x32xf32>
    %31 = arith.divf %29, %30 : vector<2x32xf32>
    %32 = vector.extract_strided_slice %31 {offsets = [0, 0], sizes = [2, 16], strides = [1, 1]} : vector<2x32xf32> to vector<2x16xf32>
    %33 = vector.extract_strided_slice %31 {offsets = [0, 16], sizes = [2, 16], strides = [1, 1]} : vector<2x32xf32> to vector<2x16xf32>
    %34 = vector.extract_strided_slice %22 {offsets = [0, 32], sizes = [2, 16], strides = [1, 1]} : vector<2x64xf32> to vector<2x16xf32>
    %35 = vector.extract_strided_slice %8 {offsets = [0, 32], sizes = [1, 16], strides = [1, 1]} : vector<1x64xf32> to vector<1x16xf32>
    %36 = vector.broadcast %35 : vector<1x16xf32> to vector<2x16xf32>
    %37 = arith.addf %34, %36 : vector<2x16xf32>
    %38 = vector.extract_strided_slice %22 {offsets = [0, 48], sizes = [2, 16], strides = [1, 1]} : vector<2x64xf32> to vector<2x16xf32>
    %39 = vector.extract_strided_slice %8 {offsets = [0, 48], sizes = [1, 16], strides = [1, 1]} : vector<1x64xf32> to vector<1x16xf32>
    %40 = vector.broadcast %39 : vector<1x16xf32> to vector<2x16xf32>
    %41 = arith.addf %38, %40 : vector<2x16xf32>
    %42 = arith.mulf %32, %41 : vector<2x16xf32>
    %43 = arith.addf %37, %42 : vector<2x16xf32>
    %44 = math.tanh %43 : vector<2x16xf32>
    %cst_23 = arith.constant 1.000000e+00 : f32
    %45 = vector.broadcast %cst_23 : f32 to vector<2x16xf32>
    %46 = arith.subf %45, %33 : vector<2x16xf32>
    %47 = arith.mulf %46, %44 : vector<2x16xf32>
    %48 = arith.mulf %33, %18 : vector<2x16xf32>
    %49 = arith.addf %47, %48 : vector<2x16xf32>
    %50 = tpu.concatenate %49, %19 in 1 : vector<2x16xf32>, vector<2x16xf32> -> vector<2x32xf32>
    %cst_24 = arith.constant dense<0.000000e+00> : vector<2x64xf32>
    %51 = tpu.matmul %50, %2, %cst_24 {dimension_numbers = #tpu.dot_dimension_numbers<[1], [0], [0], [1], [0, 0, 1, 1], [], []>} : vector<2x32xf32>, vector<32x64xf32>, vector<2x64xf32> -> vector<2x64xf32>
    %52 = vector.extract_strided_slice %51 {offsets = [0, 0], sizes = [2, 32], strides = [1, 1]} : vector<2x64xf32> to vector<2x32xf32>
    %53 = vector.extract_strided_slice %9 {offsets = [0, 0], sizes = [1, 32], strides = [1, 1]} : vector<1x64xf32> to vector<1x32xf32>
    %54 = vector.broadcast %53 : vector<1x32xf32> to vector<2x32xf32>
    %55 = arith.addf %52, %54 : vector<2x32xf32>
    %56 = arith.negf %55 : vector<2x32xf32>
    %57 = math.exp %56 : vector<2x32xf32>
    %cst_25 = arith.constant 1.000000e+00 : f32
    %58 = vector.broadcast %cst_25 : f32 to vector<2x32xf32>
    %59 = arith.addf %58, %57 : vector<2x32xf32>
    %60 = arith.divf %58, %59 : vector<2x32xf32>
    %61 = vector.extract_strided_slice %60 {offsets = [0, 0], sizes = [2, 16], strides = [1, 1]} : vector<2x32xf32> to vector<2x16xf32>
    %62 = vector.extract_strided_slice %60 {offsets = [0, 16], sizes = [2, 16], strides = [1, 1]} : vector<2x32xf32> to vector<2x16xf32>
    %63 = vector.extract_strided_slice %51 {offsets = [0, 32], sizes = [2, 16], strides = [1, 1]} : vector<2x64xf32> to vector<2x16xf32>
    %64 = vector.extract_strided_slice %9 {offsets = [0, 32], sizes = [1, 16], strides = [1, 1]} : vector<1x64xf32> to vector<1x16xf32>
    %65 = vector.broadcast %64 : vector<1x16xf32> to vector<2x16xf32>
    %66 = arith.addf %63, %65 : vector<2x16xf32>
    %67 = vector.extract_strided_slice %51 {offsets = [0, 48], sizes = [2, 16], strides = [1, 1]} : vector<2x64xf32> to vector<2x16xf32>
    %68 = vector.extract_strided_slice %9 {offsets = [0, 48], sizes = [1, 16], strides = [1, 1]} : vector<1x64xf32> to vector<1x16xf32>
    %69 = vector.broadcast %68 : vector<1x16xf32> to vector<2x16xf32>
    %70 = arith.addf %67, %69 : vector<2x16xf32>
    %71 = arith.mulf %61, %70 : vector<2x16xf32>
    %72 = arith.addf %66, %71 : vector<2x16xf32>
    %73 = math.tanh %72 : vector<2x16xf32>
    %cst_26 = arith.constant 1.000000e+00 : f32
    %74 = vector.broadcast %cst_26 : f32 to vector<2x16xf32>
    %75 = arith.subf %74, %62 : vector<2x16xf32>
    %76 = arith.mulf %75, %73 : vector<2x16xf32>
    %77 = arith.mulf %62, %19 : vector<2x16xf32>
    %78 = arith.addf %76, %77 : vector<2x16xf32>
    %79 = vector.extract_strided_slice %17 {offsets = [2, 0], sizes = [2, 64], strides = [1, 1]} : vector<16x64xf32> to vector<2x64xf32>
    %cst_27 = arith.constant dense<0.000000e+00> : vector<2x64xf32>
    %80 = tpu.matmul %49, %1, %cst_27 {dimension_numbers = #tpu.dot_dimension_numbers<[1], [0], [0], [1], [0, 0, 1, 1], [], []>} : vector<2x16xf32>, vector<16x64xf32>, vector<2x64xf32> -> vector<2x64xf32>
    %81 = arith.addf %79, %80 : vector<2x64xf32>
    %82 = vector.extract_strided_slice %81 {offsets = [0, 0], sizes = [2, 32], strides = [1, 1]} : vector<2x64xf32> to vector<2x32xf32>
    %83 = vector.extract_strided_slice %8 {offsets = [0, 0], sizes = [1, 32], strides = [1, 1]} : vector<1x64xf32> to vector<1x32xf32>
    %84 = vector.broadcast %83 : vector<1x32xf32> to vector<2x32xf32>
    %85 = arith.addf %82, %84 : vector<2x32xf32>
    %86 = arith.negf %85 : vector<2x32xf32>
    %87 = math.exp %86 : vector<2x32xf32>
    %cst_28 = arith.constant 1.000000e+00 : f32
    %88 = vector.broadcast %cst_28 : f32 to vector<2x32xf32>
    %89 = arith.addf %88, %87 : vector<2x32xf32>
    %90 = arith.divf %88, %89 : vector<2x32xf32>
    %91 = vector.extract_strided_slice %90 {offsets = [0, 0], sizes = [2, 16], strides = [1, 1]} : vector<2x32xf32> to vector<2x16xf32>
    %92 = vector.extract_strided_slice %90 {offsets = [0, 16], sizes = [2, 16], strides = [1, 1]} : vector<2x32xf32> to vector<2x16xf32>
    %93 = vector.extract_strided_slice %81 {offsets = [0, 32], sizes = [2, 16], strides = [1, 1]} : vector<2x64xf32> to vector<2x16xf32>
    %94 = vector.extract_strided_slice %8 {offsets = [0, 32], sizes = [1, 16], strides = [1, 1]} : vector<1x64xf32> to vector<1x16xf32>
    %95 = vector.broadcast %94 : vector<1x16xf32> to vector<2x16xf32>
    %96 = arith.addf %93, %95 : vector<2x16xf32>
    %97 = vector.extract_strided_slice %81 {offsets = [0, 48], sizes = [2, 16], strides = [1, 1]} : vector<2x64xf32> to vector<2x16xf32>
    %98 = vector.extract_strided_slice %8 {offsets = [0, 48], sizes = [1, 16], strides = [1, 1]} : vector<1x64xf32> to vector<1x16xf32>
    %99 = vector.broadcast %98 : vector<1x16xf32> to vector<2x16xf32>
    %100 = arith.addf %97, %99 : vector<2x16xf32>
    %101 = arith.mulf %91, %100 : vector<2x16xf32>
    %102 = arith.addf %96, %101 : vector<2x16xf32>
    %103 = math.tanh %102 : vector<2x16xf32>
    %cst_29 = arith.constant 1.000000e+00 : f32
    %104 = vector.broadcast %cst_29 : f32 to vector<2x16xf32>
    %105 = arith.subf %104, %92 : vector<2x16xf32>
    %106 = arith.mulf %105, %103 : vector<2x16xf32>
    %107 = arith.mulf %92, %49 : vector<2x16xf32>
    %108 = arith.addf %106, %107 : vector<2x16xf32>
    %109 = tpu.concatenate %108, %78 in 1 : vector<2x16xf32>, vector<2x16xf32> -> vector<2x32xf32>
    %cst_30 = arith.constant dense<0.000000e+00> : vector<2x64xf32>
    %110 = tpu.matmul %109, %2, %cst_30 {dimension_numbers = #tpu.dot_dimension_numbers<[1], [0], [0], [1], [0, 0, 1, 1], [], []>} : vector<2x32xf32>, vector<32x64xf32>, vector<2x64xf32> -> vector<2x64xf32>
    %111 = vector.extract_strided_slice %110 {offsets = [0, 0], sizes = [2, 32], strides = [1, 1]} : vector<2x64xf32> to vector<2x32xf32>
    %112 = vector.extract_strided_slice %9 {offsets = [0, 0], sizes = [1, 32], strides = [1, 1]} : vector<1x64xf32> to vector<1x32xf32>
    %113 = vector.broadcast %112 : vector<1x32xf32> to vector<2x32xf32>
    %114 = arith.addf %111, %113 : vector<2x32xf32>
    %115 = arith.negf %114 : vector<2x32xf32>
    %116 = math.exp %115 : vector<2x32xf32>
    %cst_31 = arith.constant 1.000000e+00 : f32
    %117 = vector.broadcast %cst_31 : f32 to vector<2x32xf32>
    %118 = arith.addf %117, %116 : vector<2x32xf32>
    %119 = arith.divf %117, %118 : vector<2x32xf32>
    %120 = vector.extract_strided_slice %119 {offsets = [0, 0], sizes = [2, 16], strides = [1, 1]} : vector<2x32xf32> to vector<2x16xf32>
    %121 = vector.extract_strided_slice %119 {offsets = [0, 16], sizes = [2, 16], strides = [1, 1]} : vector<2x32xf32> to vector<2x16xf32>
    %122 = vector.extract_strided_slice %110 {offsets = [0, 32], sizes = [2, 16], strides = [1, 1]} : vector<2x64xf32> to vector<2x16xf32>
    %123 = vector.extract_strided_slice %9 {offsets = [0, 32], sizes = [1, 16], strides = [1, 1]} : vector<1x64xf32> to vector<1x16xf32>
    %124 = vector.broadcast %123 : vector<1x16xf32> to vector<2x16xf32>
    %125 = arith.addf %122, %124 : vector<2x16xf32>
    %126 = vector.extract_strided_slice %110 {offsets = [0, 48], sizes = [2, 16], strides = [1, 1]} : vector<2x64xf32> to vector<2x16xf32>
    %127 = vector.extract_strided_slice %9 {offsets = [0, 48], sizes = [1, 16], strides = [1, 1]} : vector<1x64xf32> to vector<1x16xf32>
    %128 = vector.broadcast %127 : vector<1x16xf32> to vector<2x16xf32>
    %129 = arith.addf %126, %128 : vector<2x16xf32>
    %130 = arith.mulf %120, %129 : vector<2x16xf32>
    %131 = arith.addf %125, %130 : vector<2x16xf32>
    %132 = math.tanh %131 : vector<2x16xf32>
    %cst_32 = arith.constant 1.000000e+00 : f32
    %133 = vector.broadcast %cst_32 : f32 to vector<2x16xf32>
    %134 = arith.subf %133, %121 : vector<2x16xf32>
    %135 = arith.mulf %134, %132 : vector<2x16xf32>
    %136 = arith.mulf %121, %78 : vector<2x16xf32>
    %137 = arith.addf %135, %136 : vector<2x16xf32>
    %138 = vector.extract_strided_slice %17 {offsets = [4, 0], sizes = [2, 64], strides = [1, 1]} : vector<16x64xf32> to vector<2x64xf32>
    %cst_33 = arith.constant dense<0.000000e+00> : vector<2x64xf32>
    %139 = tpu.matmul %108, %1, %cst_33 {dimension_numbers = #tpu.dot_dimension_numbers<[1], [0], [0], [1], [0, 0, 1, 1], [], []>} : vector<2x16xf32>, vector<16x64xf32>, vector<2x64xf32> -> vector<2x64xf32>
    %140 = arith.addf %138, %139 : vector<2x64xf32>
    %141 = vector.extract_strided_slice %140 {offsets = [0, 0], sizes = [2, 32], strides = [1, 1]} : vector<2x64xf32> to vector<2x32xf32>
    %142 = vector.extract_strided_slice %8 {offsets = [0, 0], sizes = [1, 32], strides = [1, 1]} : vector<1x64xf32> to vector<1x32xf32>
    %143 = vector.broadcast %142 : vector<1x32xf32> to vector<2x32xf32>
    %144 = arith.addf %141, %143 : vector<2x32xf32>
    %145 = arith.negf %144 : vector<2x32xf32>
    %146 = math.exp %145 : vector<2x32xf32>
    %cst_34 = arith.constant 1.000000e+00 : f32
    %147 = vector.broadcast %cst_34 : f32 to vector<2x32xf32>
    %148 = arith.addf %147, %146 : vector<2x32xf32>
    %149 = arith.divf %147, %148 : vector<2x32xf32>
    %150 = vector.extract_strided_slice %149 {offsets = [0, 0], sizes = [2, 16], strides = [1, 1]} : vector<2x32xf32> to vector<2x16xf32>
    %151 = vector.extract_strided_slice %149 {offsets = [0, 16], sizes = [2, 16], strides = [1, 1]} : vector<2x32xf32> to vector<2x16xf32>
    %152 = vector.extract_strided_slice %140 {offsets = [0, 32], sizes = [2, 16], strides = [1, 1]} : vector<2x64xf32> to vector<2x16xf32>
    %153 = vector.extract_strided_slice %8 {offsets = [0, 32], sizes = [1, 16], strides = [1, 1]} : vector<1x64xf32> to vector<1x16xf32>
    %154 = vector.broadcast %153 : vector<1x16xf32> to vector<2x16xf32>
    %155 = arith.addf %152, %154 : vector<2x16xf32>
    %156 = vector.extract_strided_slice %140 {offsets = [0, 48], sizes = [2, 16], strides = [1, 1]} : vector<2x64xf32> to vector<2x16xf32>
    %157 = vector.extract_strided_slice %8 {offsets = [0, 48], sizes = [1, 16], strides = [1, 1]} : vector<1x64xf32> to vector<1x16xf32>
    %158 = vector.broadcast %157 : vector<1x16xf32> to vector<2x16xf32>
    %159 = arith.addf %156, %158 : vector<2x16xf32>
    %160 = arith.mulf %150, %159 : vector<2x16xf32>
    %161 = arith.addf %155, %160 : vector<2x16xf32>
    %162 = math.tanh %161 : vector<2x16xf32>
    %cst_35 = arith.constant 1.000000e+00 : f32
    %163 = vector.broadcast %cst_35 : f32 to vector<2x16xf32>
    %164 = arith.subf %163, %151 : vector<2x16xf32>
    %165 = arith.mulf %164, %162 : vector<2x16xf32>
    %166 = arith.mulf %151, %108 : vector<2x16xf32>
    %167 = arith.addf %165, %166 : vector<2x16xf32>
    %168 = tpu.concatenate %167, %137 in 1 : vector<2x16xf32>, vector<2x16xf32> -> vector<2x32xf32>
    %cst_36 = arith.constant dense<0.000000e+00> : vector<2x64xf32>
    %169 = tpu.matmul %168, %2, %cst_36 {dimension_numbers = #tpu.dot_dimension_numbers<[1], [0], [0], [1], [0, 0, 1, 1], [], []>} : vector<2x32xf32>, vector<32x64xf32>, vector<2x64xf32> -> vector<2x64xf32>
    %170 = vector.extract_strided_slice %169 {offsets = [0, 0], sizes = [2, 32], strides = [1, 1]} : vector<2x64xf32> to vector<2x32xf32>
    %171 = vector.extract_strided_slice %9 {offsets = [0, 0], sizes = [1, 32], strides = [1, 1]} : vector<1x64xf32> to vector<1x32xf32>
    %172 = vector.broadcast %171 : vector<1x32xf32> to vector<2x32xf32>
    %173 = arith.addf %170, %172 : vector<2x32xf32>
    %174 = arith.negf %173 : vector<2x32xf32>
    %175 = math.exp %174 : vector<2x32xf32>
    %cst_37 = arith.constant 1.000000e+00 : f32
    %176 = vector.broadcast %cst_37 : f32 to vector<2x32xf32>
    %177 = arith.addf %176, %175 : vector<2x32xf32>
    %178 = arith.divf %176, %177 : vector<2x32xf32>
    %179 = vector.extract_strided_slice %178 {offsets = [0, 0], sizes = [2, 16], strides = [1, 1]} : vector<2x32xf32> to vector<2x16xf32>
    %180 = vector.extract_strided_slice %178 {offsets = [0, 16], sizes = [2, 16], strides = [1, 1]} : vector<2x32xf32> to vector<2x16xf32>
    %181 = vector.extract_strided_slice %169 {offsets = [0, 32], sizes = [2, 16], strides = [1, 1]} : vector<2x64xf32> to vector<2x16xf32>
    %182 = vector.extract_strided_slice %9 {offsets = [0, 32], sizes = [1, 16], strides = [1, 1]} : vector<1x64xf32> to vector<1x16xf32>
    %183 = vector.broadcast %182 : vector<1x16xf32> to vector<2x16xf32>
    %184 = arith.addf %181, %183 : vector<2x16xf32>
    %185 = vector.extract_strided_slice %169 {offsets = [0, 48], sizes = [2, 16], strides = [1, 1]} : vector<2x64xf32> to vector<2x16xf32>
    %186 = vector.extract_strided_slice %9 {offsets = [0, 48], sizes = [1, 16], strides = [1, 1]} : vector<1x64xf32> to vector<1x16xf32>
    %187 = vector.broadcast %186 : vector<1x16xf32> to vector<2x16xf32>
    %188 = arith.addf %185, %187 : vector<2x16xf32>
    %189 = arith.mulf %179, %188 : vector<2x16xf32>
    %190 = arith.addf %184, %189 : vector<2x16xf32>
    %191 = math.tanh %190 : vector<2x16xf32>
    %cst_38 = arith.constant 1.000000e+00 : f32
    %192 = vector.broadcast %cst_38 : f32 to vector<2x16xf32>
    %193 = arith.subf %192, %180 : vector<2x16xf32>
    %194 = arith.mulf %193, %191 : vector<2x16xf32>
    %195 = arith.mulf %180, %137 : vector<2x16xf32>
    %196 = arith.addf %194, %195 : vector<2x16xf32>
    %197 = vector.extract_strided_slice %17 {offsets = [6, 0], sizes = [2, 64], strides = [1, 1]} : vector<16x64xf32> to vector<2x64xf32>
    %cst_39 = arith.constant dense<0.000000e+00> : vector<2x64xf32>
    %198 = tpu.matmul %167, %1, %cst_39 {dimension_numbers = #tpu.dot_dimension_numbers<[1], [0], [0], [1], [0, 0, 1, 1], [], []>} : vector<2x16xf32>, vector<16x64xf32>, vector<2x64xf32> -> vector<2x64xf32>
    %199 = arith.addf %197, %198 : vector<2x64xf32>
    %200 = vector.extract_strided_slice %199 {offsets = [0, 0], sizes = [2, 32], strides = [1, 1]} : vector<2x64xf32> to vector<2x32xf32>
    %201 = vector.extract_strided_slice %8 {offsets = [0, 0], sizes = [1, 32], strides = [1, 1]} : vector<1x64xf32> to vector<1x32xf32>
    %202 = vector.broadcast %201 : vector<1x32xf32> to vector<2x32xf32>
    %203 = arith.addf %200, %202 : vector<2x32xf32>
    %204 = arith.negf %203 : vector<2x32xf32>
    %205 = math.exp %204 : vector<2x32xf32>
    %cst_40 = arith.constant 1.000000e+00 : f32
    %206 = vector.broadcast %cst_40 : f32 to vector<2x32xf32>
    %207 = arith.addf %206, %205 : vector<2x32xf32>
    %208 = arith.divf %206, %207 : vector<2x32xf32>
    %209 = vector.extract_strided_slice %208 {offsets = [0, 0], sizes = [2, 16], strides = [1, 1]} : vector<2x32xf32> to vector<2x16xf32>
    %210 = vector.extract_strided_slice %208 {offsets = [0, 16], sizes = [2, 16], strides = [1, 1]} : vector<2x32xf32> to vector<2x16xf32>
    %211 = vector.extract_strided_slice %199 {offsets = [0, 32], sizes = [2, 16], strides = [1, 1]} : vector<2x64xf32> to vector<2x16xf32>
    %212 = vector.extract_strided_slice %8 {offsets = [0, 32], sizes = [1, 16], strides = [1, 1]} : vector<1x64xf32> to vector<1x16xf32>
    %213 = vector.broadcast %212 : vector<1x16xf32> to vector<2x16xf32>
    %214 = arith.addf %211, %213 : vector<2x16xf32>
    %215 = vector.extract_strided_slice %199 {offsets = [0, 48], sizes = [2, 16], strides = [1, 1]} : vector<2x64xf32> to vector<2x16xf32>
    %216 = vector.extract_strided_slice %8 {offsets = [0, 48], sizes = [1, 16], strides = [1, 1]} : vector<1x64xf32> to vector<1x16xf32>
    %217 = vector.broadcast %216 : vector<1x16xf32> to vector<2x16xf32>
    %218 = arith.addf %215, %217 : vector<2x16xf32>
    %219 = arith.mulf %209, %218 : vector<2x16xf32>
    %220 = arith.addf %214, %219 : vector<2x16xf32>
    %221 = math.tanh %220 : vector<2x16xf32>
    %cst_41 = arith.constant 1.000000e+00 : f32
    %222 = vector.broadcast %cst_41 : f32 to vector<2x16xf32>
    %223 = arith.subf %222, %210 : vector<2x16xf32>
    %224 = arith.mulf %223, %221 : vector<2x16xf32>
    %225 = arith.mulf %210, %167 : vector<2x16xf32>
    %226 = arith.addf %224, %225 : vector<2x16xf32>
    %227 = tpu.concatenate %226, %196 in 1 : vector<2x16xf32>, vector<2x16xf32> -> vector<2x32xf32>
    %cst_42 = arith.constant dense<0.000000e+00> : vector<2x64xf32>
    %228 = tpu.matmul %227, %2, %cst_42 {dimension_numbers = #tpu.dot_dimension_numbers<[1], [0], [0], [1], [0, 0, 1, 1], [], []>} : vector<2x32xf32>, vector<32x64xf32>, vector<2x64xf32> -> vector<2x64xf32>
    %229 = vector.extract_strided_slice %228 {offsets = [0, 0], sizes = [2, 32], strides = [1, 1]} : vector<2x64xf32> to vector<2x32xf32>
    %230 = vector.extract_strided_slice %9 {offsets = [0, 0], sizes = [1, 32], strides = [1, 1]} : vector<1x64xf32> to vector<1x32xf32>
    %231 = vector.broadcast %230 : vector<1x32xf32> to vector<2x32xf32>
    %232 = arith.addf %229, %231 : vector<2x32xf32>
    %233 = arith.negf %232 : vector<2x32xf32>
    %234 = math.exp %233 : vector<2x32xf32>
    %cst_43 = arith.constant 1.000000e+00 : f32
    %235 = vector.broadcast %cst_43 : f32 to vector<2x32xf32>
    %236 = arith.addf %235, %234 : vector<2x32xf32>
    %237 = arith.divf %235, %236 : vector<2x32xf32>
    %238 = vector.extract_strided_slice %237 {offsets = [0, 0], sizes = [2, 16], strides = [1, 1]} : vector<2x32xf32> to vector<2x16xf32>
    %239 = vector.extract_strided_slice %237 {offsets = [0, 16], sizes = [2, 16], strides = [1, 1]} : vector<2x32xf32> to vector<2x16xf32>
    %240 = vector.extract_strided_slice %228 {offsets = [0, 32], sizes = [2, 16], strides = [1, 1]} : vector<2x64xf32> to vector<2x16xf32>
    %241 = vector.extract_strided_slice %9 {offsets = [0, 32], sizes = [1, 16], strides = [1, 1]} : vector<1x64xf32> to vector<1x16xf32>
    %242 = vector.broadcast %241 : vector<1x16xf32> to vector<2x16xf32>
    %243 = arith.addf %240, %242 : vector<2x16xf32>
    %244 = vector.extract_strided_slice %228 {offsets = [0, 48], sizes = [2, 16], strides = [1, 1]} : vector<2x64xf32> to vector<2x16xf32>
    %245 = vector.extract_strided_slice %9 {offsets = [0, 48], sizes = [1, 16], strides = [1, 1]} : vector<1x64xf32> to vector<1x16xf32>
    %246 = vector.broadcast %245 : vector<1x16xf32> to vector<2x16xf32>
    %247 = arith.addf %244, %246 : vector<2x16xf32>
    %248 = arith.mulf %238, %247 : vector<2x16xf32>
    %249 = arith.addf %243, %248 : vector<2x16xf32>
    %250 = math.tanh %249 : vector<2x16xf32>
    %cst_44 = arith.constant 1.000000e+00 : f32
    %251 = vector.broadcast %cst_44 : f32 to vector<2x16xf32>
    %252 = arith.subf %251, %239 : vector<2x16xf32>
    %253 = arith.mulf %252, %250 : vector<2x16xf32>
    %254 = arith.mulf %239, %196 : vector<2x16xf32>
    %255 = arith.addf %253, %254 : vector<2x16xf32>
    %256 = vector.extract_strided_slice %17 {offsets = [8, 0], sizes = [2, 64], strides = [1, 1]} : vector<16x64xf32> to vector<2x64xf32>
    %cst_45 = arith.constant dense<0.000000e+00> : vector<2x64xf32>
    %257 = tpu.matmul %226, %1, %cst_45 {dimension_numbers = #tpu.dot_dimension_numbers<[1], [0], [0], [1], [0, 0, 1, 1], [], []>} : vector<2x16xf32>, vector<16x64xf32>, vector<2x64xf32> -> vector<2x64xf32>
    %258 = arith.addf %256, %257 : vector<2x64xf32>
    %259 = vector.extract_strided_slice %258 {offsets = [0, 0], sizes = [2, 32], strides = [1, 1]} : vector<2x64xf32> to vector<2x32xf32>
    %260 = vector.extract_strided_slice %8 {offsets = [0, 0], sizes = [1, 32], strides = [1, 1]} : vector<1x64xf32> to vector<1x32xf32>
    %261 = vector.broadcast %260 : vector<1x32xf32> to vector<2x32xf32>
    %262 = arith.addf %259, %261 : vector<2x32xf32>
    %263 = arith.negf %262 : vector<2x32xf32>
    %264 = math.exp %263 : vector<2x32xf32>
    %cst_46 = arith.constant 1.000000e+00 : f32
    %265 = vector.broadcast %cst_46 : f32 to vector<2x32xf32>
    %266 = arith.addf %265, %264 : vector<2x32xf32>
    %267 = arith.divf %265, %266 : vector<2x32xf32>
    %268 = vector.extract_strided_slice %267 {offsets = [0, 0], sizes = [2, 16], strides = [1, 1]} : vector<2x32xf32> to vector<2x16xf32>
    %269 = vector.extract_strided_slice %267 {offsets = [0, 16], sizes = [2, 16], strides = [1, 1]} : vector<2x32xf32> to vector<2x16xf32>
    %270 = vector.extract_strided_slice %258 {offsets = [0, 32], sizes = [2, 16], strides = [1, 1]} : vector<2x64xf32> to vector<2x16xf32>
    %271 = vector.extract_strided_slice %8 {offsets = [0, 32], sizes = [1, 16], strides = [1, 1]} : vector<1x64xf32> to vector<1x16xf32>
    %272 = vector.broadcast %271 : vector<1x16xf32> to vector<2x16xf32>
    %273 = arith.addf %270, %272 : vector<2x16xf32>
    %274 = vector.extract_strided_slice %258 {offsets = [0, 48], sizes = [2, 16], strides = [1, 1]} : vector<2x64xf32> to vector<2x16xf32>
    %275 = vector.extract_strided_slice %8 {offsets = [0, 48], sizes = [1, 16], strides = [1, 1]} : vector<1x64xf32> to vector<1x16xf32>
    %276 = vector.broadcast %275 : vector<1x16xf32> to vector<2x16xf32>
    %277 = arith.addf %274, %276 : vector<2x16xf32>
    %278 = arith.mulf %268, %277 : vector<2x16xf32>
    %279 = arith.addf %273, %278 : vector<2x16xf32>
    %280 = math.tanh %279 : vector<2x16xf32>
    %cst_47 = arith.constant 1.000000e+00 : f32
    %281 = vector.broadcast %cst_47 : f32 to vector<2x16xf32>
    %282 = arith.subf %281, %269 : vector<2x16xf32>
    %283 = arith.mulf %282, %280 : vector<2x16xf32>
    %284 = arith.mulf %269, %226 : vector<2x16xf32>
    %285 = arith.addf %283, %284 : vector<2x16xf32>
    %286 = tpu.concatenate %285, %255 in 1 : vector<2x16xf32>, vector<2x16xf32> -> vector<2x32xf32>
    %cst_48 = arith.constant dense<0.000000e+00> : vector<2x64xf32>
    %287 = tpu.matmul %286, %2, %cst_48 {dimension_numbers = #tpu.dot_dimension_numbers<[1], [0], [0], [1], [0, 0, 1, 1], [], []>} : vector<2x32xf32>, vector<32x64xf32>, vector<2x64xf32> -> vector<2x64xf32>
    %288 = vector.extract_strided_slice %287 {offsets = [0, 0], sizes = [2, 32], strides = [1, 1]} : vector<2x64xf32> to vector<2x32xf32>
    %289 = vector.extract_strided_slice %9 {offsets = [0, 0], sizes = [1, 32], strides = [1, 1]} : vector<1x64xf32> to vector<1x32xf32>
    %290 = vector.broadcast %289 : vector<1x32xf32> to vector<2x32xf32>
    %291 = arith.addf %288, %290 : vector<2x32xf32>
    %292 = arith.negf %291 : vector<2x32xf32>
    %293 = math.exp %292 : vector<2x32xf32>
    %cst_49 = arith.constant 1.000000e+00 : f32
    %294 = vector.broadcast %cst_49 : f32 to vector<2x32xf32>
    %295 = arith.addf %294, %293 : vector<2x32xf32>
    %296 = arith.divf %294, %295 : vector<2x32xf32>
    %297 = vector.extract_strided_slice %296 {offsets = [0, 0], sizes = [2, 16], strides = [1, 1]} : vector<2x32xf32> to vector<2x16xf32>
    %298 = vector.extract_strided_slice %296 {offsets = [0, 16], sizes = [2, 16], strides = [1, 1]} : vector<2x32xf32> to vector<2x16xf32>
    %299 = vector.extract_strided_slice %287 {offsets = [0, 32], sizes = [2, 16], strides = [1, 1]} : vector<2x64xf32> to vector<2x16xf32>
    %300 = vector.extract_strided_slice %9 {offsets = [0, 32], sizes = [1, 16], strides = [1, 1]} : vector<1x64xf32> to vector<1x16xf32>
    %301 = vector.broadcast %300 : vector<1x16xf32> to vector<2x16xf32>
    %302 = arith.addf %299, %301 : vector<2x16xf32>
    %303 = vector.extract_strided_slice %287 {offsets = [0, 48], sizes = [2, 16], strides = [1, 1]} : vector<2x64xf32> to vector<2x16xf32>
    %304 = vector.extract_strided_slice %9 {offsets = [0, 48], sizes = [1, 16], strides = [1, 1]} : vector<1x64xf32> to vector<1x16xf32>
    %305 = vector.broadcast %304 : vector<1x16xf32> to vector<2x16xf32>
    %306 = arith.addf %303, %305 : vector<2x16xf32>
    %307 = arith.mulf %297, %306 : vector<2x16xf32>
    %308 = arith.addf %302, %307 : vector<2x16xf32>
    %309 = math.tanh %308 : vector<2x16xf32>
    %cst_50 = arith.constant 1.000000e+00 : f32
    %310 = vector.broadcast %cst_50 : f32 to vector<2x16xf32>
    %311 = arith.subf %310, %298 : vector<2x16xf32>
    %312 = arith.mulf %311, %309 : vector<2x16xf32>
    %313 = arith.mulf %298, %255 : vector<2x16xf32>
    %314 = arith.addf %312, %313 : vector<2x16xf32>
    %315 = vector.extract_strided_slice %17 {offsets = [10, 0], sizes = [2, 64], strides = [1, 1]} : vector<16x64xf32> to vector<2x64xf32>
    %cst_51 = arith.constant dense<0.000000e+00> : vector<2x64xf32>
    %316 = tpu.matmul %285, %1, %cst_51 {dimension_numbers = #tpu.dot_dimension_numbers<[1], [0], [0], [1], [0, 0, 1, 1], [], []>} : vector<2x16xf32>, vector<16x64xf32>, vector<2x64xf32> -> vector<2x64xf32>
    %317 = arith.addf %315, %316 : vector<2x64xf32>
    %318 = vector.extract_strided_slice %317 {offsets = [0, 0], sizes = [2, 32], strides = [1, 1]} : vector<2x64xf32> to vector<2x32xf32>
    %319 = vector.extract_strided_slice %8 {offsets = [0, 0], sizes = [1, 32], strides = [1, 1]} : vector<1x64xf32> to vector<1x32xf32>
    %320 = vector.broadcast %319 : vector<1x32xf32> to vector<2x32xf32>
    %321 = arith.addf %318, %320 : vector<2x32xf32>
    %322 = arith.negf %321 : vector<2x32xf32>
    %323 = math.exp %322 : vector<2x32xf32>
    %cst_52 = arith.constant 1.000000e+00 : f32
    %324 = vector.broadcast %cst_52 : f32 to vector<2x32xf32>
    %325 = arith.addf %324, %323 : vector<2x32xf32>
    %326 = arith.divf %324, %325 : vector<2x32xf32>
    %327 = vector.extract_strided_slice %326 {offsets = [0, 0], sizes = [2, 16], strides = [1, 1]} : vector<2x32xf32> to vector<2x16xf32>
    %328 = vector.extract_strided_slice %326 {offsets = [0, 16], sizes = [2, 16], strides = [1, 1]} : vector<2x32xf32> to vector<2x16xf32>
    %329 = vector.extract_strided_slice %317 {offsets = [0, 32], sizes = [2, 16], strides = [1, 1]} : vector<2x64xf32> to vector<2x16xf32>
    %330 = vector.extract_strided_slice %8 {offsets = [0, 32], sizes = [1, 16], strides = [1, 1]} : vector<1x64xf32> to vector<1x16xf32>
    %331 = vector.broadcast %330 : vector<1x16xf32> to vector<2x16xf32>
    %332 = arith.addf %329, %331 : vector<2x16xf32>
    %333 = vector.extract_strided_slice %317 {offsets = [0, 48], sizes = [2, 16], strides = [1, 1]} : vector<2x64xf32> to vector<2x16xf32>
    %334 = vector.extract_strided_slice %8 {offsets = [0, 48], sizes = [1, 16], strides = [1, 1]} : vector<1x64xf32> to vector<1x16xf32>
    %335 = vector.broadcast %334 : vector<1x16xf32> to vector<2x16xf32>
    %336 = arith.addf %333, %335 : vector<2x16xf32>
    %337 = arith.mulf %327, %336 : vector<2x16xf32>
    %338 = arith.addf %332, %337 : vector<2x16xf32>
    %339 = math.tanh %338 : vector<2x16xf32>
    %cst_53 = arith.constant 1.000000e+00 : f32
    %340 = vector.broadcast %cst_53 : f32 to vector<2x16xf32>
    %341 = arith.subf %340, %328 : vector<2x16xf32>
    %342 = arith.mulf %341, %339 : vector<2x16xf32>
    %343 = arith.mulf %328, %285 : vector<2x16xf32>
    %344 = arith.addf %342, %343 : vector<2x16xf32>
    %345 = tpu.concatenate %344, %314 in 1 : vector<2x16xf32>, vector<2x16xf32> -> vector<2x32xf32>
    %cst_54 = arith.constant dense<0.000000e+00> : vector<2x64xf32>
    %346 = tpu.matmul %345, %2, %cst_54 {dimension_numbers = #tpu.dot_dimension_numbers<[1], [0], [0], [1], [0, 0, 1, 1], [], []>} : vector<2x32xf32>, vector<32x64xf32>, vector<2x64xf32> -> vector<2x64xf32>
    %347 = vector.extract_strided_slice %346 {offsets = [0, 0], sizes = [2, 32], strides = [1, 1]} : vector<2x64xf32> to vector<2x32xf32>
    %348 = vector.extract_strided_slice %9 {offsets = [0, 0], sizes = [1, 32], strides = [1, 1]} : vector<1x64xf32> to vector<1x32xf32>
    %349 = vector.broadcast %348 : vector<1x32xf32> to vector<2x32xf32>
    %350 = arith.addf %347, %349 : vector<2x32xf32>
    %351 = arith.negf %350 : vector<2x32xf32>
    %352 = math.exp %351 : vector<2x32xf32>
    %cst_55 = arith.constant 1.000000e+00 : f32
    %353 = vector.broadcast %cst_55 : f32 to vector<2x32xf32>
    %354 = arith.addf %353, %352 : vector<2x32xf32>
    %355 = arith.divf %353, %354 : vector<2x32xf32>
    %356 = vector.extract_strided_slice %355 {offsets = [0, 0], sizes = [2, 16], strides = [1, 1]} : vector<2x32xf32> to vector<2x16xf32>
    %357 = vector.extract_strided_slice %355 {offsets = [0, 16], sizes = [2, 16], strides = [1, 1]} : vector<2x32xf32> to vector<2x16xf32>
    %358 = vector.extract_strided_slice %346 {offsets = [0, 32], sizes = [2, 16], strides = [1, 1]} : vector<2x64xf32> to vector<2x16xf32>
    %359 = vector.extract_strided_slice %9 {offsets = [0, 32], sizes = [1, 16], strides = [1, 1]} : vector<1x64xf32> to vector<1x16xf32>
    %360 = vector.broadcast %359 : vector<1x16xf32> to vector<2x16xf32>
    %361 = arith.addf %358, %360 : vector<2x16xf32>
    %362 = vector.extract_strided_slice %346 {offsets = [0, 48], sizes = [2, 16], strides = [1, 1]} : vector<2x64xf32> to vector<2x16xf32>
    %363 = vector.extract_strided_slice %9 {offsets = [0, 48], sizes = [1, 16], strides = [1, 1]} : vector<1x64xf32> to vector<1x16xf32>
    %364 = vector.broadcast %363 : vector<1x16xf32> to vector<2x16xf32>
    %365 = arith.addf %362, %364 : vector<2x16xf32>
    %366 = arith.mulf %356, %365 : vector<2x16xf32>
    %367 = arith.addf %361, %366 : vector<2x16xf32>
    %368 = math.tanh %367 : vector<2x16xf32>
    %cst_56 = arith.constant 1.000000e+00 : f32
    %369 = vector.broadcast %cst_56 : f32 to vector<2x16xf32>
    %370 = arith.subf %369, %357 : vector<2x16xf32>
    %371 = arith.mulf %370, %368 : vector<2x16xf32>
    %372 = arith.mulf %357, %314 : vector<2x16xf32>
    %373 = arith.addf %371, %372 : vector<2x16xf32>
    %374 = vector.extract_strided_slice %17 {offsets = [12, 0], sizes = [2, 64], strides = [1, 1]} : vector<16x64xf32> to vector<2x64xf32>
    %cst_57 = arith.constant dense<0.000000e+00> : vector<2x64xf32>
    %375 = tpu.matmul %344, %1, %cst_57 {dimension_numbers = #tpu.dot_dimension_numbers<[1], [0], [0], [1], [0, 0, 1, 1], [], []>} : vector<2x16xf32>, vector<16x64xf32>, vector<2x64xf32> -> vector<2x64xf32>
    %376 = arith.addf %374, %375 : vector<2x64xf32>
    %377 = vector.extract_strided_slice %376 {offsets = [0, 0], sizes = [2, 32], strides = [1, 1]} : vector<2x64xf32> to vector<2x32xf32>
    %378 = vector.extract_strided_slice %8 {offsets = [0, 0], sizes = [1, 32], strides = [1, 1]} : vector<1x64xf32> to vector<1x32xf32>
    %379 = vector.broadcast %378 : vector<1x32xf32> to vector<2x32xf32>
    %380 = arith.addf %377, %379 : vector<2x32xf32>
    %381 = arith.negf %380 : vector<2x32xf32>
    %382 = math.exp %381 : vector<2x32xf32>
    %cst_58 = arith.constant 1.000000e+00 : f32
    %383 = vector.broadcast %cst_58 : f32 to vector<2x32xf32>
    %384 = arith.addf %383, %382 : vector<2x32xf32>
    %385 = arith.divf %383, %384 : vector<2x32xf32>
    %386 = vector.extract_strided_slice %385 {offsets = [0, 0], sizes = [2, 16], strides = [1, 1]} : vector<2x32xf32> to vector<2x16xf32>
    %387 = vector.extract_strided_slice %385 {offsets = [0, 16], sizes = [2, 16], strides = [1, 1]} : vector<2x32xf32> to vector<2x16xf32>
    %388 = vector.extract_strided_slice %376 {offsets = [0, 32], sizes = [2, 16], strides = [1, 1]} : vector<2x64xf32> to vector<2x16xf32>
    %389 = vector.extract_strided_slice %8 {offsets = [0, 32], sizes = [1, 16], strides = [1, 1]} : vector<1x64xf32> to vector<1x16xf32>
    %390 = vector.broadcast %389 : vector<1x16xf32> to vector<2x16xf32>
    %391 = arith.addf %388, %390 : vector<2x16xf32>
    %392 = vector.extract_strided_slice %376 {offsets = [0, 48], sizes = [2, 16], strides = [1, 1]} : vector<2x64xf32> to vector<2x16xf32>
    %393 = vector.extract_strided_slice %8 {offsets = [0, 48], sizes = [1, 16], strides = [1, 1]} : vector<1x64xf32> to vector<1x16xf32>
    %394 = vector.broadcast %393 : vector<1x16xf32> to vector<2x16xf32>
    %395 = arith.addf %392, %394 : vector<2x16xf32>
    %396 = arith.mulf %386, %395 : vector<2x16xf32>
    %397 = arith.addf %391, %396 : vector<2x16xf32>
    %398 = math.tanh %397 : vector<2x16xf32>
    %cst_59 = arith.constant 1.000000e+00 : f32
    %399 = vector.broadcast %cst_59 : f32 to vector<2x16xf32>
    %400 = arith.subf %399, %387 : vector<2x16xf32>
    %401 = arith.mulf %400, %398 : vector<2x16xf32>
    %402 = arith.mulf %387, %344 : vector<2x16xf32>
    %403 = arith.addf %401, %402 : vector<2x16xf32>
    %404 = tpu.concatenate %403, %373 in 1 : vector<2x16xf32>, vector<2x16xf32> -> vector<2x32xf32>
    %cst_60 = arith.constant dense<0.000000e+00> : vector<2x64xf32>
    %405 = tpu.matmul %404, %2, %cst_60 {dimension_numbers = #tpu.dot_dimension_numbers<[1], [0], [0], [1], [0, 0, 1, 1], [], []>} : vector<2x32xf32>, vector<32x64xf32>, vector<2x64xf32> -> vector<2x64xf32>
    %406 = vector.extract_strided_slice %405 {offsets = [0, 0], sizes = [2, 32], strides = [1, 1]} : vector<2x64xf32> to vector<2x32xf32>
    %407 = vector.extract_strided_slice %9 {offsets = [0, 0], sizes = [1, 32], strides = [1, 1]} : vector<1x64xf32> to vector<1x32xf32>
    %408 = vector.broadcast %407 : vector<1x32xf32> to vector<2x32xf32>
    %409 = arith.addf %406, %408 : vector<2x32xf32>
    %410 = arith.negf %409 : vector<2x32xf32>
    %411 = math.exp %410 : vector<2x32xf32>
    %cst_61 = arith.constant 1.000000e+00 : f32
    %412 = vector.broadcast %cst_61 : f32 to vector<2x32xf32>
    %413 = arith.addf %412, %411 : vector<2x32xf32>
    %414 = arith.divf %412, %413 : vector<2x32xf32>
    %415 = vector.extract_strided_slice %414 {offsets = [0, 0], sizes = [2, 16], strides = [1, 1]} : vector<2x32xf32> to vector<2x16xf32>
    %416 = vector.extract_strided_slice %414 {offsets = [0, 16], sizes = [2, 16], strides = [1, 1]} : vector<2x32xf32> to vector<2x16xf32>
    %417 = vector.extract_strided_slice %405 {offsets = [0, 32], sizes = [2, 16], strides = [1, 1]} : vector<2x64xf32> to vector<2x16xf32>
    %418 = vector.extract_strided_slice %9 {offsets = [0, 32], sizes = [1, 16], strides = [1, 1]} : vector<1x64xf32> to vector<1x16xf32>
    %419 = vector.broadcast %418 : vector<1x16xf32> to vector<2x16xf32>
    %420 = arith.addf %417, %419 : vector<2x16xf32>
    %421 = vector.extract_strided_slice %405 {offsets = [0, 48], sizes = [2, 16], strides = [1, 1]} : vector<2x64xf32> to vector<2x16xf32>
    %422 = vector.extract_strided_slice %9 {offsets = [0, 48], sizes = [1, 16], strides = [1, 1]} : vector<1x64xf32> to vector<1x16xf32>
    %423 = vector.broadcast %422 : vector<1x16xf32> to vector<2x16xf32>
    %424 = arith.addf %421, %423 : vector<2x16xf32>
    %425 = arith.mulf %415, %424 : vector<2x16xf32>
    %426 = arith.addf %420, %425 : vector<2x16xf32>
    %427 = math.tanh %426 : vector<2x16xf32>
    %cst_62 = arith.constant 1.000000e+00 : f32
    %428 = vector.broadcast %cst_62 : f32 to vector<2x16xf32>
    %429 = arith.subf %428, %416 : vector<2x16xf32>
    %430 = arith.mulf %429, %427 : vector<2x16xf32>
    %431 = arith.mulf %416, %373 : vector<2x16xf32>
    %432 = arith.addf %430, %431 : vector<2x16xf32>
    %433 = vector.extract_strided_slice %17 {offsets = [14, 0], sizes = [2, 64], strides = [1, 1]} : vector<16x64xf32> to vector<2x64xf32>
    %cst_63 = arith.constant dense<0.000000e+00> : vector<2x64xf32>
    %434 = tpu.matmul %403, %1, %cst_63 {dimension_numbers = #tpu.dot_dimension_numbers<[1], [0], [0], [1], [0, 0, 1, 1], [], []>} : vector<2x16xf32>, vector<16x64xf32>, vector<2x64xf32> -> vector<2x64xf32>
    %435 = arith.addf %433, %434 : vector<2x64xf32>
    %436 = vector.extract_strided_slice %435 {offsets = [0, 0], sizes = [2, 32], strides = [1, 1]} : vector<2x64xf32> to vector<2x32xf32>
    %437 = vector.extract_strided_slice %8 {offsets = [0, 0], sizes = [1, 32], strides = [1, 1]} : vector<1x64xf32> to vector<1x32xf32>
    %438 = vector.broadcast %437 : vector<1x32xf32> to vector<2x32xf32>
    %439 = arith.addf %436, %438 : vector<2x32xf32>
    %440 = arith.negf %439 : vector<2x32xf32>
    %441 = math.exp %440 : vector<2x32xf32>
    %cst_64 = arith.constant 1.000000e+00 : f32
    %442 = vector.broadcast %cst_64 : f32 to vector<2x32xf32>
    %443 = arith.addf %442, %441 : vector<2x32xf32>
    %444 = arith.divf %442, %443 : vector<2x32xf32>
    %445 = vector.extract_strided_slice %444 {offsets = [0, 0], sizes = [2, 16], strides = [1, 1]} : vector<2x32xf32> to vector<2x16xf32>
    %446 = vector.extract_strided_slice %444 {offsets = [0, 16], sizes = [2, 16], strides = [1, 1]} : vector<2x32xf32> to vector<2x16xf32>
    %447 = vector.extract_strided_slice %435 {offsets = [0, 32], sizes = [2, 16], strides = [1, 1]} : vector<2x64xf32> to vector<2x16xf32>
    %448 = vector.extract_strided_slice %8 {offsets = [0, 32], sizes = [1, 16], strides = [1, 1]} : vector<1x64xf32> to vector<1x16xf32>
    %449 = vector.broadcast %448 : vector<1x16xf32> to vector<2x16xf32>
    %450 = arith.addf %447, %449 : vector<2x16xf32>
    %451 = vector.extract_strided_slice %435 {offsets = [0, 48], sizes = [2, 16], strides = [1, 1]} : vector<2x64xf32> to vector<2x16xf32>
    %452 = vector.extract_strided_slice %8 {offsets = [0, 48], sizes = [1, 16], strides = [1, 1]} : vector<1x64xf32> to vector<1x16xf32>
    %453 = vector.broadcast %452 : vector<1x16xf32> to vector<2x16xf32>
    %454 = arith.addf %451, %453 : vector<2x16xf32>
    %455 = arith.mulf %445, %454 : vector<2x16xf32>
    %456 = arith.addf %450, %455 : vector<2x16xf32>
    %457 = math.tanh %456 : vector<2x16xf32>
    %cst_65 = arith.constant 1.000000e+00 : f32
    %458 = vector.broadcast %cst_65 : f32 to vector<2x16xf32>
    %459 = arith.subf %458, %446 : vector<2x16xf32>
    %460 = arith.mulf %459, %457 : vector<2x16xf32>
    %461 = arith.mulf %446, %403 : vector<2x16xf32>
    %462 = arith.addf %460, %461 : vector<2x16xf32>
    %463 = tpu.concatenate %462, %432 in 1 : vector<2x16xf32>, vector<2x16xf32> -> vector<2x32xf32>
    %cst_66 = arith.constant dense<0.000000e+00> : vector<2x64xf32>
    %464 = tpu.matmul %463, %2, %cst_66 {dimension_numbers = #tpu.dot_dimension_numbers<[1], [0], [0], [1], [0, 0, 1, 1], [], []>} : vector<2x32xf32>, vector<32x64xf32>, vector<2x64xf32> -> vector<2x64xf32>
    %465 = vector.extract_strided_slice %464 {offsets = [0, 0], sizes = [2, 32], strides = [1, 1]} : vector<2x64xf32> to vector<2x32xf32>
    %466 = vector.extract_strided_slice %9 {offsets = [0, 0], sizes = [1, 32], strides = [1, 1]} : vector<1x64xf32> to vector<1x32xf32>
    %467 = vector.broadcast %466 : vector<1x32xf32> to vector<2x32xf32>
    %468 = arith.addf %465, %467 : vector<2x32xf32>
    %469 = arith.negf %468 : vector<2x32xf32>
    %470 = math.exp %469 : vector<2x32xf32>
    %cst_67 = arith.constant 1.000000e+00 : f32
    %471 = vector.broadcast %cst_67 : f32 to vector<2x32xf32>
    %472 = arith.addf %471, %470 : vector<2x32xf32>
    %473 = arith.divf %471, %472 : vector<2x32xf32>
    %474 = vector.extract_strided_slice %473 {offsets = [0, 0], sizes = [2, 16], strides = [1, 1]} : vector<2x32xf32> to vector<2x16xf32>
    %475 = vector.extract_strided_slice %473 {offsets = [0, 16], sizes = [2, 16], strides = [1, 1]} : vector<2x32xf32> to vector<2x16xf32>
    %476 = vector.extract_strided_slice %464 {offsets = [0, 32], sizes = [2, 16], strides = [1, 1]} : vector<2x64xf32> to vector<2x16xf32>
    %477 = vector.extract_strided_slice %9 {offsets = [0, 32], sizes = [1, 16], strides = [1, 1]} : vector<1x64xf32> to vector<1x16xf32>
    %478 = vector.broadcast %477 : vector<1x16xf32> to vector<2x16xf32>
    %479 = arith.addf %476, %478 : vector<2x16xf32>
    %480 = vector.extract_strided_slice %464 {offsets = [0, 48], sizes = [2, 16], strides = [1, 1]} : vector<2x64xf32> to vector<2x16xf32>
    %481 = vector.extract_strided_slice %9 {offsets = [0, 48], sizes = [1, 16], strides = [1, 1]} : vector<1x64xf32> to vector<1x16xf32>
    %482 = vector.broadcast %481 : vector<1x16xf32> to vector<2x16xf32>
    %483 = arith.addf %480, %482 : vector<2x16xf32>
    %484 = arith.mulf %474, %483 : vector<2x16xf32>
    %485 = arith.addf %479, %484 : vector<2x16xf32>
    %486 = math.tanh %485 : vector<2x16xf32>
    %cst_68 = arith.constant 1.000000e+00 : f32
    %487 = vector.broadcast %cst_68 : f32 to vector<2x16xf32>
    %488 = arith.subf %487, %475 : vector<2x16xf32>
    %489 = arith.mulf %488, %486 : vector<2x16xf32>
    %490 = arith.mulf %475, %432 : vector<2x16xf32>
    %491 = arith.addf %489, %490 : vector<2x16xf32>
    %492 = tpu.concatenate %462, %491 in 1 : vector<2x16xf32>, vector<2x16xf32> -> vector<2x32xf32>
    %cst_69 = arith.constant dense<0.000000e+00> : vector<2x16xf32>
    %493 = tpu.matmul %492, %5, %cst_69 {dimension_numbers = #tpu.dot_dimension_numbers<[1], [0], [0], [1], [0, 0, 1, 1], [], []>} : vector<2x32xf32>, vector<32x16xf32>, vector<2x16xf32> -> vector<2x16xf32>
    %494 = vector.broadcast %12 : vector<1x16xf32> to vector<2x16xf32>
    %495 = arith.addf %493, %494 : vector<2x16xf32>
    %cst_70 = arith.constant dense<0.000000e+00> : vector<2x32xf32>
    %496 = tpu.matmul %495, %6, %cst_70 {dimension_numbers = #tpu.dot_dimension_numbers<[1], [0], [0], [1], [0, 0, 1, 1], [], []>} : vector<2x16xf32>, vector<16x32xf32>, vector<2x32xf32> -> vector<2x32xf32>
    %497 = vector.broadcast %13 : vector<1x32xf32> to vector<2x32xf32>
    %498 = arith.addf %496, %497 : vector<2x32xf32>
    %499 = vector.extract_strided_slice %498 {offsets = [0, 0], sizes = [1, 32], strides = [1, 1]} : vector<2x32xf32> to vector<1x32xf32>
    %500 = vector.shape_cast %499 : vector<1x32xf32> to vector<1x32xf32>
    %501 = vector.broadcast %500 : vector<1x32xf32> to vector<5x32xf32>
    %502 = vector.extract_strided_slice %498 {offsets = [1, 0], sizes = [1, 32], strides = [1, 1]} : vector<2x32xf32> to vector<1x32xf32>
    %503 = vector.shape_cast %502 : vector<1x32xf32> to vector<1x32xf32>
    %504 = vector.broadcast %503 : vector<1x32xf32> to vector<5x32xf32>
    %505 = tpu.concatenate %501, %504 in 0 : vector<5x32xf32>, vector<5x32xf32> -> vector<10x32xf32>
    %c0_71 = arith.constant 0 : index
    %c0_72 = arith.constant 0 : index
    %506 = vector.load %arg2[%c0_71, %c0_72] : memref<10x1xf32, #tpu.memory_space<vmem>>, vector<10x1xf32>
    %507 = vector.broadcast %506 : vector<10x1xf32> to vector<10x32xf32>
    %508 = vector.broadcast %15 : vector<1x32xf32> to vector<10x32xf32>
    %509 = arith.mulf %507, %508 : vector<10x32xf32>
    %510 = arith.addf %505, %509 : vector<10x32xf32>
    %511 = vector.extract_strided_slice %510 {offsets = [0, 0], sizes = [10, 16], strides = [1, 1]} : vector<10x32xf32> to vector<10x16xf32>
    %512 = vector.extract_strided_slice %510 {offsets = [0, 16], sizes = [10, 16], strides = [1, 1]} : vector<10x32xf32> to vector<10x16xf32>
    %c0_73 = arith.constant 0 : index
    %c0_74 = arith.constant 0 : index
    %513 = vector.load %arg1[%c0_73, %c0_74] : memref<2x3xf32, #tpu.memory_space<vmem>>, vector<2x3xf32>
    %514 = vector.extract_strided_slice %513 {offsets = [0, 0], sizes = [1, 3], strides = [1, 1]} : vector<2x3xf32> to vector<1x3xf32>
    %515 = vector.shape_cast %514 : vector<1x3xf32> to vector<1x3xf32>
    %516 = vector.broadcast %515 : vector<1x3xf32> to vector<5x3xf32>
    %517 = vector.extract_strided_slice %513 {offsets = [1, 0], sizes = [1, 3], strides = [1, 1]} : vector<2x3xf32> to vector<1x3xf32>
    %518 = vector.shape_cast %517 : vector<1x3xf32> to vector<1x3xf32>
    %519 = vector.broadcast %518 : vector<1x3xf32> to vector<5x3xf32>
    %520 = tpu.concatenate %516, %519 in 0 : vector<5x3xf32>, vector<5x3xf32> -> vector<10x3xf32>
    %521 = tpu.concatenate %520, %511 in 1 : vector<10x3xf32>, vector<10x16xf32> -> vector<10x19xf32>
    %cst_75 = arith.constant dense<0.000000e+00> : vector<10x64xf32>
    %522 = tpu.matmul %521, %3, %cst_75 {dimension_numbers = #tpu.dot_dimension_numbers<[1], [0], [0], [1], [0, 0, 1, 1], [], []>} : vector<10x19xf32>, vector<19x64xf32>, vector<10x64xf32> -> vector<10x64xf32>
    %523 = vector.extract_strided_slice %522 {offsets = [0, 0], sizes = [10, 32], strides = [1, 1]} : vector<10x64xf32> to vector<10x32xf32>
    %524 = vector.extract_strided_slice %10 {offsets = [0, 0], sizes = [1, 32], strides = [1, 1]} : vector<1x64xf32> to vector<1x32xf32>
    %525 = vector.broadcast %524 : vector<1x32xf32> to vector<10x32xf32>
    %526 = arith.addf %523, %525 : vector<10x32xf32>
    %527 = arith.negf %526 : vector<10x32xf32>
    %528 = math.exp %527 : vector<10x32xf32>
    %cst_76 = arith.constant 1.000000e+00 : f32
    %529 = vector.broadcast %cst_76 : f32 to vector<10x32xf32>
    %530 = arith.addf %529, %528 : vector<10x32xf32>
    %531 = arith.divf %529, %530 : vector<10x32xf32>
    %532 = vector.extract_strided_slice %531 {offsets = [0, 0], sizes = [10, 16], strides = [1, 1]} : vector<10x32xf32> to vector<10x16xf32>
    %533 = vector.extract_strided_slice %531 {offsets = [0, 16], sizes = [10, 16], strides = [1, 1]} : vector<10x32xf32> to vector<10x16xf32>
    %534 = vector.extract_strided_slice %522 {offsets = [0, 32], sizes = [10, 16], strides = [1, 1]} : vector<10x64xf32> to vector<10x16xf32>
    %535 = vector.extract_strided_slice %10 {offsets = [0, 32], sizes = [1, 16], strides = [1, 1]} : vector<1x64xf32> to vector<1x16xf32>
    %536 = vector.broadcast %535 : vector<1x16xf32> to vector<10x16xf32>
    %537 = arith.addf %534, %536 : vector<10x16xf32>
    %538 = vector.extract_strided_slice %522 {offsets = [0, 48], sizes = [10, 16], strides = [1, 1]} : vector<10x64xf32> to vector<10x16xf32>
    %539 = vector.extract_strided_slice %10 {offsets = [0, 48], sizes = [1, 16], strides = [1, 1]} : vector<1x64xf32> to vector<1x16xf32>
    %540 = vector.broadcast %539 : vector<1x16xf32> to vector<10x16xf32>
    %541 = arith.addf %538, %540 : vector<10x16xf32>
    %542 = arith.mulf %532, %541 : vector<10x16xf32>
    %543 = arith.addf %537, %542 : vector<10x16xf32>
    %544 = math.tanh %543 : vector<10x16xf32>
    %cst_77 = arith.constant 1.000000e+00 : f32
    %545 = vector.broadcast %cst_77 : f32 to vector<10x16xf32>
    %546 = arith.subf %545, %533 : vector<10x16xf32>
    %547 = arith.mulf %546, %544 : vector<10x16xf32>
    %548 = arith.mulf %533, %511 : vector<10x16xf32>
    %549 = arith.addf %547, %548 : vector<10x16xf32>
    %550 = tpu.concatenate %549, %512 in 1 : vector<10x16xf32>, vector<10x16xf32> -> vector<10x32xf32>
    %cst_78 = arith.constant dense<0.000000e+00> : vector<10x64xf32>
    %551 = tpu.matmul %550, %4, %cst_78 {dimension_numbers = #tpu.dot_dimension_numbers<[1], [0], [0], [1], [0, 0, 1, 1], [], []>} : vector<10x32xf32>, vector<32x64xf32>, vector<10x64xf32> -> vector<10x64xf32>
    %552 = vector.extract_strided_slice %551 {offsets = [0, 0], sizes = [10, 32], strides = [1, 1]} : vector<10x64xf32> to vector<10x32xf32>
    %553 = vector.extract_strided_slice %11 {offsets = [0, 0], sizes = [1, 32], strides = [1, 1]} : vector<1x64xf32> to vector<1x32xf32>
    %554 = vector.broadcast %553 : vector<1x32xf32> to vector<10x32xf32>
    %555 = arith.addf %552, %554 : vector<10x32xf32>
    %556 = arith.negf %555 : vector<10x32xf32>
    %557 = math.exp %556 : vector<10x32xf32>
    %cst_79 = arith.constant 1.000000e+00 : f32
    %558 = vector.broadcast %cst_79 : f32 to vector<10x32xf32>
    %559 = arith.addf %558, %557 : vector<10x32xf32>
    %560 = arith.divf %558, %559 : vector<10x32xf32>
    %561 = vector.extract_strided_slice %560 {offsets = [0, 0], sizes = [10, 16], strides = [1, 1]} : vector<10x32xf32> to vector<10x16xf32>
    %562 = vector.extract_strided_slice %560 {offsets = [0, 16], sizes = [10, 16], strides = [1, 1]} : vector<10x32xf32> to vector<10x16xf32>
    %563 = vector.extract_strided_slice %551 {offsets = [0, 32], sizes = [10, 16], strides = [1, 1]} : vector<10x64xf32> to vector<10x16xf32>
    %564 = vector.extract_strided_slice %11 {offsets = [0, 32], sizes = [1, 16], strides = [1, 1]} : vector<1x64xf32> to vector<1x16xf32>
    %565 = vector.broadcast %564 : vector<1x16xf32> to vector<10x16xf32>
    %566 = arith.addf %563, %565 : vector<10x16xf32>
    %567 = vector.extract_strided_slice %551 {offsets = [0, 48], sizes = [10, 16], strides = [1, 1]} : vector<10x64xf32> to vector<10x16xf32>
    %568 = vector.extract_strided_slice %11 {offsets = [0, 48], sizes = [1, 16], strides = [1, 1]} : vector<1x64xf32> to vector<1x16xf32>
    %569 = vector.broadcast %568 : vector<1x16xf32> to vector<10x16xf32>
    %570 = arith.addf %567, %569 : vector<10x16xf32>
    %571 = arith.mulf %561, %570 : vector<10x16xf32>
    %572 = arith.addf %566, %571 : vector<10x16xf32>
    %573 = math.tanh %572 : vector<10x16xf32>
    %cst_80 = arith.constant 1.000000e+00 : f32
    %574 = vector.broadcast %cst_80 : f32 to vector<10x16xf32>
    %575 = arith.subf %574, %562 : vector<10x16xf32>
    %576 = arith.mulf %575, %573 : vector<10x16xf32>
    %577 = arith.mulf %562, %512 : vector<10x16xf32>
    %578 = arith.addf %576, %577 : vector<10x16xf32>
    %cst_81 = arith.constant dense<0.000000e+00> : vector<10x3xf32>
    %579 = tpu.matmul %578, %7, %cst_81 {dimension_numbers = #tpu.dot_dimension_numbers<[1], [0], [0], [1], [0, 0, 1, 1], [], []>} : vector<10x16xf32>, vector<16x3xf32>, vector<10x3xf32> -> vector<10x3xf32>
    %580 = arith.addf %520, %579 : vector<10x3xf32>
    %581 = vector.broadcast %14 : vector<1x3xf32> to vector<10x3xf32>
    %582 = arith.addf %580, %581 : vector<10x3xf32>
    %583 = vector.extract_strided_slice %582 {offsets = [0, 0], sizes = [10, 1], strides = [1, 1]} : vector<10x3xf32> to vector<10x1xf32>
    %584 = vector.extract_strided_slice %582 {offsets = [0, 0], sizes = [10, 1], strides = [1, 1]} : vector<10x3xf32> to vector<10x1xf32>
    %585 = arith.mulf %583, %584 : vector<10x1xf32>
    %586 = vector.extract_strided_slice %582 {offsets = [0, 1], sizes = [10, 1], strides = [1, 1]} : vector<10x3xf32> to vector<10x1xf32>
    %587 = vector.extract_strided_slice %582 {offsets = [0, 1], sizes = [10, 1], strides = [1, 1]} : vector<10x3xf32> to vector<10x1xf32>
    %588 = arith.mulf %586, %587 : vector<10x1xf32>
    %589 = arith.addf %585, %588 : vector<10x1xf32>
    %590 = vector.extract_strided_slice %582 {offsets = [0, 2], sizes = [10, 1], strides = [1, 1]} : vector<10x3xf32> to vector<10x1xf32>
    %591 = vector.extract_strided_slice %582 {offsets = [0, 2], sizes = [10, 1], strides = [1, 1]} : vector<10x3xf32> to vector<10x1xf32>
    %592 = arith.mulf %590, %591 : vector<10x1xf32>
    %593 = arith.addf %589, %592 : vector<10x1xf32>
    %594 = math.rsqrt %593 : vector<10x1xf32>
    %595 = vector.broadcast %594 : vector<10x1xf32> to vector<10x3xf32>
    %596 = arith.mulf %582, %595 : vector<10x3xf32>
    %597 = tpu.concatenate %596, %549 in 1 : vector<10x3xf32>, vector<10x16xf32> -> vector<10x19xf32>
    %cst_82 = arith.constant dense<0.000000e+00> : vector<10x64xf32>
    %598 = tpu.matmul %597, %3, %cst_82 {dimension_numbers = #tpu.dot_dimension_numbers<[1], [0], [0], [1], [0, 0, 1, 1], [], []>} : vector<10x19xf32>, vector<19x64xf32>, vector<10x64xf32> -> vector<10x64xf32>
    %599 = vector.extract_strided_slice %598 {offsets = [0, 0], sizes = [10, 32], strides = [1, 1]} : vector<10x64xf32> to vector<10x32xf32>
    %600 = vector.extract_strided_slice %10 {offsets = [0, 0], sizes = [1, 32], strides = [1, 1]} : vector<1x64xf32> to vector<1x32xf32>
    %601 = vector.broadcast %600 : vector<1x32xf32> to vector<10x32xf32>
    %602 = arith.addf %599, %601 : vector<10x32xf32>
    %603 = arith.negf %602 : vector<10x32xf32>
    %604 = math.exp %603 : vector<10x32xf32>
    %cst_83 = arith.constant 1.000000e+00 : f32
    %605 = vector.broadcast %cst_83 : f32 to vector<10x32xf32>
    %606 = arith.addf %605, %604 : vector<10x32xf32>
    %607 = arith.divf %605, %606 : vector<10x32xf32>
    %608 = vector.extract_strided_slice %607 {offsets = [0, 0], sizes = [10, 16], strides = [1, 1]} : vector<10x32xf32> to vector<10x16xf32>
    %609 = vector.extract_strided_slice %607 {offsets = [0, 16], sizes = [10, 16], strides = [1, 1]} : vector<10x32xf32> to vector<10x16xf32>
    %610 = vector.extract_strided_slice %598 {offsets = [0, 32], sizes = [10, 16], strides = [1, 1]} : vector<10x64xf32> to vector<10x16xf32>
    %611 = vector.extract_strided_slice %10 {offsets = [0, 32], sizes = [1, 16], strides = [1, 1]} : vector<1x64xf32> to vector<1x16xf32>
    %612 = vector.broadcast %611 : vector<1x16xf32> to vector<10x16xf32>
    %613 = arith.addf %610, %612 : vector<10x16xf32>
    %614 = vector.extract_strided_slice %598 {offsets = [0, 48], sizes = [10, 16], strides = [1, 1]} : vector<10x64xf32> to vector<10x16xf32>
    %615 = vector.extract_strided_slice %10 {offsets = [0, 48], sizes = [1, 16], strides = [1, 1]} : vector<1x64xf32> to vector<1x16xf32>
    %616 = vector.broadcast %615 : vector<1x16xf32> to vector<10x16xf32>
    %617 = arith.addf %614, %616 : vector<10x16xf32>
    %618 = arith.mulf %608, %617 : vector<10x16xf32>
    %619 = arith.addf %613, %618 : vector<10x16xf32>
    %620 = math.tanh %619 : vector<10x16xf32>
    %cst_84 = arith.constant 1.000000e+00 : f32
    %621 = vector.broadcast %cst_84 : f32 to vector<10x16xf32>
    %622 = arith.subf %621, %609 : vector<10x16xf32>
    %623 = arith.mulf %622, %620 : vector<10x16xf32>
    %624 = arith.mulf %609, %549 : vector<10x16xf32>
    %625 = arith.addf %623, %624 : vector<10x16xf32>
    %626 = tpu.concatenate %625, %578 in 1 : vector<10x16xf32>, vector<10x16xf32> -> vector<10x32xf32>
    %cst_85 = arith.constant dense<0.000000e+00> : vector<10x64xf32>
    %627 = tpu.matmul %626, %4, %cst_85 {dimension_numbers = #tpu.dot_dimension_numbers<[1], [0], [0], [1], [0, 0, 1, 1], [], []>} : vector<10x32xf32>, vector<32x64xf32>, vector<10x64xf32> -> vector<10x64xf32>
    %628 = vector.extract_strided_slice %627 {offsets = [0, 0], sizes = [10, 32], strides = [1, 1]} : vector<10x64xf32> to vector<10x32xf32>
    %629 = vector.extract_strided_slice %11 {offsets = [0, 0], sizes = [1, 32], strides = [1, 1]} : vector<1x64xf32> to vector<1x32xf32>
    %630 = vector.broadcast %629 : vector<1x32xf32> to vector<10x32xf32>
    %631 = arith.addf %628, %630 : vector<10x32xf32>
    %632 = arith.negf %631 : vector<10x32xf32>
    %633 = math.exp %632 : vector<10x32xf32>
    %cst_86 = arith.constant 1.000000e+00 : f32
    %634 = vector.broadcast %cst_86 : f32 to vector<10x32xf32>
    %635 = arith.addf %634, %633 : vector<10x32xf32>
    %636 = arith.divf %634, %635 : vector<10x32xf32>
    %637 = vector.extract_strided_slice %636 {offsets = [0, 0], sizes = [10, 16], strides = [1, 1]} : vector<10x32xf32> to vector<10x16xf32>
    %638 = vector.extract_strided_slice %636 {offsets = [0, 16], sizes = [10, 16], strides = [1, 1]} : vector<10x32xf32> to vector<10x16xf32>
    %639 = vector.extract_strided_slice %627 {offsets = [0, 32], sizes = [10, 16], strides = [1, 1]} : vector<10x64xf32> to vector<10x16xf32>
    %640 = vector.extract_strided_slice %11 {offsets = [0, 32], sizes = [1, 16], strides = [1, 1]} : vector<1x64xf32> to vector<1x16xf32>
    %641 = vector.broadcast %640 : vector<1x16xf32> to vector<10x16xf32>
    %642 = arith.addf %639, %641 : vector<10x16xf32>
    %643 = vector.extract_strided_slice %627 {offsets = [0, 48], sizes = [10, 16], strides = [1, 1]} : vector<10x64xf32> to vector<10x16xf32>
    %644 = vector.extract_strided_slice %11 {offsets = [0, 48], sizes = [1, 16], strides = [1, 1]} : vector<1x64xf32> to vector<1x16xf32>
    %645 = vector.broadcast %644 : vector<1x16xf32> to vector<10x16xf32>
    %646 = arith.addf %643, %645 : vector<10x16xf32>
    %647 = arith.mulf %637, %646 : vector<10x16xf32>
    %648 = arith.addf %642, %647 : vector<10x16xf32>
    %649 = math.tanh %648 : vector<10x16xf32>
    %cst_87 = arith.constant 1.000000e+00 : f32
    %650 = vector.broadcast %cst_87 : f32 to vector<10x16xf32>
    %651 = arith.subf %650, %638 : vector<10x16xf32>
    %652 = arith.mulf %651, %649 : vector<10x16xf32>
    %653 = arith.mulf %638, %578 : vector<10x16xf32>
    %654 = arith.addf %652, %653 : vector<10x16xf32>
    %cst_88 = arith.constant dense<0.000000e+00> : vector<10x3xf32>
    %655 = tpu.matmul %654, %7, %cst_88 {dimension_numbers = #tpu.dot_dimension_numbers<[1], [0], [0], [1], [0, 0, 1, 1], [], []>} : vector<10x16xf32>, vector<16x3xf32>, vector<10x3xf32> -> vector<10x3xf32>
    %656 = arith.addf %596, %655 : vector<10x3xf32>
    %657 = vector.broadcast %14 : vector<1x3xf32> to vector<10x3xf32>
    %658 = arith.addf %656, %657 : vector<10x3xf32>
    %659 = vector.extract_strided_slice %658 {offsets = [0, 0], sizes = [10, 1], strides = [1, 1]} : vector<10x3xf32> to vector<10x1xf32>
    %660 = vector.extract_strided_slice %658 {offsets = [0, 0], sizes = [10, 1], strides = [1, 1]} : vector<10x3xf32> to vector<10x1xf32>
    %661 = arith.mulf %659, %660 : vector<10x1xf32>
    %662 = vector.extract_strided_slice %658 {offsets = [0, 1], sizes = [10, 1], strides = [1, 1]} : vector<10x3xf32> to vector<10x1xf32>
    %663 = vector.extract_strided_slice %658 {offsets = [0, 1], sizes = [10, 1], strides = [1, 1]} : vector<10x3xf32> to vector<10x1xf32>
    %664 = arith.mulf %662, %663 : vector<10x1xf32>
    %665 = arith.addf %661, %664 : vector<10x1xf32>
    %666 = vector.extract_strided_slice %658 {offsets = [0, 2], sizes = [10, 1], strides = [1, 1]} : vector<10x3xf32> to vector<10x1xf32>
    %667 = vector.extract_strided_slice %658 {offsets = [0, 2], sizes = [10, 1], strides = [1, 1]} : vector<10x3xf32> to vector<10x1xf32>
    %668 = arith.mulf %666, %667 : vector<10x1xf32>
    %669 = arith.addf %665, %668 : vector<10x1xf32>
    %670 = math.rsqrt %669 : vector<10x1xf32>
    %671 = vector.broadcast %670 : vector<10x1xf32> to vector<10x3xf32>
    %672 = arith.mulf %658, %671 : vector<10x3xf32>
    %673 = tpu.concatenate %672, %625 in 1 : vector<10x3xf32>, vector<10x16xf32> -> vector<10x19xf32>
    %cst_89 = arith.constant dense<0.000000e+00> : vector<10x64xf32>
    %674 = tpu.matmul %673, %3, %cst_89 {dimension_numbers = #tpu.dot_dimension_numbers<[1], [0], [0], [1], [0, 0, 1, 1], [], []>} : vector<10x19xf32>, vector<19x64xf32>, vector<10x64xf32> -> vector<10x64xf32>
    %675 = vector.extract_strided_slice %674 {offsets = [0, 0], sizes = [10, 32], strides = [1, 1]} : vector<10x64xf32> to vector<10x32xf32>
    %676 = vector.extract_strided_slice %10 {offsets = [0, 0], sizes = [1, 32], strides = [1, 1]} : vector<1x64xf32> to vector<1x32xf32>
    %677 = vector.broadcast %676 : vector<1x32xf32> to vector<10x32xf32>
    %678 = arith.addf %675, %677 : vector<10x32xf32>
    %679 = arith.negf %678 : vector<10x32xf32>
    %680 = math.exp %679 : vector<10x32xf32>
    %cst_90 = arith.constant 1.000000e+00 : f32
    %681 = vector.broadcast %cst_90 : f32 to vector<10x32xf32>
    %682 = arith.addf %681, %680 : vector<10x32xf32>
    %683 = arith.divf %681, %682 : vector<10x32xf32>
    %684 = vector.extract_strided_slice %683 {offsets = [0, 0], sizes = [10, 16], strides = [1, 1]} : vector<10x32xf32> to vector<10x16xf32>
    %685 = vector.extract_strided_slice %683 {offsets = [0, 16], sizes = [10, 16], strides = [1, 1]} : vector<10x32xf32> to vector<10x16xf32>
    %686 = vector.extract_strided_slice %674 {offsets = [0, 32], sizes = [10, 16], strides = [1, 1]} : vector<10x64xf32> to vector<10x16xf32>
    %687 = vector.extract_strided_slice %10 {offsets = [0, 32], sizes = [1, 16], strides = [1, 1]} : vector<1x64xf32> to vector<1x16xf32>
    %688 = vector.broadcast %687 : vector<1x16xf32> to vector<10x16xf32>
    %689 = arith.addf %686, %688 : vector<10x16xf32>
    %690 = vector.extract_strided_slice %674 {offsets = [0, 48], sizes = [10, 16], strides = [1, 1]} : vector<10x64xf32> to vector<10x16xf32>
    %691 = vector.extract_strided_slice %10 {offsets = [0, 48], sizes = [1, 16], strides = [1, 1]} : vector<1x64xf32> to vector<1x16xf32>
    %692 = vector.broadcast %691 : vector<1x16xf32> to vector<10x16xf32>
    %693 = arith.addf %690, %692 : vector<10x16xf32>
    %694 = arith.mulf %684, %693 : vector<10x16xf32>
    %695 = arith.addf %689, %694 : vector<10x16xf32>
    %696 = math.tanh %695 : vector<10x16xf32>
    %cst_91 = arith.constant 1.000000e+00 : f32
    %697 = vector.broadcast %cst_91 : f32 to vector<10x16xf32>
    %698 = arith.subf %697, %685 : vector<10x16xf32>
    %699 = arith.mulf %698, %696 : vector<10x16xf32>
    %700 = arith.mulf %685, %625 : vector<10x16xf32>
    %701 = arith.addf %699, %700 : vector<10x16xf32>
    %702 = tpu.concatenate %701, %654 in 1 : vector<10x16xf32>, vector<10x16xf32> -> vector<10x32xf32>
    %cst_92 = arith.constant dense<0.000000e+00> : vector<10x64xf32>
    %703 = tpu.matmul %702, %4, %cst_92 {dimension_numbers = #tpu.dot_dimension_numbers<[1], [0], [0], [1], [0, 0, 1, 1], [], []>} : vector<10x32xf32>, vector<32x64xf32>, vector<10x64xf32> -> vector<10x64xf32>
    %704 = vector.extract_strided_slice %703 {offsets = [0, 0], sizes = [10, 32], strides = [1, 1]} : vector<10x64xf32> to vector<10x32xf32>
    %705 = vector.extract_strided_slice %11 {offsets = [0, 0], sizes = [1, 32], strides = [1, 1]} : vector<1x64xf32> to vector<1x32xf32>
    %706 = vector.broadcast %705 : vector<1x32xf32> to vector<10x32xf32>
    %707 = arith.addf %704, %706 : vector<10x32xf32>
    %708 = arith.negf %707 : vector<10x32xf32>
    %709 = math.exp %708 : vector<10x32xf32>
    %cst_93 = arith.constant 1.000000e+00 : f32
    %710 = vector.broadcast %cst_93 : f32 to vector<10x32xf32>
    %711 = arith.addf %710, %709 : vector<10x32xf32>
    %712 = arith.divf %710, %711 : vector<10x32xf32>
    %713 = vector.extract_strided_slice %712 {offsets = [0, 0], sizes = [10, 16], strides = [1, 1]} : vector<10x32xf32> to vector<10x16xf32>
    %714 = vector.extract_strided_slice %712 {offsets = [0, 16], sizes = [10, 16], strides = [1, 1]} : vector<10x32xf32> to vector<10x16xf32>
    %715 = vector.extract_strided_slice %703 {offsets = [0, 32], sizes = [10, 16], strides = [1, 1]} : vector<10x64xf32> to vector<10x16xf32>
    %716 = vector.extract_strided_slice %11 {offsets = [0, 32], sizes = [1, 16], strides = [1, 1]} : vector<1x64xf32> to vector<1x16xf32>
    %717 = vector.broadcast %716 : vector<1x16xf32> to vector<10x16xf32>
    %718 = arith.addf %715, %717 : vector<10x16xf32>
    %719 = vector.extract_strided_slice %703 {offsets = [0, 48], sizes = [10, 16], strides = [1, 1]} : vector<10x64xf32> to vector<10x16xf32>
    %720 = vector.extract_strided_slice %11 {offsets = [0, 48], sizes = [1, 16], strides = [1, 1]} : vector<1x64xf32> to vector<1x16xf32>
    %721 = vector.broadcast %720 : vector<1x16xf32> to vector<10x16xf32>
    %722 = arith.addf %719, %721 : vector<10x16xf32>
    %723 = arith.mulf %713, %722 : vector<10x16xf32>
    %724 = arith.addf %718, %723 : vector<10x16xf32>
    %725 = math.tanh %724 : vector<10x16xf32>
    %cst_94 = arith.constant 1.000000e+00 : f32
    %726 = vector.broadcast %cst_94 : f32 to vector<10x16xf32>
    %727 = arith.subf %726, %714 : vector<10x16xf32>
    %728 = arith.mulf %727, %725 : vector<10x16xf32>
    %729 = arith.mulf %714, %654 : vector<10x16xf32>
    %730 = arith.addf %728, %729 : vector<10x16xf32>
    %cst_95 = arith.constant dense<0.000000e+00> : vector<10x3xf32>
    %731 = tpu.matmul %730, %7, %cst_95 {dimension_numbers = #tpu.dot_dimension_numbers<[1], [0], [0], [1], [0, 0, 1, 1], [], []>} : vector<10x16xf32>, vector<16x3xf32>, vector<10x3xf32> -> vector<10x3xf32>
    %732 = arith.addf %672, %731 : vector<10x3xf32>
    %733 = vector.broadcast %14 : vector<1x3xf32> to vector<10x3xf32>
    %734 = arith.addf %732, %733 : vector<10x3xf32>
    %735 = vector.extract_strided_slice %734 {offsets = [0, 0], sizes = [10, 1], strides = [1, 1]} : vector<10x3xf32> to vector<10x1xf32>
    %736 = vector.extract_strided_slice %734 {offsets = [0, 0], sizes = [10, 1], strides = [1, 1]} : vector<10x3xf32> to vector<10x1xf32>
    %737 = arith.mulf %735, %736 : vector<10x1xf32>
    %738 = vector.extract_strided_slice %734 {offsets = [0, 1], sizes = [10, 1], strides = [1, 1]} : vector<10x3xf32> to vector<10x1xf32>
    %739 = vector.extract_strided_slice %734 {offsets = [0, 1], sizes = [10, 1], strides = [1, 1]} : vector<10x3xf32> to vector<10x1xf32>
    %740 = arith.mulf %738, %739 : vector<10x1xf32>
    %741 = arith.addf %737, %740 : vector<10x1xf32>
    %742 = vector.extract_strided_slice %734 {offsets = [0, 2], sizes = [10, 1], strides = [1, 1]} : vector<10x3xf32> to vector<10x1xf32>
    %743 = vector.extract_strided_slice %734 {offsets = [0, 2], sizes = [10, 1], strides = [1, 1]} : vector<10x3xf32> to vector<10x1xf32>
    %744 = arith.mulf %742, %743 : vector<10x1xf32>
    %745 = arith.addf %741, %744 : vector<10x1xf32>
    %746 = math.rsqrt %745 : vector<10x1xf32>
    %747 = vector.broadcast %746 : vector<10x1xf32> to vector<10x3xf32>
    %748 = arith.mulf %734, %747 : vector<10x3xf32>
    %749 = tpu.concatenate %748, %701 in 1 : vector<10x3xf32>, vector<10x16xf32> -> vector<10x19xf32>
    %cst_96 = arith.constant dense<0.000000e+00> : vector<10x64xf32>
    %750 = tpu.matmul %749, %3, %cst_96 {dimension_numbers = #tpu.dot_dimension_numbers<[1], [0], [0], [1], [0, 0, 1, 1], [], []>} : vector<10x19xf32>, vector<19x64xf32>, vector<10x64xf32> -> vector<10x64xf32>
    %751 = vector.extract_strided_slice %750 {offsets = [0, 0], sizes = [10, 32], strides = [1, 1]} : vector<10x64xf32> to vector<10x32xf32>
    %752 = vector.extract_strided_slice %10 {offsets = [0, 0], sizes = [1, 32], strides = [1, 1]} : vector<1x64xf32> to vector<1x32xf32>
    %753 = vector.broadcast %752 : vector<1x32xf32> to vector<10x32xf32>
    %754 = arith.addf %751, %753 : vector<10x32xf32>
    %755 = arith.negf %754 : vector<10x32xf32>
    %756 = math.exp %755 : vector<10x32xf32>
    %cst_97 = arith.constant 1.000000e+00 : f32
    %757 = vector.broadcast %cst_97 : f32 to vector<10x32xf32>
    %758 = arith.addf %757, %756 : vector<10x32xf32>
    %759 = arith.divf %757, %758 : vector<10x32xf32>
    %760 = vector.extract_strided_slice %759 {offsets = [0, 0], sizes = [10, 16], strides = [1, 1]} : vector<10x32xf32> to vector<10x16xf32>
    %761 = vector.extract_strided_slice %759 {offsets = [0, 16], sizes = [10, 16], strides = [1, 1]} : vector<10x32xf32> to vector<10x16xf32>
    %762 = vector.extract_strided_slice %750 {offsets = [0, 32], sizes = [10, 16], strides = [1, 1]} : vector<10x64xf32> to vector<10x16xf32>
    %763 = vector.extract_strided_slice %10 {offsets = [0, 32], sizes = [1, 16], strides = [1, 1]} : vector<1x64xf32> to vector<1x16xf32>
    %764 = vector.broadcast %763 : vector<1x16xf32> to vector<10x16xf32>
    %765 = arith.addf %762, %764 : vector<10x16xf32>
    %766 = vector.extract_strided_slice %750 {offsets = [0, 48], sizes = [10, 16], strides = [1, 1]} : vector<10x64xf32> to vector<10x16xf32>
    %767 = vector.extract_strided_slice %10 {offsets = [0, 48], sizes = [1, 16], strides = [1, 1]} : vector<1x64xf32> to vector<1x16xf32>
    %768 = vector.broadcast %767 : vector<1x16xf32> to vector<10x16xf32>
    %769 = arith.addf %766, %768 : vector<10x16xf32>
    %770 = arith.mulf %760, %769 : vector<10x16xf32>
    %771 = arith.addf %765, %770 : vector<10x16xf32>
    %772 = math.tanh %771 : vector<10x16xf32>
    %cst_98 = arith.constant 1.000000e+00 : f32
    %773 = vector.broadcast %cst_98 : f32 to vector<10x16xf32>
    %774 = arith.subf %773, %761 : vector<10x16xf32>
    %775 = arith.mulf %774, %772 : vector<10x16xf32>
    %776 = arith.mulf %761, %701 : vector<10x16xf32>
    %777 = arith.addf %775, %776 : vector<10x16xf32>
    %778 = tpu.concatenate %777, %730 in 1 : vector<10x16xf32>, vector<10x16xf32> -> vector<10x32xf32>
    %cst_99 = arith.constant dense<0.000000e+00> : vector<10x64xf32>
    %779 = tpu.matmul %778, %4, %cst_99 {dimension_numbers = #tpu.dot_dimension_numbers<[1], [0], [0], [1], [0, 0, 1, 1], [], []>} : vector<10x32xf32>, vector<32x64xf32>, vector<10x64xf32> -> vector<10x64xf32>
    %780 = vector.extract_strided_slice %779 {offsets = [0, 0], sizes = [10, 32], strides = [1, 1]} : vector<10x64xf32> to vector<10x32xf32>
    %781 = vector.extract_strided_slice %11 {offsets = [0, 0], sizes = [1, 32], strides = [1, 1]} : vector<1x64xf32> to vector<1x32xf32>
    %782 = vector.broadcast %781 : vector<1x32xf32> to vector<10x32xf32>
    %783 = arith.addf %780, %782 : vector<10x32xf32>
    %784 = arith.negf %783 : vector<10x32xf32>
    %785 = math.exp %784 : vector<10x32xf32>
    %cst_100 = arith.constant 1.000000e+00 : f32
    %786 = vector.broadcast %cst_100 : f32 to vector<10x32xf32>
    %787 = arith.addf %786, %785 : vector<10x32xf32>
    %788 = arith.divf %786, %787 : vector<10x32xf32>
    %789 = vector.extract_strided_slice %788 {offsets = [0, 0], sizes = [10, 16], strides = [1, 1]} : vector<10x32xf32> to vector<10x16xf32>
    %790 = vector.extract_strided_slice %788 {offsets = [0, 16], sizes = [10, 16], strides = [1, 1]} : vector<10x32xf32> to vector<10x16xf32>
    %791 = vector.extract_strided_slice %779 {offsets = [0, 32], sizes = [10, 16], strides = [1, 1]} : vector<10x64xf32> to vector<10x16xf32>
    %792 = vector.extract_strided_slice %11 {offsets = [0, 32], sizes = [1, 16], strides = [1, 1]} : vector<1x64xf32> to vector<1x16xf32>
    %793 = vector.broadcast %792 : vector<1x16xf32> to vector<10x16xf32>
    %794 = arith.addf %791, %793 : vector<10x16xf32>
    %795 = vector.extract_strided_slice %779 {offsets = [0, 48], sizes = [10, 16], strides = [1, 1]} : vector<10x64xf32> to vector<10x16xf32>
    %796 = vector.extract_strided_slice %11 {offsets = [0, 48], sizes = [1, 16], strides = [1, 1]} : vector<1x64xf32> to vector<1x16xf32>
    %797 = vector.broadcast %796 : vector<1x16xf32> to vector<10x16xf32>
    %798 = arith.addf %795, %797 : vector<10x16xf32>
    %799 = arith.mulf %789, %798 : vector<10x16xf32>
    %800 = arith.addf %794, %799 : vector<10x16xf32>
    %801 = math.tanh %800 : vector<10x16xf32>
    %cst_101 = arith.constant 1.000000e+00 : f32
    %802 = vector.broadcast %cst_101 : f32 to vector<10x16xf32>
    %803 = arith.subf %802, %790 : vector<10x16xf32>
    %804 = arith.mulf %803, %801 : vector<10x16xf32>
    %805 = arith.mulf %790, %730 : vector<10x16xf32>
    %806 = arith.addf %804, %805 : vector<10x16xf32>
    %cst_102 = arith.constant dense<0.000000e+00> : vector<10x3xf32>
    %807 = tpu.matmul %806, %7, %cst_102 {dimension_numbers = #tpu.dot_dimension_numbers<[1], [0], [0], [1], [0, 0, 1, 1], [], []>} : vector<10x16xf32>, vector<16x3xf32>, vector<10x3xf32> -> vector<10x3xf32>
    %808 = arith.addf %748, %807 : vector<10x3xf32>
    %809 = vector.broadcast %14 : vector<1x3xf32> to vector<10x3xf32>
    %810 = arith.addf %808, %809 : vector<10x3xf32>
    %811 = vector.extract_strided_slice %810 {offsets = [0, 0], sizes = [10, 1], strides = [1, 1]} : vector<10x3xf32> to vector<10x1xf32>
    %812 = vector.extract_strided_slice %810 {offsets = [0, 0], sizes = [10, 1], strides = [1, 1]} : vector<10x3xf32> to vector<10x1xf32>
    %813 = arith.mulf %811, %812 : vector<10x1xf32>
    %814 = vector.extract_strided_slice %810 {offsets = [0, 1], sizes = [10, 1], strides = [1, 1]} : vector<10x3xf32> to vector<10x1xf32>
    %815 = vector.extract_strided_slice %810 {offsets = [0, 1], sizes = [10, 1], strides = [1, 1]} : vector<10x3xf32> to vector<10x1xf32>
    %816 = arith.mulf %814, %815 : vector<10x1xf32>
    %817 = arith.addf %813, %816 : vector<10x1xf32>
    %818 = vector.extract_strided_slice %810 {offsets = [0, 2], sizes = [10, 1], strides = [1, 1]} : vector<10x3xf32> to vector<10x1xf32>
    %819 = vector.extract_strided_slice %810 {offsets = [0, 2], sizes = [10, 1], strides = [1, 1]} : vector<10x3xf32> to vector<10x1xf32>
    %820 = arith.mulf %818, %819 : vector<10x1xf32>
    %821 = arith.addf %817, %820 : vector<10x1xf32>
    %822 = math.rsqrt %821 : vector<10x1xf32>
    %823 = vector.broadcast %822 : vector<10x1xf32> to vector<10x3xf32>
    %824 = arith.mulf %810, %823 : vector<10x3xf32>
    %825 = tpu.concatenate %824, %777 in 1 : vector<10x3xf32>, vector<10x16xf32> -> vector<10x19xf32>
    %cst_103 = arith.constant dense<0.000000e+00> : vector<10x64xf32>
    %826 = tpu.matmul %825, %3, %cst_103 {dimension_numbers = #tpu.dot_dimension_numbers<[1], [0], [0], [1], [0, 0, 1, 1], [], []>} : vector<10x19xf32>, vector<19x64xf32>, vector<10x64xf32> -> vector<10x64xf32>
    %827 = vector.extract_strided_slice %826 {offsets = [0, 0], sizes = [10, 32], strides = [1, 1]} : vector<10x64xf32> to vector<10x32xf32>
    %828 = vector.extract_strided_slice %10 {offsets = [0, 0], sizes = [1, 32], strides = [1, 1]} : vector<1x64xf32> to vector<1x32xf32>
    %829 = vector.broadcast %828 : vector<1x32xf32> to vector<10x32xf32>
    %830 = arith.addf %827, %829 : vector<10x32xf32>
    %831 = arith.negf %830 : vector<10x32xf32>
    %832 = math.exp %831 : vector<10x32xf32>
    %cst_104 = arith.constant 1.000000e+00 : f32
    %833 = vector.broadcast %cst_104 : f32 to vector<10x32xf32>
    %834 = arith.addf %833, %832 : vector<10x32xf32>
    %835 = arith.divf %833, %834 : vector<10x32xf32>
    %836 = vector.extract_strided_slice %835 {offsets = [0, 0], sizes = [10, 16], strides = [1, 1]} : vector<10x32xf32> to vector<10x16xf32>
    %837 = vector.extract_strided_slice %835 {offsets = [0, 16], sizes = [10, 16], strides = [1, 1]} : vector<10x32xf32> to vector<10x16xf32>
    %838 = vector.extract_strided_slice %826 {offsets = [0, 32], sizes = [10, 16], strides = [1, 1]} : vector<10x64xf32> to vector<10x16xf32>
    %839 = vector.extract_strided_slice %10 {offsets = [0, 32], sizes = [1, 16], strides = [1, 1]} : vector<1x64xf32> to vector<1x16xf32>
    %840 = vector.broadcast %839 : vector<1x16xf32> to vector<10x16xf32>
    %841 = arith.addf %838, %840 : vector<10x16xf32>
    %842 = vector.extract_strided_slice %826 {offsets = [0, 48], sizes = [10, 16], strides = [1, 1]} : vector<10x64xf32> to vector<10x16xf32>
    %843 = vector.extract_strided_slice %10 {offsets = [0, 48], sizes = [1, 16], strides = [1, 1]} : vector<1x64xf32> to vector<1x16xf32>
    %844 = vector.broadcast %843 : vector<1x16xf32> to vector<10x16xf32>
    %845 = arith.addf %842, %844 : vector<10x16xf32>
    %846 = arith.mulf %836, %845 : vector<10x16xf32>
    %847 = arith.addf %841, %846 : vector<10x16xf32>
    %848 = math.tanh %847 : vector<10x16xf32>
    %cst_105 = arith.constant 1.000000e+00 : f32
    %849 = vector.broadcast %cst_105 : f32 to vector<10x16xf32>
    %850 = arith.subf %849, %837 : vector<10x16xf32>
    %851 = arith.mulf %850, %848 : vector<10x16xf32>
    %852 = arith.mulf %837, %777 : vector<10x16xf32>
    %853 = arith.addf %851, %852 : vector<10x16xf32>
    %854 = tpu.concatenate %853, %806 in 1 : vector<10x16xf32>, vector<10x16xf32> -> vector<10x32xf32>
    %cst_106 = arith.constant dense<0.000000e+00> : vector<10x64xf32>
    %855 = tpu.matmul %854, %4, %cst_106 {dimension_numbers = #tpu.dot_dimension_numbers<[1], [0], [0], [1], [0, 0, 1, 1], [], []>} : vector<10x32xf32>, vector<32x64xf32>, vector<10x64xf32> -> vector<10x64xf32>
    %856 = vector.extract_strided_slice %855 {offsets = [0, 0], sizes = [10, 32], strides = [1, 1]} : vector<10x64xf32> to vector<10x32xf32>
    %857 = vector.extract_strided_slice %11 {offsets = [0, 0], sizes = [1, 32], strides = [1, 1]} : vector<1x64xf32> to vector<1x32xf32>
    %858 = vector.broadcast %857 : vector<1x32xf32> to vector<10x32xf32>
    %859 = arith.addf %856, %858 : vector<10x32xf32>
    %860 = arith.negf %859 : vector<10x32xf32>
    %861 = math.exp %860 : vector<10x32xf32>
    %cst_107 = arith.constant 1.000000e+00 : f32
    %862 = vector.broadcast %cst_107 : f32 to vector<10x32xf32>
    %863 = arith.addf %862, %861 : vector<10x32xf32>
    %864 = arith.divf %862, %863 : vector<10x32xf32>
    %865 = vector.extract_strided_slice %864 {offsets = [0, 0], sizes = [10, 16], strides = [1, 1]} : vector<10x32xf32> to vector<10x16xf32>
    %866 = vector.extract_strided_slice %864 {offsets = [0, 16], sizes = [10, 16], strides = [1, 1]} : vector<10x32xf32> to vector<10x16xf32>
    %867 = vector.extract_strided_slice %855 {offsets = [0, 32], sizes = [10, 16], strides = [1, 1]} : vector<10x64xf32> to vector<10x16xf32>
    %868 = vector.extract_strided_slice %11 {offsets = [0, 32], sizes = [1, 16], strides = [1, 1]} : vector<1x64xf32> to vector<1x16xf32>
    %869 = vector.broadcast %868 : vector<1x16xf32> to vector<10x16xf32>
    %870 = arith.addf %867, %869 : vector<10x16xf32>
    %871 = vector.extract_strided_slice %855 {offsets = [0, 48], sizes = [10, 16], strides = [1, 1]} : vector<10x64xf32> to vector<10x16xf32>
    %872 = vector.extract_strided_slice %11 {offsets = [0, 48], sizes = [1, 16], strides = [1, 1]} : vector<1x64xf32> to vector<1x16xf32>
    %873 = vector.broadcast %872 : vector<1x16xf32> to vector<10x16xf32>
    %874 = arith.addf %871, %873 : vector<10x16xf32>
    %875 = arith.mulf %865, %874 : vector<10x16xf32>
    %876 = arith.addf %870, %875 : vector<10x16xf32>
    %877 = math.tanh %876 : vector<10x16xf32>
    %cst_108 = arith.constant 1.000000e+00 : f32
    %878 = vector.broadcast %cst_108 : f32 to vector<10x16xf32>
    %879 = arith.subf %878, %866 : vector<10x16xf32>
    %880 = arith.mulf %879, %877 : vector<10x16xf32>
    %881 = arith.mulf %866, %806 : vector<10x16xf32>
    %882 = arith.addf %880, %881 : vector<10x16xf32>
    %cst_109 = arith.constant dense<0.000000e+00> : vector<10x3xf32>
    %883 = tpu.matmul %882, %7, %cst_109 {dimension_numbers = #tpu.dot_dimension_numbers<[1], [0], [0], [1], [0, 0, 1, 1], [], []>} : vector<10x16xf32>, vector<16x3xf32>, vector<10x3xf32> -> vector<10x3xf32>
    %884 = arith.addf %824, %883 : vector<10x3xf32>
    %885 = vector.broadcast %14 : vector<1x3xf32> to vector<10x3xf32>
    %886 = arith.addf %884, %885 : vector<10x3xf32>
    %887 = vector.extract_strided_slice %886 {offsets = [0, 0], sizes = [10, 1], strides = [1, 1]} : vector<10x3xf32> to vector<10x1xf32>
    %888 = vector.extract_strided_slice %886 {offsets = [0, 0], sizes = [10, 1], strides = [1, 1]} : vector<10x3xf32> to vector<10x1xf32>
    %889 = arith.mulf %887, %888 : vector<10x1xf32>
    %890 = vector.extract_strided_slice %886 {offsets = [0, 1], sizes = [10, 1], strides = [1, 1]} : vector<10x3xf32> to vector<10x1xf32>
    %891 = vector.extract_strided_slice %886 {offsets = [0, 1], sizes = [10, 1], strides = [1, 1]} : vector<10x3xf32> to vector<10x1xf32>
    %892 = arith.mulf %890, %891 : vector<10x1xf32>
    %893 = arith.addf %889, %892 : vector<10x1xf32>
    %894 = vector.extract_strided_slice %886 {offsets = [0, 2], sizes = [10, 1], strides = [1, 1]} : vector<10x3xf32> to vector<10x1xf32>
    %895 = vector.extract_strided_slice %886 {offsets = [0, 2], sizes = [10, 1], strides = [1, 1]} : vector<10x3xf32> to vector<10x1xf32>
    %896 = arith.mulf %894, %895 : vector<10x1xf32>
    %897 = arith.addf %893, %896 : vector<10x1xf32>
    %898 = math.rsqrt %897 : vector<10x1xf32>
    %899 = vector.broadcast %898 : vector<10x1xf32> to vector<10x3xf32>
    %900 = arith.mulf %886, %899 : vector<10x3xf32>
    %901 = tpu.concatenate %596, %672, %748, %824, %900 in 1 : vector<10x3xf32>, vector<10x3xf32>, vector<10x3xf32>, vector<10x3xf32>, vector<10x3xf32> -> vector<10x15xf32>
    %c0_110 = arith.constant 0 : index
    %c0_111 = arith.constant 0 : index
    %902 = vector.load %arg5[%c0_110, %c0_111] : memref<10x15xf32, #tpu.memory_space<vmem>>, vector<10x15xf32>
    tpu.vector_store %arg5[%c0_110, %c0_111], %901 {strides = array<i32>} : memref<10x15xf32, #tpu.memory_space<vmem>>, vector<10x15xf32>,
    return
  }
}

</mosaic_0001>

<bundles_post_ra>
// kernel: tpu_custom_call.1
= control target key start
LH: loop header
LB: loop body
LE: loop exit
PB: predicated region body
PF: predicated region fallthrough
CT: control target
= control target key end

     0   :  { %vm60_vm0 = vcmask 1042432   ;;  %vm53_vm1 = vcmask 23552   ;;  %v5005_v2 = vmov 0.0   ;;  %s5952_s0 = inlined_call_operand.vmem [shape: f32[16,3], index: 0, kind: input, shape index: {}]   ;;  %s5953_s1 = inlined_call_operand.vmem [shape: f32[2,3], index: 1, kind: input, shape index: {}]   ;;  %s5954_s2 = inlined_call_operand.vmem [shape: f32[10,1], index: 2, kind: input, shape index: {}]   ;;  %s5955_s3 = inlined_call_operand.vmem [shape: f32[176,64], index: 3, kind: input, shape index: {}]   ;;  %s5956_s4 = inlined_call_operand.vmem [shape: f32[8,64], index: 4, kind: input, shape index: {}]   ;;  %s5957_s5 = inlined_call_operand.hbm [shape: f32[10,15], index: 5, kind: output, shape index: {}]  }
   0x1   :  { %v21_v0 = vld [vmem:[%s5955_s3] sm:$0x7]  ;;  %4419 = vmatprep.subr.mxu1 %v5005_v2  ;;  %v5063_v3 = vld [vmem:[%s5955_s3 + $0x10] sm:$0xff]  ;;  %v52_v4 = vld [vmem:[%s5952_s0 + $0x8] sm:$0xff] }
   0x2   :  { %v51_v1 = vld [vmem:[%s5952_s0] sm:$0xff]  ;;  %4414 = vmatprep.subr.msk.mxu0 %vm60_vm0, %v21_v0  ;;  %v5073_v5 = vld [vmem:[%s5955_s3 + $0x8] sm:$0xff] }
   0x3   :  { %4415 = vmatpush3.msk.msra.mxu0 %vm60_vm0, %v21_v0  ;;  %4416 = vmatprep.mubr.msk.f32.mxu0 %vm53_vm1, %v51_v1 }
   0x4   :  { %10 = vsyncpa [#allocation3], 0  ;;  %4420 = vmatpush3.msra.mxu1 %v5063_v3  ;;  %4417 = vmatmul.mubr.msk.f32.vlgmr.msra.gmra.mxu0 %vm53_vm1, %v52_v4  ;;  %vm5006_vm2 = vmmov 0   ;;  %v5099_v8 = vld [vmem:[%s5956_s4] ss:$0 sm:$0xff]  ;;  %s5007_s29 = smov 80  }
   0x5   :  { %4421 = vmatprep.subr.mxu1 %v5005_v2  ;;  %4423 = vmatprep.mubr.msk.f32.mxu1 %vm5006_vm2, %v5005_v2  ;;  %s5008_s30 = smov 32   ;;  %v5108_v21 = vld [vmem:[%s5955_s3 + $0x30] sm:$0xff]  ;;  %v5113_v22 = vld [vmem:[%s5955_s3 + $0x28] sm:$0xff]  ;;  %v5120_v23 = vld [vmem:[%s5955_s3 + $0x20] sm:$0xff]  ;;  %s5009_s12 = smov 112   ;;  %vm139_vm3 = vcmask 130048  }
   0x6   :  { %4422 = vmatpush3.msra.mxu1 %v5073_v5  ;;  %4426 = vmatprep.subr.mxu0 %v5005_v2  ;;  %v5130_v25 = vld [vmem:[%s5955_s3 + $0x18] sm:$0xff]  ;;  %vm249_vm4 = vcmask 261120   ;;  %v5161_v49 = vld [vmem:[%s5956_s4 + $0x1] ss:$0 sm:$0xff]  ;;  %vm2011_vm5 = vcmask 1044480   ;;  %s5011_s21 = smov 3  }
   0x7   :  { %4424 = vmatmul.mubr.f32.vlgmr.msra.gmra.mxu1 %v5005_v2  ;;  %4437 = vmatprep.subr.mxu1 %v5005_v2  ;;  %vm2053_vm6 = vcmask 154624   ;;  %s5012_s25 = smov 16   ;;  %s5013_s18 = smov 127   ;;  %vm4136_vm7 = vcmask 48128   ;;  %vm4139_vm8 = vcmask 72704   ;;  %vm4142_vm9 = vcmask 97280  }
   0x8   :  { %4438 = vmatpush3.msra.mxu1 %v5063_v3  ;;  %4441 = vmatprep.mubr.msk.f32.mxu1 %vm5006_vm2, %v5005_v2  ;;  %s5014_s19 = smov 126   ;;  %s5015_s20 = smov 115   ;;  %vm4147_vm10 = vcmask 115712   ;;  %vm4145_vm11 = vcmask 121856  }
   0x9   :  { %4439 = vmatprep.subr.mxu1 %v5005_v2  ;;  %4434 = vmatprep.mubr.msk.f32.mxu0 %vm5006_vm2, %v5005_v2 }
   0xa   :  { %4440 = vmatpush3.msra.mxu1 %v5073_v5  ;;  %4427 = vmatpush3.msra.mxu0 %v5108_v21 }
   0xb   :  { %4444 = vmatprep.subr.mxu1 %v5005_v2  ;;  %4428 = vmatprep.subr.mxu0 %v5005_v2 }
   0xc   :  { %4429 = vmatpush3.msra.mxu0 %v5113_v22 }
   0xd   :  { %4430 = vmatprep.subr.mxu0 %v5005_v2 }
   0xe   :  { %4431 = vmatpush3.msra.mxu0 %v5120_v23 }
   0xf   :  { %4432 = vmatprep.subr.mxu0 %v5005_v2 }
  0x10   :  { %4433 = vmatpush3.msra.mxu0 %v5130_v25 }
  0x11   :  { %4455 = vmatprep.subr.mxu0 %v5005_v2 }
  0xc4   :  { %v5092_v6 = vpop.f32.mrf.mxu0 }
  0xc6   :  { %v5094_v7 = vpop.f32.mrf.mxu0 }
  0xc7   :  { %v209_v9 = vpop.f32.mrf.mxu1 }
  0xc8   :  { %v213_v10 = vadd.f32 %v209_v9, %v5094_v7 }
  0xc9   :  { %v4425_v11 = vpop.f32.mrf.mxu1 }
  0xca   :  { %v218_v12 = vadd.f32 %v5099_v8, %v213_v10 }
  0xcc   :  { %226 = vrot.lane.b32.xlu0 %v218_v12, %s5007_s29  ;;  %v4169_v13 = vmul.f32 -1.442695, %v218_v12 }
  0xce   :  { %4735 = vpow2.f32 %v4169_v13 }
  0xdb   :  { %v4736_v14 = vpop.eup %4735 }
  0xdc   :  { %v222_v15 = vadd.f32 1.0, %v4736_v14 }
  0xde   :  { %4737 = vrcp.f32 %v222_v15 }
  0xeb   :  { %v4738_v16 = vpop.eup %4737 }
  0xec   :  { %v236_v26 = vsub.f32 1.0, %v4738_v16  ;;  %v242_v28 = vmul.f32 0.0, %v4738_v16 }
 0x13e   :  { %v227_v17 = vpop.permute.xlu0 %226 }
 0x13f   :  { %v229_v18 = vmul.f32 %v4738_v16, %v227_v17 }
 0x141   :  { %231 = vrot.lane.b32.xlu0 %v229_v18, %s5008_s30 }
 0x1b3   :  { %v232_v19 = vpop.permute.xlu0 %231 }
 0x1b4   :  { %v234_v20 = vadd.f32 %v232_v19, %v218_v12 }
 0x1b6   :  { %4739 = vtanh.f32 %v234_v20 }
 0x1c3   :  { %v4740_v24 = vpop.eup %4739 }
 0x1c4   :  { %238 = vrot.lane.b32.xlu1 %v4740_v24, %s5009_s12 }
 0x236   :  { %v239_v27 = vpop.permute.xlu1 %238 }
 0x237   :  { %v241_v29 = vmul.f32 %v239_v27, %v236_v26 }
 0x239   :  { %v243_v30 = vadd.f32 %v242_v28, %v241_v29 }
 0x23b   :  { %245 = vrot.lane.b32.xlu1 %v243_v30, %s5009_s12  ;;  %v453_v54 = vrot.slane %v243_v30, 6 }
 0x2ad   :  { %v246_v31 = vpop.permute.xlu1 %245 }
 0x2ae   :  { %v248_v32 = vsel %vm139_vm3, %v246_v31, 0.0  ;;  %4442 = vmatmul.mubr.msk.f32.vlgmr.msra.gmra.mxu1 %vm139_vm3, %v246_v31 }
 0x2af   :  { %4435 = vmatmul.mubr.msk.f32.vlgmr.msra.gmra.mxu0 %vm249_vm4, %v248_v32  ;;  %4445 = vmatpush3.msra.mxu1 %v5108_v21 }
 0x2b0   :  { %4456 = vmatpush3.msra.mxu0 %v5063_v3  ;;  %4459 = vmatprep.mubr.msk.f32.mxu0 %vm5006_vm2, %v5005_v2 }
 0x2b1   :  { %4457 = vmatprep.subr.mxu0 %v5005_v2  ;;  %4446 = vmatprep.subr.mxu1 %v5005_v2 }
 0x2b2   :  { %4458 = vmatpush3.msra.mxu0 %v5073_v5  ;;  %4447 = vmatpush3.msra.mxu1 %v5113_v22 }
 0x2b3   :  { %4448 = vmatprep.subr.mxu1 %v5005_v2  ;;  %4452 = vmatprep.mubr.msk.f32.mxu1 %vm5006_vm2, %v5005_v2 }
 0x2b4   :  { %4449 = vmatpush3.msra.mxu1 %v5120_v23  ;;  %4462 = vmatprep.subr.mxu0 %v5005_v2 }
 0x2b5   :  { %4450 = vmatprep.subr.mxu1 %v5005_v2 }
 0x2b6   :  { %4451 = vmatpush3.msra.mxu1 %v5130_v25 }
 0x2b7   :  { %4473 = vmatprep.subr.mxu1 %v5005_v2 }
 0x36e   :  { %v421_v33 = vpop.f32.mrf.mxu1 }
 0x36f   :  { %v426_v34 = vrot.slane %v421_v33, 6  ;;  %v319_v35 = vpop.f32.mrf.mxu0 }
 0x370   :  { %v4443_v36 = vpop.f32.mrf.mxu1  ;;  %v327_v50 = vadd.f32 %v5161_v49, %v319_v35 }
 0x371   :  { %v428_v37 = vadd.f32 %v426_v34, %v5094_v7  ;;  %v4436_v38 = vpop.f32.mrf.mxu0 }
 0x372   :  { %v4172_v51 = vmul.f32 -1.442695, %v327_v50 }
 0x373   :  { %v429_v39 = vadd.f32 %v5099_v8, %v428_v37 }
 0x375   :  { %437 = vrot.lane.b32.xlu0 %v429_v39, %s5007_s29  ;;  %v4174_v40 = vmul.f32 -1.442695, %v429_v39 }
 0x377   :  { %4741 = vpow2.f32 %v4174_v40 }
 0x384   :  { %v4742_v41 = vpop.eup %4741 }
 0x385   :  { %v433_v42 = vadd.f32 1.0, %v4742_v41 }
 0x387   :  { %4743 = vrcp.f32 %v433_v42 }
 0x394   :  { %v4744_v43 = vpop.eup %4743 }
 0x395   :  { %v447_v55 = vsub.f32 1.0, %v4744_v43  ;;  %v455_v58 = vmul.f32 %v4744_v43, %v453_v54 }
 0x3e7   :  { %v438_v44 = vpop.permute.xlu0 %437 }
 0x3e8   :  { %v440_v45 = vmul.f32 %v4744_v43, %v438_v44 }
 0x3ea   :  { %442 = vrot.lane.b32.xlu1 %v440_v45, %s5008_s30 }
 0x45c   :  { %v443_v46 = vpop.permute.xlu1 %442 }
 0x45d   :  { %v445_v47 = vadd.f32 %v443_v46, %v429_v39 }
 0x45f   :  { %4745 = vtanh.f32 %v445_v47 }
 0x460   :  { %4747 = vpow2.f32 %v4172_v51 }
 0x46c   :  { %v4746_v48 = vpop.eup %4745 }
 0x46d   :  { %449 = vrot.lane.b32.xlu0 %v4746_v48, %s5009_s12  ;;  %v4748_v52 = vpop.eup %4747 }
 0x46e   :  { %v331_v53 = vadd.f32 1.0, %v4748_v52 }
 0x470   :  { %4749 = vrcp.f32 %v331_v53 }
 0x471   :  { %335 = vrot.lane.b32.xlu0 %v327_v50, %s5007_s29 }
 0x47d   :  { %v4750_v60 = vpop.eup %4749 }
 0x47e   :  { %v345_v26 = vsub.f32 1.0, %v4750_v60  ;;  %v351_v28 = vmul.f32 0.0, %v4750_v60 }
 0x4df   :  { %v450_v56 = vpop.permute.xlu0 %449 }
 0x4e0   :  { %v452_v57 = vmul.f32 %v450_v56, %v447_v55 }
 0x4e2   :  { %v5166_v59 = vadd.f32 %v455_v58, %v452_v57 }
 0x4e3   :  { %v336_v61 = vpop.permute.xlu0 %335 }
 0x4e4   :  { %v338_v62 = vmul.f32 %v4750_v60, %v336_v61  ;;  %v565_v63 = vrot.slane %v5166_v59, 2  ;;  %v668_v38 = vrot.slane %v5166_v59, 6 }
 0x4e6   :  { %340 = vrot.lane.b32.xlu0 %v338_v62, %s5008_s30  ;;  %566 = vrot.lane.b32.xlu1 %v565_v63, %s5009_s12 }
 0x558   :  { %v341_v0 = vpop.permute.xlu0 %340  ;;  %v567_v1 = vpop.permute.xlu1 %566 }
 0x559   :  { %v343_v4 = vadd.f32 %v341_v0, %v327_v50  ;;  %4460 = vmatmul.mubr.msk.f32.vlgmr.msra.gmra.mxu0 %vm139_vm3, %v567_v1 }
 0x55a   :  { %4463 = vmatpush3.msra.mxu0 %v5108_v21  ;;  %4470 = vmatprep.mubr.msk.f32.mxu0 %vm5006_vm2, %v5005_v2 }
 0x55b   :  { %4751 = vtanh.f32 %v343_v4  ;;  %4464 = vmatprep.subr.mxu0 %v5005_v2 }
 0x55c   :  { %4465 = vmatpush3.msra.mxu0 %v5113_v22 }
 0x55d   :  { %4466 = vmatprep.subr.mxu0 %v5005_v2 }
 0x55e   :  { %4467 = vmatpush3.msra.mxu0 %v5120_v23 }
 0x55f   :  { %4468 = vmatprep.subr.mxu0 %v5005_v2 }
 0x560   :  { %4469 = vmatpush3.msra.mxu0 %v5130_v25 }
 0x561   :  { %4491 = vmatprep.subr.mxu0 %v5005_v2 }
 0x568   :  { %v4752_v9 = vpop.eup %4751 }
 0x569   :  { %347 = vrot.lane.b32.xlu0 %v4752_v9, %s5009_s12 }
 0x5db   :  { %v348_v24 = vpop.permute.xlu0 %347 }
 0x5dc   :  { %v350_v27 = vmul.f32 %v348_v24, %v345_v26 }
 0x5de   :  { %v5189_v29 = vadd.f32 %v351_v28, %v350_v27 }
 0x5e0   :  { %v462_v32 = vrot.slane %v5189_v29, 6 }
 0x619   :  { %v636_v10 = vpop.f32.mrf.mxu0 }
 0x61a   :  { %v641_v11 = vrot.slane %v636_v10, 4 }
 0x61b   :  { %v4461_v12 = vpop.f32.mrf.mxu0 }
 0x61c   :  { %v643_v13 = vadd.f32 %v641_v11, %v5094_v7 }
 0x61e   :  { %v644_v14 = vadd.f32 %v5099_v8, %v643_v13 }
 0x620   :  { %652 = vrot.lane.b32.xlu1 %v644_v14, %s5007_s29  ;;  %v4178_v15 = vmul.f32 -1.442695, %v644_v14 }
 0x622   :  { %4753 = vpow2.f32 %v4178_v15 }
 0x62f   :  { %v4754_v16 = vpop.eup %4753 }
 0x630   :  { %v648_v17 = vadd.f32 1.0, %v4754_v16 }
 0x632   :  { %4755 = vrcp.f32 %v648_v17 }
 0x63f   :  { %v4756_v18 = vpop.eup %4755 }
 0x640   :  { %v662_v37 = vsub.f32 1.0, %v4756_v18  ;;  %v670_v40 = vmul.f32 %v4756_v18, %v668_v38 }
 0x692   :  { %v653_v19 = vpop.permute.xlu1 %652 }
 0x693   :  { %v655_v20 = vmul.f32 %v4756_v18, %v653_v19 }
 0x695   :  { %657 = vrot.lane.b32.xlu1 %v655_v20, %s5008_s30 }
 0x699   :  { %458 = vrot.lane.b32.xlu1 %v5166_v59, %s5009_s12 }
 0x707   :  { %v658_v30 = vpop.permute.xlu1 %657 }
 0x708   :  { %v660_v31 = vadd.f32 %v658_v30, %v644_v14 }
 0x70a   :  { %4757 = vtanh.f32 %v660_v31 }
 0x70b   :  { %v459_v33 = vpop.permute.xlu1 %458 }
 0x70c   :  { %v464_v34 = vsel %vm139_vm3, %v459_v33, %v462_v32 }
 0x70d   :  { %v466_v35 = vrot.slane %v464_v34, 2 }
 0x70f   :  { %4453 = vmatmul.mubr.msk.f32.vlgmr.msra.gmra.mxu1 %vm249_vm4, %v466_v35 }
 0x710   :  { %4474 = vmatpush3.msra.mxu1 %v5063_v3  ;;  %4477 = vmatprep.mubr.msk.f32.mxu1 %vm5006_vm2, %v5005_v2 }
 0x711   :  { %4475 = vmatprep.subr.mxu1 %v5005_v2 }
 0x712   :  { %4476 = vmatpush3.msra.mxu1 %v5073_v5 }
 0x713   :  { %4480 = vmatprep.subr.mxu1 %v5005_v2 }
 0x717   :  { %v4758_v36 = vpop.eup %4757 }
 0x718   :  { %664 = vrot.lane.b32.xlu0 %v4758_v36, %s5009_s12 }
 0x78a   :  { %v665_v39 = vpop.permute.xlu0 %664 }
 0x78b   :  { %v667_v41 = vmul.f32 %v665_v39, %v662_v37 }
 0x78d   :  { %v5202_v42 = vadd.f32 %v670_v40, %v667_v41 }
 0x78f   :  { %v780_v43 = vrot.slane %v5202_v42, 4  ;;  %v883_v30 = vrot.slane %v5202_v42, 6 }
 0x791   :  { %781 = vrot.lane.b32.xlu1 %v780_v43, %s5009_s12 }
 0x7cf   :  { %v535_v44 = vpop.f32.mrf.mxu1 }
 0x7d0   :  { %v539_v45 = vadd.f32 %v5161_v49, %v535_v44 }
 0x7d1   :  { %v4454_v46 = vpop.f32.mrf.mxu1 }
 0x7d2   :  { %547 = vrot.lane.b32.xlu0 %v539_v45, %s5007_s29  ;;  %v4176_v48 = vmul.f32 -1.442695, %v539_v45 }
 0x7d4   :  { %4759 = vpow2.f32 %v4176_v48 }
 0x7e1   :  { %v4760_v50 = vpop.eup %4759 }
 0x7e2   :  { %v543_v51 = vadd.f32 1.0, %v4760_v50 }
 0x7e4   :  { %4761 = vrcp.f32 %v543_v51 }
 0x7f1   :  { %v4762_v52 = vpop.eup %4761 }
 0x7f2   :  { %v557_v4 = vsub.f32 1.0, %v4762_v52 }
 0x803   :  { %v782_v47 = vpop.permute.xlu1 %781 }
 0x804   :  { %4478 = vmatmul.mubr.msk.f32.vlgmr.msra.gmra.mxu1 %vm139_vm3, %v782_v47 }
 0x805   :  { %4481 = vmatpush3.msra.mxu1 %v5108_v21  ;;  %4488 = vmatprep.mubr.msk.f32.mxu1 %vm5006_vm2, %v5005_v2 }
 0x806   :  { %4482 = vmatprep.subr.mxu1 %v5005_v2 }
 0x807   :  { %4483 = vmatpush3.msra.mxu1 %v5113_v22 }
 0x808   :  { %4484 = vmatprep.subr.mxu1 %v5005_v2 }
 0x809   :  { %4485 = vmatpush3.msra.mxu1 %v5120_v23 }
 0x80a   :  { %4486 = vmatprep.subr.mxu1 %v5005_v2 }
 0x80b   :  { %4487 = vmatpush3.msra.mxu1 %v5130_v25 }
 0x80c   :  { %4509 = vmatprep.subr.mxu1 %v5005_v2 }
 0x844   :  { %v548_v53 = vpop.permute.xlu0 %547 }
 0x845   :  { %v550_v54 = vmul.f32 %v4762_v52, %v548_v53 }
 0x847   :  { %552 = vrot.lane.b32.xlu1 %v550_v54, %s5008_s30 }
 0x8b9   :  { %v553_v55 = vpop.permute.xlu1 %552 }
 0x8ba   :  { %v555_v56 = vadd.f32 %v553_v55, %v539_v45 }
 0x8bc   :  { %4763 = vtanh.f32 %v555_v56 }
 0x8c4   :  { %v851_v57 = vpop.f32.mrf.mxu1 }
 0x8c5   :  { %v856_v58 = vrot.slane %v851_v57, 2 }
 0x8c6   :  { %v4479_v59 = vpop.f32.mrf.mxu1 }
 0x8c7   :  { %v858_v60 = vadd.f32 %v856_v58, %v5094_v7  ;;  %v563_v7 = vmul.f32 %v4762_v52, %v5189_v29 }
 0x8c9   :  { %v4764_v61 = vpop.eup %4763  ;;  %v859_v62 = vadd.f32 %v5099_v8, %v858_v60 }
 0x8ca   :  { %559 = vrot.lane.b32.xlu1 %v4764_v61, %s5009_s12 }
 0x8cb   :  { %867 = vrot.lane.b32.xlu0 %v859_v62, %s5007_s29  ;;  %v4182_v63 = vmul.f32 -1.442695, %v859_v62 }
 0x8cd   :  { %4765 = vpow2.f32 %v4182_v63 }
 0x8cf   :  { %673 = vrot.lane.b32.xlu0 %v5202_v42, %s5009_s12 }
 0x8da   :  { %v4766_v0 = vpop.eup %4765 }
 0x8db   :  { %v863_v1 = vadd.f32 1.0, %v4766_v0 }
 0x8dd   :  { %4767 = vrcp.f32 %v863_v1 }
 0x8ea   :  { %v4768_v10 = vpop.eup %4767 }
 0x8eb   :  { %v877_v29 = vsub.f32 1.0, %v4768_v10  ;;  %v885_v32 = vmul.f32 %v4768_v10, %v883_v30 }
 0x93c   :  { %v560_v9 = vpop.permute.xlu1 %559 }
 0x93d   :  { %v562_v11 = vmul.f32 %v560_v9, %v557_v4  ;;  %v868_v12 = vpop.permute.xlu0 %867 }
 0x93e   :  { %v870_v13 = vmul.f32 %v4768_v10, %v868_v12 }
 0x93f   :  { %v564_v14 = vadd.f32 %v563_v7, %v562_v11 }
 0x940   :  { %872 = vrot.lane.b32.xlu1 %v870_v13, %s5008_s30 }
 0x941   :  { %v677_v15 = vrot.slane %v564_v14, 4  ;;  %v674_v16 = vpop.permute.xlu0 %673 }
 0x943   :  { %v679_v17 = vsel %vm139_vm3, %v674_v16, %v677_v15 }
 0x944   :  { %v681_v18 = vrot.slane %v679_v17, 4 }
 0x946   :  { %4471 = vmatmul.mubr.msk.f32.vlgmr.msra.gmra.mxu0 %vm249_vm4, %v681_v18 }
 0x947   :  { %4492 = vmatpush3.msra.mxu0 %v5063_v3  ;;  %4495 = vmatprep.mubr.msk.f32.mxu0 %vm5006_vm2, %v5005_v2 }
 0x948   :  { %4493 = vmatprep.subr.mxu0 %v5005_v2 }
 0x949   :  { %4494 = vmatpush3.msra.mxu0 %v5073_v5 }
 0x94a   :  { %4498 = vmatprep.subr.mxu0 %v5005_v2 }
 0x9b2   :  { %v873_v19 = vpop.permute.xlu1 %872 }
 0x9b3   :  { %v875_v20 = vadd.f32 %v873_v19, %v859_v62 }
 0x9b5   :  { %4769 = vtanh.f32 %v875_v20 }
 0x9c2   :  { %v4770_v24 = vpop.eup %4769 }
 0x9c3   :  { %879 = vrot.lane.b32.xlu0 %v4770_v24, %s5009_s12 }
 0xa06   :  { %v750_v26 = vpop.f32.mrf.mxu0 }
 0xa07   :  { %v754_v27 = vadd.f32 %v5161_v49, %v750_v26 }
 0xa08   :  { %v4472_v28 = vpop.f32.mrf.mxu0 }
 0xa09   :  { %762 = vrot.lane.b32.xlu0 %v754_v27, %s5007_s29  ;;  %v4180_v36 = vmul.f32 -1.442695, %v754_v27 }
 0xa0b   :  { %4771 = vpow2.f32 %v4180_v36 }
 0xa18   :  { %v4772_v37 = vpop.eup %4771 }
 0xa19   :  { %v758_v38 = vadd.f32 1.0, %v4772_v37 }
 0xa1b   :  { %4773 = vrcp.f32 %v758_v38 }
 0xa28   :  { %v4774_v39 = vpop.eup %4773 }
 0xa29   :  { %v772_v51 = vsub.f32 1.0, %v4774_v39  ;;  %v778_v53 = vmul.f32 %v4774_v39, %v564_v14 }
 0xa35   :  { %v880_v31 = vpop.permute.xlu0 %879 }
 0xa36   :  { %v882_v33 = vmul.f32 %v880_v31, %v877_v29 }
 0xa38   :  { %v5240_v34 = vadd.f32 %v885_v32, %v882_v33 }
 0xa3a   :  { %v995_v35 = vrot.slane %v5240_v34, 6 }
 0xa3c   :  { %996 = vrot.lane.b32.xlu1 %v995_v35, %s5009_s12 }
 0xa7b   :  { %v763_v40 = vpop.permute.xlu0 %762 }
 0xa7c   :  { %v765_v41 = vmul.f32 %v4774_v39, %v763_v40 }
 0xa7e   :  { %767 = vrot.lane.b32.xlu1 %v765_v41, %s5008_s30 }
 0xa82   :  { %888 = vrot.lane.b32.xlu1 %v5240_v34, %s5009_s12 }
 0xaae   :  { %v997_v42 = vpop.permute.xlu1 %996 }
 0xaaf   :  { %4496 = vmatmul.mubr.msk.f32.vlgmr.msra.gmra.mxu0 %vm139_vm3, %v997_v42 }
 0xab0   :  { %4499 = vmatpush3.msra.mxu0 %v5108_v21  ;;  %4506 = vmatprep.mubr.msk.f32.mxu0 %vm5006_vm2, %v5005_v2 }
 0xab1   :  { %4500 = vmatprep.subr.mxu0 %v5005_v2 }
 0xab2   :  { %4501 = vmatpush3.msra.mxu0 %v5113_v22 }
 0xab3   :  { %4502 = vmatprep.subr.mxu0 %v5005_v2 }
 0xab4   :  { %4503 = vmatpush3.msra.mxu0 %v5120_v23 }
 0xab5   :  { %4504 = vmatprep.subr.mxu0 %v5005_v2 }
 0xab6   :  { %4505 = vmatpush3.msra.mxu0 %v5130_v25 }
 0xab7   :  { %4527 = vmatprep.subr.mxu0 %v5005_v2 }
 0xaf0   :  { %v768_v43 = vpop.permute.xlu1 %767 }
 0xaf1   :  { %v770_v44 = vadd.f32 %v768_v43, %v754_v27 }
 0xaf3   :  { %4775 = vtanh.f32 %v770_v44 }
 0xaf4   :  { %v889_v57 = vpop.permute.xlu1 %888 }
 0xb00   :  { %v4776_v45 = vpop.eup %4775 }
 0xb01   :  { %774 = vrot.lane.b32.xlu0 %v4776_v45, %s5009_s12 }
 0xb6f   :  { %v1066_v46 = vpop.f32.mrf.mxu0 }
 0xb70   :  { %v1070_v47 = vadd.f32 %v5092_v6, %v1066_v46 }
 0xb71   :  { %v4497_v48 = vpop.f32.mrf.mxu0 }
 0xb72   :  { %v1071_v50 = vadd.f32 %v5099_v8, %v1070_v47 }
 0xb73   :  { %v775_v52 = vpop.permute.xlu0 %774 }
 0xb74   :  { %v777_v54 = vmul.f32 %v775_v52, %v772_v51  ;;  %1079 = vrot.lane.b32.xlu0 %v1071_v50, %s5007_s29  ;;  %v4186_v60 = vmul.f32 -1.442695, %v1071_v50 }
 0xb76   :  { %v779_v55 = vadd.f32 %v778_v53, %v777_v54  ;;  %4777 = vpow2.f32 %v4186_v60 }
 0xb78   :  { %v892_v56 = vrot.slane %v779_v55, 2 }
 0xb7a   :  { %v894_v58 = vsel %vm139_vm3, %v889_v57, %v892_v56 }
 0xb7b   :  { %v896_v59 = vrot.slane %v894_v58, 6 }
 0xb7d   :  { %4489 = vmatmul.mubr.msk.f32.vlgmr.msra.gmra.mxu1 %vm249_vm4, %v896_v59 }
 0xb7e   :  { %4510 = vmatpush3.msra.mxu1 %v5063_v3  ;;  %4513 = vmatprep.mubr.msk.f32.mxu1 %vm5006_vm2, %v5005_v2 }
 0xb7f   :  { %4511 = vmatprep.subr.mxu1 %v5005_v2 }
 0xb80   :  { %4512 = vmatpush3.msra.mxu1 %v5073_v5 }
 0xb81   :  { %4516 = vmatprep.subr.mxu1 %v5005_v2 }
 0xb83   :  { %v4778_v61 = vpop.eup %4777 }
 0xb84   :  { %v1075_v62 = vadd.f32 1.0, %v4778_v61 }
 0xb86   :  { %4779 = vrcp.f32 %v1075_v62 }
 0xb93   :  { %v4780_v63 = vpop.eup %4779 }
 0xb94   :  { %v1089_v16 = vsub.f32 1.0, %v4780_v63  ;;  %v1096_v18 = vmul.f32 %v4780_v63, %v995_v35 }
 0xbe6   :  { %v1080_v0 = vpop.permute.xlu0 %1079 }
 0xbe7   :  { %v1082_v1 = vmul.f32 %v4780_v63, %v1080_v0 }
 0xbe9   :  { %1084 = vrot.lane.b32.xlu1 %v1082_v1, %s5008_s30 }
 0xc3d   :  { %v965_v4 = vpop.f32.mrf.mxu1 }
 0xc3e   :  { %v969_v12 = vadd.f32 %v5161_v49, %v965_v4 }
 0xc3f   :  { %v4490_v9 = vpop.f32.mrf.mxu1 }
 0xc40   :  { %v4184_v13 = vmul.f32 -1.442695, %v969_v12 }
 0xc5b   :  { %v1085_v10 = vpop.permute.xlu1 %1084 }
 0xc5c   :  { %v1087_v7 = vadd.f32 %v1085_v10, %v1071_v50 }
 0xc5e   :  { %4781 = vtanh.f32 %v1087_v7 }
 0xc5f   :  { %4783 = vpow2.f32 %v4184_v13 }
 0xc6b   :  { %v4782_v11 = vpop.eup %4781 }
 0xc6c   :  { %1091 = vrot.lane.b32.xlu0 %v4782_v11, %s5009_s12  ;;  %v4784_v14 = vpop.eup %4783 }
 0xc6d   :  { %v973_v15 = vadd.f32 1.0, %v4784_v14 }
 0xc6f   :  { %4785 = vrcp.f32 %v973_v15 }
 0xc70   :  { %977 = vrot.lane.b32.xlu0 %v969_v12, %s5007_s29 }
 0xc7c   :  { %v4786_v26 = vpop.eup %4785 }
 0xc7d   :  { %v987_v32 = vsub.f32 1.0, %v4786_v26  ;;  %v993_v34 = vmul.f32 %v4786_v26, %v779_v55 }
 0xcde   :  { %v1092_v17 = vpop.permute.xlu0 %1091 }
 0xcdf   :  { %v1094_v19 = vmul.f32 %v1092_v17, %v1089_v16 }
 0xce1   :  { %v5278_v20 = vadd.f32 %v1096_v18, %v1094_v19 }
 0xce2   :  { %v978_v24 = vpop.permute.xlu0 %977 }
 0xce3   :  { %1099 = vrot.lane.b32.xlu1 %v5278_v20, %s5009_s12  ;;  %v980_v27 = vmul.f32 %v4786_v26, %v978_v24  ;;  %v1302_v62 = vrot.slane %v5278_v20, 6 }
 0xce7   :  { %982 = vrot.lane.b32.xlu1 %v980_v27, %s5008_s30 }
 0xd55   :  { %v1100_v28 = vpop.permute.xlu1 %1099 }
 0xd56   :  { %4514 = vmatmul.mubr.msk.f32.vlgmr.msra.gmra.mxu1 %vm139_vm3, %v1100_v28 }
 0xd57   :  { %4517 = vmatpush3.msra.mxu1 %v5108_v21  ;;  %4524 = vmatprep.mubr.msk.f32.mxu1 %vm5006_vm2, %v5005_v2 }
 0xd58   :  { %4518 = vmatprep.subr.mxu1 %v5005_v2 }
 0xd59   :  { %v983_v29 = vpop.permute.xlu1 %982  ;;  %4519 = vmatpush3.msra.mxu1 %v5113_v22 }
 0xd5a   :  { %v985_v30 = vadd.f32 %v983_v29, %v969_v12  ;;  %4520 = vmatprep.subr.mxu1 %v5005_v2 }
 0xd5b   :  { %4521 = vmatpush3.msra.mxu1 %v5120_v23 }
 0xd5c   :  { %4787 = vtanh.f32 %v985_v30  ;;  %4522 = vmatprep.subr.mxu1 %v5005_v2 }
 0xd5d   :  { %4523 = vmatpush3.msra.mxu1 %v5130_v25 }
 0xd5e   :  { %4545 = vmatprep.subr.mxu1 %v5005_v2 }
 0xd69   :  { %v4788_v31 = vpop.eup %4787 }
 0xd6a   :  { %989 = vrot.lane.b32.xlu0 %v4788_v31, %s5009_s12 }
 0xddc   :  { %v990_v33 = vpop.permute.xlu0 %989 }
 0xddd   :  { %v992_v35 = vmul.f32 %v990_v33, %v987_v32 }
 0xddf   :  { %v5295_v36 = vadd.f32 %v993_v34, %v992_v35 }
 0xde1   :  { %v1102_v37 = vsel %vm139_vm3, %v1100_v28, %v5295_v36 }
 0xde2   :  { %4507 = vmatmul.mubr.msk.f32.vlgmr.msra.gmra.mxu0 %vm249_vm4, %v1102_v37 }
 0xde3   :  { %4528 = vmatpush3.msra.mxu0 %v5063_v3  ;;  %4531 = vmatprep.mubr.msk.f32.mxu0 %vm5006_vm2, %v5005_v2 }
 0xde4   :  { %4529 = vmatprep.subr.mxu0 %v5005_v2 }
 0xde5   :  { %4530 = vmatpush3.msra.mxu0 %v5073_v5 }
 0xde6   :  { %4534 = vmatprep.subr.mxu0 %v5005_v2 }
 0xe16   :  { %v1270_v38 = vpop.f32.mrf.mxu1 }
 0xe17   :  { %v1275_v39 = vrot.slane %v1270_v38, 6 }
 0xe18   :  { %v4515_v40 = vpop.f32.mrf.mxu1 }
 0xe19   :  { %v1277_v41 = vadd.f32 %v5092_v6, %v1275_v39 }
 0xe1b   :  { %v1278_v42 = vadd.f32 %v5099_v8, %v1277_v41 }
 0xe1d   :  { %1286 = vrot.lane.b32.xlu1 %v1278_v42, %s5007_s29  ;;  %v4190_v43 = vmul.f32 -1.442695, %v1278_v42 }
 0xe1f   :  { %4789 = vpow2.f32 %v4190_v43 }
 0xe2c   :  { %v4790_v44 = vpop.eup %4789 }
 0xe2d   :  { %v1282_v45 = vadd.f32 1.0, %v4790_v44 }
 0xe2f   :  { %4791 = vrcp.f32 %v1282_v45 }
 0xe3c   :  { %v4792_v46 = vpop.eup %4791 }
 0xe3d   :  { %v1296_v63 = vsub.f32 1.0, %v4792_v46  ;;  %v1304_v1 = vmul.f32 %v4792_v46, %v1302_v62 }
 0xe8f   :  { %v1287_v47 = vpop.permute.xlu1 %1286 }
 0xe90   :  { %v1289_v48 = vmul.f32 %v4792_v46, %v1287_v47 }
 0xe92   :  { %1291 = vrot.lane.b32.xlu0 %v1289_v48, %s5008_s30 }
 0xea2   :  { %v1172_v50 = vpop.f32.mrf.mxu0 }
 0xea3   :  { %v1176_v51 = vadd.f32 %v5161_v49, %v1172_v50 }
 0xea4   :  { %v4508_v52 = vpop.f32.mrf.mxu0 }
 0xea5   :  { %1184 = vrot.lane.b32.xlu0 %v1176_v51, %s5007_s29  ;;  %v4188_v53 = vmul.f32 -1.442695, %v1176_v51 }
 0xea7   :  { %4793 = vpow2.f32 %v4188_v53 }
 0xeb4   :  { %v4794_v54 = vpop.eup %4793 }
 0xeb5   :  { %v1180_v57 = vadd.f32 1.0, %v4794_v54 }
 0xf04   :  { %v1292_v55 = vpop.permute.xlu0 %1291 }
 0xf05   :  { %v1294_v56 = vadd.f32 %v1292_v55, %v1278_v42 }
 0xf07   :  { %4795 = vtanh.f32 %v1294_v56 }
 0xf08   :  { %4797 = vrcp.f32 %v1180_v57 }
 0xf14   :  { %v4796_v58 = vpop.eup %4795 }
 0xf15   :  { %1298 = vrot.lane.b32.xlu1 %v4796_v58, %s5009_s12  ;;  %v4798_v59 = vpop.eup %4797 }
 0xf16   :  { %v1194_v14 = vsub.f32 1.0, %v4798_v59  ;;  %v1200_v16 = vmul.f32 %v4798_v59, %v5295_v36 }
 0xf17   :  { %v1185_v60 = vpop.permute.xlu0 %1184 }
 0xf18   :  { %v1187_v61 = vmul.f32 %v4798_v59, %v1185_v60 }
 0xf1a   :  { %1189 = vrot.lane.b32.xlu0 %v1187_v61, %s5008_s30 }
 0xf87   :  { %v1299_v0 = vpop.permute.xlu1 %1298 }
 0xf88   :  { %v1301_v4 = vmul.f32 %v1299_v0, %v1296_v63 }
 0xf8a   :  { %v5315_v9 = vadd.f32 %v1304_v1, %v1301_v4 }
 0xf8c   :  { %1307 = vrot.lane.b32.xlu0 %v5315_v9, %s5009_s12  ;;  %v1190_v10 = vpop.permute.xlu0 %1189  ;;  %v1414_v7 = vrot.slane %v5315_v9, 2  ;;  %v1517_v53 = vrot.slane %v5315_v9, 6 }
 0xf8d   :  { %v1192_v11 = vadd.f32 %v1190_v10, %v1176_v51 }
 0xf8e   :  { %1415 = vrot.lane.b32.xlu1 %v1414_v7, %s5009_s12 }
 0xf8f   :  { %4799 = vtanh.f32 %v1192_v11 }
 0xf9c   :  { %v4800_v12 = vpop.eup %4799 }
 0xf9d   :  { %1196 = vrot.lane.b32.xlu1 %v4800_v12, %s5009_s12 }
 0xffe   :  { %v1308_v20 = vpop.permute.xlu0 %1307 }
0x1000   :  { %v1416_v13 = vpop.permute.xlu1 %1415 }
0x1001   :  { %4532 = vmatmul.mubr.msk.f32.vlgmr.msra.gmra.mxu0 %vm139_vm3, %v1416_v13 }
0x1002   :  { %4535 = vmatpush3.msra.mxu0 %v5108_v21  ;;  %4542 = vmatprep.mubr.msk.f32.mxu0 %vm5006_vm2, %v5005_v2 }
0x1003   :  { %4536 = vmatprep.subr.mxu0 %v5005_v2 }
0x1004   :  { %4537 = vmatpush3.msra.mxu0 %v5113_v22 }
0x1005   :  { %4538 = vmatprep.subr.mxu0 %v5005_v2 }
0x1006   :  { %4539 = vmatpush3.msra.mxu0 %v5120_v23 }
0x1007   :  { %4540 = vmatprep.subr.mxu0 %v5005_v2 }
0x1008   :  { %4541 = vmatpush3.msra.mxu0 %v5130_v25 }
0x1009   :  { %4563 = vmatprep.subr.mxu0 %v5005_v2 }
0x100f   :  { %v1197_v15 = vpop.permute.xlu1 %1196 }
0x1010   :  { %v1199_v17 = vmul.f32 %v1197_v15, %v1194_v14 }
0x1012   :  { %v1201_v18 = vadd.f32 %v1200_v16, %v1199_v17 }
0x1014   :  { %v1311_v19 = vrot.slane %v1201_v18, 6 }
0x1016   :  { %v1313_v24 = vsel %vm139_vm3, %v1308_v20, %v1311_v19 }
0x1017   :  { %v1315_v26 = vrot.slane %v1313_v24, 2 }
0x1019   :  { %4525 = vmatmul.mubr.msk.f32.vlgmr.msra.gmra.mxu1 %vm249_vm4, %v1315_v26 }
0x101a   :  { %4546 = vmatpush3.msra.mxu1 %v5063_v3  ;;  %4549 = vmatprep.mubr.msk.f32.mxu1 %vm5006_vm2, %v5005_v2 }
0x101b   :  { %4547 = vmatprep.subr.mxu1 %v5005_v2 }
0x101c   :  { %4548 = vmatpush3.msra.mxu1 %v5073_v5 }
0x101d   :  { %4552 = vmatprep.subr.mxu1 %v5005_v2 }
0x10c1   :  { %v1485_v27 = vpop.f32.mrf.mxu0 }
0x10c2   :  { %v1490_v28 = vrot.slane %v1485_v27, 4 }
0x10c3   :  { %v4533_v29 = vpop.f32.mrf.mxu0 }
0x10c4   :  { %v1492_v30 = vadd.f32 %v5092_v6, %v1490_v28 }
0x10c6   :  { %v1493_v31 = vadd.f32 %v5099_v8, %v1492_v30 }
0x10c8   :  { %1501 = vrot.lane.b32.xlu1 %v1493_v31, %s5007_s29  ;;  %v4194_v34 = vmul.f32 -1.442695, %v1493_v31 }
0x10ca   :  { %4801 = vpow2.f32 %v4194_v34 }
0x10d7   :  { %v4802_v5 = vpop.eup %4801 }
0x10d8   :  { %v1497_v35 = vadd.f32 1.0, %v4802_v5 }
0x10d9   :  { %v1384_v32 = vpop.f32.mrf.mxu1 }
0x10da   :  { %v1388_v3 = vadd.f32 %v5161_v49, %v1384_v32  ;;  %4803 = vrcp.f32 %v1497_v35 }
0x10db   :  { %v4526_v33 = vpop.f32.mrf.mxu1 }
0x10dc   :  { %1396 = vrot.lane.b32.xlu1 %v1388_v3, %s5007_s29  ;;  %v4192_v36 = vmul.f32 -1.442695, %v1388_v3 }
0x10de   :  { %4805 = vpow2.f32 %v4192_v36 }
0x10e7   :  { %v4804_v37 = vpop.eup %4803 }
0x10e8   :  { %v1511_v52 = vsub.f32 1.0, %v4804_v37  ;;  %v1519_v55 = vmul.f32 %v4804_v37, %v1517_v53 }
0x10eb   :  { %v4806_v38 = vpop.eup %4805 }
0x10ec   :  { %v1392_v41 = vadd.f32 1.0, %v4806_v38 }
0x10ee   :  { %4807 = vrcp.f32 %v1392_v41 }
0x10fb   :  { %v4808_v42 = vpop.eup %4807 }
0x10fc   :  { %v1406_v60 = vsub.f32 1.0, %v4808_v42  ;;  %v1412_v62 = vmul.f32 %v4808_v42, %v1201_v18 }
0x113a   :  { %v1502_v39 = vpop.permute.xlu1 %1501 }
0x113b   :  { %v1504_v40 = vmul.f32 %v4804_v37, %v1502_v39 }
0x113d   :  { %1506 = vrot.lane.b32.xlu0 %v1504_v40, %s5008_s30 }
0x114e   :  { %v1397_v43 = vpop.permute.xlu1 %1396 }
0x114f   :  { %v1399_v44 = vmul.f32 %v4808_v42, %v1397_v43 }
0x1151   :  { %1401 = vrot.lane.b32.xlu1 %v1399_v44, %s5008_s30 }
0x11af   :  { %v1507_v45 = vpop.permute.xlu0 %1506 }
0x11b0   :  { %v1509_v46 = vadd.f32 %v1507_v45, %v1493_v31 }
0x11b2   :  { %4809 = vtanh.f32 %v1509_v46 }
0x11bf   :  { %v4810_v47 = vpop.eup %4809 }
0x11c0   :  { %1513 = vrot.lane.b32.xlu0 %v4810_v47, %s5009_s12 }
0x11c3   :  { %v1402_v48 = vpop.permute.xlu1 %1401 }
0x11c4   :  { %v1404_v50 = vadd.f32 %v1402_v48, %v1388_v3 }
0x11c6   :  { %4811 = vtanh.f32 %v1404_v50 }
0x11d3   :  { %v4812_v51 = vpop.eup %4811 }
0x11d4   :  { %1408 = vrot.lane.b32.xlu1 %v4812_v51, %s5009_s12 }
0x1232   :  { %v1514_v54 = vpop.permute.xlu0 %1513 }
0x1233   :  { %v1516_v56 = vmul.f32 %v1514_v54, %v1511_v52 }
0x1235   :  { %v5352_v57 = vadd.f32 %v1519_v55, %v1516_v56 }
0x1237   :  { %v1629_v58 = vrot.slane %v5352_v57, 4  ;;  %v1732_v34 = vrot.slane %v5352_v57, 6 }
0x1239   :  { %1630 = vrot.lane.b32.xlu0 %v1629_v58, %s5009_s12 }
0x123d   :  { %1522 = vrot.lane.b32.xlu0 %v5352_v57, %s5009_s12 }
0x1246   :  { %v1409_v59 = vpop.permute.xlu1 %1408 }
0x1247   :  { %v1411_v61 = vmul.f32 %v1409_v59, %v1406_v60  ;;  %v37_v59 = vld [vmem:[%s5955_s3 + $0x80] sm:$0xff]  ;;  %v36_v60 = vld [vmem:[%s5955_s3 + $0x78] sm:$0xff] }
0x1249   :  { %v5358_v63 = vadd.f32 %v1412_v62, %v1411_v61  ;;  %v35_v61 = vld [vmem:[%s5955_s3 + $0x70] sm:$0xff]  ;;  %v40_v62 = vld [vmem:[%s5955_s3 + $0x98] sm:$0xff] }
0x124b   :  { %v1526_v1 = vrot.slane %v5358_v63, 4 }
0x12ab   :  { %v1631_v0 = vpop.permute.xlu0 %1630 }
0x12ac   :  { %4550 = vmatmul.mubr.msk.f32.vlgmr.msra.gmra.mxu1 %vm139_vm3, %v1631_v0 }
0x12ad   :  { %4553 = vmatpush3.msra.mxu1 %v5108_v21  ;;  %4560 = vmatprep.mubr.msk.f32.mxu1 %vm5006_vm2, %v5005_v2 }
0x12ae   :  { %4554 = vmatprep.subr.mxu1 %v5005_v2 }
0x12af   :  { %v1523_v4 = vpop.permute.xlu0 %1522  ;;  %4555 = vmatpush3.msra.mxu1 %v5113_v22 }
0x12b0   :  { %v1528_v9 = vsel %vm139_vm3, %v1523_v4, %v1526_v1  ;;  %4556 = vmatprep.subr.mxu1 %v5005_v2 }
0x12b1   :  { %v1530_v10 = vrot.slane %v1528_v9, 4  ;;  %4557 = vmatpush3.msra.mxu1 %v5120_v23 }
0x12b2   :  { %4558 = vmatprep.subr.mxu1 %v5005_v2 }
0x12b3   :  { %4543 = vmatmul.mubr.msk.f32.vlgmr.msra.gmra.mxu0 %vm249_vm4, %v1530_v10  ;;  %4559 = vmatpush3.msra.mxu1 %v5130_v25 }
0x12b4   :  { %4571 = vmatprep.mubr.msk.f32.mxu0 %vm5006_vm2, %v5005_v2  ;;  %4574 = vmatprep.subr.mxu1 %v5005_v2 }
0x136c   :  { %v1700_v21 = vpop.f32.mrf.mxu1 }
0x136d   :  { %v1705_v22 = vrot.slane %v1700_v21, 2 }
0x136e   :  { %v4551_v7 = vpop.f32.mrf.mxu1 }
0x136f   :  { %v1707_v11 = vadd.f32 %v5092_v6, %v1705_v22 }
0x1371   :  { %v1708_v12 = vadd.f32 %v5099_v8, %v1707_v11  ;;  %v39_v11 = vld [vmem:[%s5955_s3 + $0x90] sm:$0xff] }
0x1373   :  { %1716 = vrot.lane.b32.xlu1 %v1708_v12, %s5007_s29  ;;  %v1599_v23 = vpop.f32.mrf.mxu0  ;;  %v4198_v25 = vmul.f32 -1.442695, %v1708_v12 }
0x1374   :  { %v1603_v13 = vadd.f32 %v5161_v49, %v1599_v23  ;;  %v5010_v23 = vmov 0  }
0x1375   :  { %v4544_v14 = vpop.f32.mrf.mxu0  ;;  %4813 = vpow2.f32 %v4198_v25  ;;  %4734 = vset.pattern.permute.xlu0 %v5010_v23  ;;  %4733 = vset.pattern.permute.xlu1 %v5010_v23 }
0x1376   :  { %1611 = vrot.lane.b32.xlu0 %v1603_v13, %s5007_s29  ;;  %v4196_v15 = vmul.f32 -1.442695, %v1603_v13 }
0x1378   :  { %4815 = vpow2.f32 %v4196_v15 }
0x1382   :  { %v4814_v16 = vpop.eup %4813 }
0x1383   :  { %v1712_v18 = vadd.f32 1.0, %v4814_v16  ;;  %v5433_v16 = vld [vmem:[%s5955_s3 + $0x48] sm:$0x7] }
0x1385   :  { %v4816_v17 = vpop.eup %4815  ;;  %4817 = vrcp.f32 %v1712_v18 }
0x1386   :  { %v1607_v19 = vadd.f32 1.0, %v4816_v17  ;;  %v2003_v17 = vlaneseq }
0x1388   :  { %4819 = vrcp.f32 %v1607_v19  ;;  %v2004_v18 = vshrl.u32 %v2003_v17, 7  ;;  %v5442_v19 = vld [vmem:[%s5955_s3 + $0x40] sm:$0xff] }
0x1392   :  { %v4818_v6 = vpop.eup %4817 }
0x1393   :  { %v1726_v33 = vsub.f32 1.0, %v4818_v6  ;;  %v1734_v35 = vmul.f32 %v4818_v6, %v1732_v34 }
0x1395   :  { %v4820_v24 = vpop.eup %4819 }
0x1396   :  { %v1621_v39 = vsub.f32 1.0, %v4820_v24  ;;  %v1627_v41 = vmul.f32 %v4820_v24, %v5358_v63 }
0x13e5   :  { %v1717_v8 = vpop.permute.xlu1 %1716 }
0x13e6   :  { %v1719_v20 = vmul.f32 %v4818_v6, %v1717_v8  ;;  %v5448_v6 = vld [vmem:[%s5955_s3 + $0x38] sm:$0xff]  ;;  %v4203_v8 = vld [vmem:[%s5956_s4 + $0x5] ss:$0 sm:$0xff] }
0x13e8   :  { %1721 = vrot.lane.b32.xlu1 %v1719_v20, %s5008_s30  ;;  %v1612_v26 = vpop.permute.xlu0 %1611  ;;  %v2005_v20 = vsub.s32 0, %v2004_v18 }
0x13e9   :  { %v1614_v27 = vmul.f32 %v4820_v24, %v1612_v26  ;;  %v2009_v24 = vsub.s32 1, %v2004_v18  ;;  %v4205_v26 = vld [vmem:[%s5956_s4 + $0x7] ss:$0 sm:$0xff] }
0x13eb   :  { %1616 = vrot.lane.b32.xlu0 %v1614_v27, %s5008_s30 }
0x145a   :  { %v1722_v28 = vpop.permute.xlu1 %1721 }
0x145b   :  { %v1724_v29 = vadd.f32 %v1722_v28, %v1708_v12  ;;  %v2013_v12 = vld [vmem:[%s5954_s2] sm:$0xff] }
0x145d   :  { %4821 = vtanh.f32 %v1724_v29  ;;  %v1617_v30 = vpop.permute.xlu0 %1616 }
0x145e   :  { %v1619_v31 = vadd.f32 %v1617_v30, %v1603_v13  ;;  %v4201_v13 = vld [vmem:[%s5956_s4 + $0x4] ss:$0 sm:$0xff] }
0x1460   :  { %4823 = vtanh.f32 %v1619_v31 }
0x146a   :  { %v4822_v32 = vpop.eup %4821 }
0x146b   :  { %1728 = vrot.lane.b32.xlu1 %v4822_v32, %s5009_s12 }
0x146d   :  { %v4824_v3 = vpop.eup %4823 }
0x146e   :  { %1623 = vrot.lane.b32.xlu0 %v4824_v3, %s5009_s12 }
0x14dd   :  { %v1729_v5 = vpop.permute.xlu1 %1728 }
0x14de   :  { %v1731_v36 = vmul.f32 %v1729_v5, %v1726_v33 }
0x14e0   :  { %v1735_v37 = vadd.f32 %v1734_v35, %v1731_v36  ;;  %v1624_v38 = vpop.permute.xlu0 %1623 }
0x14e1   :  { %v1626_v40 = vmul.f32 %v1624_v38, %v1621_v39 }
0x14e2   :  { %1737 = vrot.lane.b32.xlu1 %v1735_v37, %s5009_s12  ;;  %v2033_v37 = vld [vmem:[%s5953_s1] sm:$0x3] }
0x14e3   :  { %v1628_v42 = vadd.f32 %v1627_v41, %v1626_v40  ;;  %v2037_v38 = vrot.slane %v2033_v37, %v2005_v20  ;;  %v5470_v39 = vrot.slane %v2033_v37, %v2009_v24 }
0x14e5   :  { %v1741_v43 = vrot.slane %v1628_v42, 2  ;;  %v5473_v40 = vsel %vm2011_vm5, %v2037_v38, %v5470_v39 }
0x1554   :  { %v1738_v44 = vpop.permute.xlu1 %1737 }
0x1555   :  { %v1743_v45 = vsel %vm139_vm3, %v1738_v44, %v1741_v43 }
0x1556   :  { %v1745_v46 = vrot.slane %v1743_v45, 6  ;;  %v5484_v45 = vld [vmem:[%s5956_s4 + $0x2] ss:$0 sm:$0xff] }
0x1558   :  { %4561 = vmatmul.mubr.msk.f32.vlgmr.msra.gmra.mxu1 %vm249_vm4, %v1745_v46 }
0x1559   :  { %4578 = vmatprep.mubr.msk.f32.mxu1 %vm5006_vm2, %v5005_v2  ;;  %4575 = vmatpush3.msra.mxu1 %v40_v62 }
0x155a   :  { %4576 = vmatprep.subr.mxu1 %v5005_v2 }
0x155b   :  { %4577 = vmatpush3.msra.mxu1 %v39_v11 }
0x1618   :  { %v1814_v47 = vpop.f32.mrf.mxu1 }
0x1619   :  { %v1818_v48 = vadd.f32 %v5161_v49, %v1814_v47  ;;  %v38_v49 = vld [vmem:[%s5955_s3 + $0x88] sm:$0xff] }
0x161a   :  { %v4562_v50 = vpop.f32.mrf.mxu1  ;;  %4564 = vmatpush3.msra.mxu0 %v38_v49 }
0x161b   :  { %1826 = vrot.lane.b32.xlu0 %v1818_v48, %s5007_s29  ;;  %v4200_v51 = vmul.f32 -1.442695, %v1818_v48  ;;  %4565 = vmatprep.subr.mxu0 %v5005_v2 }
0x161c   :  { %4566 = vmatpush3.msra.mxu0 %v37_v59 }
0x161d   :  { %4825 = vpow2.f32 %v4200_v51  ;;  %4567 = vmatprep.subr.mxu0 %v5005_v2 }
0x161e   :  { %4568 = vmatpush3.msra.mxu0 %v36_v60 }
0x161f   :  { %4569 = vmatprep.subr.mxu0 %v5005_v2  ;;  %v2014_v2 = vld [vmem:[%s5954_s2 + $0x8] sm:$0x3] }
0x1620   :  { %4570 = vmatpush3.msra.mxu0 %v35_v61 }
0x1621   :  { %4581 = vmatprep.subr.msk.mxu0 %vm60_vm0, %v5433_v16 }
0x162a   :  { %v4826_v52 = vpop.eup %4825 }
0x162b   :  { %v1822_v53 = vadd.f32 1.0, %v4826_v52 }
0x162d   :  { %4827 = vrcp.f32 %v1822_v53 }
0x163a   :  { %v4828_v54 = vpop.eup %4827 }
0x163b   :  { %v1836_v0 = vsub.f32 1.0, %v4828_v54  ;;  %v1842_v4 = vmul.f32 %v4828_v54, %v1628_v42 }
0x168d   :  { %v1827_v55 = vpop.permute.xlu0 %1826 }
0x168e   :  { %v1829_v56 = vmul.f32 %v4828_v54, %v1827_v55 }
0x1690   :  { %1831 = vrot.lane.b32.xlu1 %v1829_v56, %s5008_s30 }
0x1694   :  { %2017 = vperm.xlu1 %4733, %v2013_v12  }
0x1702   :  { %v1832_v57 = vpop.permute.xlu1 %1831 }
0x1703   :  { %v1834_v58 = vadd.f32 %v1832_v57, %v1818_v48 }
0x1705   :  { %4829 = vtanh.f32 %v1834_v58 }
0x170f   :  { %v2018_v27 = vpop.permute.xlu1 %2017 }
0x1710   :  { %v2029_v31 = vmul.f32 %v4205_v26, %v2018_v27 }
0x1712   :  { %v4830_v63 = vpop.eup %4829 }
0x1713   :  { %1838 = vrot.lane.b32.xlu0 %v4830_v63, %s5009_s12 }
0x1717   :  { %2022 = vperm.xlu0 %4734, %v2014_v2  }
0x1785   :  { %v1839_v1 = vpop.permute.xlu0 %1838 }
0x1786   :  { %v1841_v9 = vmul.f32 %v1839_v1, %v1836_v0 }
0x1788   :  { %v1843_v10 = vadd.f32 %v1842_v4, %v1841_v9  ;;  %v5497_v4 = vld [vmem:[%s5955_s3 + $0x68] sm:$0xff]  ;;  %v5502_v9 = vld [vmem:[%s5955_s3 + $0x60] sm:$0xff] }
0x1789   :  { %4590 = vmatprep.subr.mxu1 %v5497_v4 }
0x178a   :  { %v1845_v21 = vrot.slane %v1843_v10, 2 }
0x178c   :  { %v1847_v22 = vsel %vm139_vm3, %v1738_v44, %v1845_v21 }
0x178d   :  { %v1853_v7 = vrot.slane %v1847_v22, 6  ;;  %v5513_v22 = vld [vmem:[%s5955_s3 + $0x58] sm:$0xff] }
0x178f   :  { %4572 = vmatmul.mubr.msk.f32.vlgmr.msra.gmra.mxu0 %vm249_vm4, %v1853_v7  ;;  %v5519_v7 = vld [vmem:[%s5955_s3 + $0x50] sm:$0xff] }
0x1790   :  { %4582 = vmatpush3.msk.msra.mxu0 %vm60_vm0, %v5433_v16 }
0x1791   :  { %4583 = vmatprep.subr.mxu0 %v5442_v19 }
0x1792   :  { %4584 = vmatpush3.msra.mxu0 %v5442_v19  ;;  %v2023_v33 = vpop.permute.xlu0 %2022 }
0x1793   :  { %4585 = vmatprep.subr.mxu0 %v5448_v6  ;;  %v2030_v5 = vmul.f32 %v4205_v26, %v2023_v33 }
0x1794   :  { %4586 = vmatpush3.msra.mxu0 %v5448_v6 }
0x184f   :  { %v1922_v14 = vpop.f32.mrf.mxu0 }
0x1850   :  { %v1923_v25 = vadd.f32 %v4201_v13, %v1922_v14 }
0x1851   :  { %v4573_v15 = vpop.f32.mrf.mxu0 }
0x1852   :  { %4579 = vmatmul.mubr.msk.f32.vlgmr.msra.gmra.mxu1 %vm139_vm3, %v1923_v25 }
0x1853   :  { %4591 = vmatpush3.msra.mxu1 %v5497_v4 }
0x1854   :  { %4592 = vmatprep.subr.mxu1 %v5502_v9 }
0x1855   :  { %4593 = vmatpush3.msra.mxu1 %v5502_v9 }
0x1856   :  { %4594 = vmatprep.subr.mxu1 %v5513_v22 }
0x1857   :  { %4595 = vmatpush3.msra.mxu1 %v5513_v22 }
0x1858   :  { %4596 = vmatprep.subr.mxu1 %v5519_v7 }
0x1859   :  { %4597 = vmatpush3.msra.mxu1 %v5519_v7 }
0x185a   :  { %4617 = vmatprep.subr.mxu1 %v5497_v4 }
0x1912   :  { %v1999_v28 = vpop.f32.mrf.mxu1 }
0x1913   :  { %v2000_v29 = vadd.f32 %v4203_v8, %v1999_v28 }
0x1914   :  { %v4580_v30 = vpop.f32.mrf.mxu1 }
0x1915   :  { %v2006_v32 = vrot.slane %v2000_v29, %v2005_v20  ;;  %v2010_v3 = vrot.slane %v2000_v29, %v2009_v24  ;;  %v5551_v29 = vld [vmem:[%s5956_s4 + $0x3] ss:$0 sm:$0xff] }
0x1917   :  { %v2012_v34 = vsel %vm2011_vm5, %v2006_v32, %v2010_v3  ;;  %v5463_v36 = vadd.f32 %v2030_v5, %v2010_v3 }
0x1918   :  { %v5459_v35 = vadd.f32 %v2029_v31, %v2012_v34 }
0x191a   :  { %2045 = vrot.lane.b32.xlu1 %v5459_v35, %s5011_s21 }
0x191e   :  { %2047 = vrot.lane.b32.xlu1 %v5463_v36, %s5011_s21 }
0x198c   :  { %v2046_v41 = vpop.permute.xlu1 %2045 }
0x198d   :  { %v2051_v42 = vsel %vm53_vm1, %v5473_v40, %v2046_v41 }
0x198e   :  { %4587 = vmatprep.mubr.msk.f32.mxu0 %vm2053_vm6, %v2051_v42 }
0x1990   :  { %v2048_v43 = vpop.permute.xlu1 %2047 }
0x1991   :  { %v2052_v44 = vsel %vm53_vm1, %v5470_v39, %v2048_v43 }
0x1992   :  { %4588 = vmatmul.mubr.msk.f32.vlgmr.msra.gmra.mxu0 %vm2053_vm6, %v2052_v44 }
0x1a52   :  { %v4589_v46 = vpop.f32.mrf.mxu0 }
0x1a53   :  { %v2143_v47 = vadd.f32 %v4589_v46, %v5484_v45 }
0x1a54   :  { %v2129_v48 = vpop.f32.mrf.mxu0 }
0x1a55   :  { %v2142_v50 = vadd.f32 %v5484_v45, %v2129_v48  ;;  %2160 = vrot.lane.b32.xlu1 %v2143_v47, %s5007_s29  ;;  %v4211_v51 = vmul.f32 -1.442695, %v2143_v47 }
0x1a57   :  { %2158 = vrot.lane.b32.xlu0 %v2142_v50, %s5007_s29  ;;  %v4210_v52 = vmul.f32 -1.442695, %v2142_v50  ;;  %4831 = vpow2.f32 %v4211_v51 }
0x1a59   :  { %4833 = vpow2.f32 %v4210_v52 }
0x1a64   :  { %v4832_v53 = vpop.eup %4831 }
0x1a65   :  { %v2151_v55 = vadd.f32 1.0, %v4832_v53 }
0x1a66   :  { %v4834_v54 = vpop.eup %4833 }
0x1a67   :  { %v2150_v56 = vadd.f32 1.0, %v4834_v54  ;;  %4835 = vrcp.f32 %v2151_v55  ;;  %v5562_v54 = vld [vmem:[%s5955_s3 + $0xa8] sm:$0xff] }
0x1a68   :  { %4601 = vmatprep.subr.mxu0 %v5562_v54 }
0x1a69   :  { %4837 = vrcp.f32 %v2150_v56  ;;  %4602 = vmatpush3.msra.mxu0 %v5562_v54 }
0x1a74   :  { %v4836_v57 = vpop.eup %4835 }
0x1a75   :  { %v2179_v15 = vsub.f32 1.0, %v4836_v57 }
0x1a76   :  { %v4838_v59 = vpop.eup %4837 }
0x1a77   :  { %v2178_v2 = vsub.f32 1.0, %v4838_v59 }
0x1ac7   :  { %v2161_v58 = vpop.permute.xlu1 %2160 }
0x1ac8   :  { %v2165_v49 = vmul.f32 %v4836_v57, %v2161_v58 }
0x1ac9   :  { %v2159_v60 = vpop.permute.xlu0 %2158 }
0x1aca   :  { %v2164_v61 = vmul.f32 %v4838_v59, %v2159_v60  ;;  %2170 = vrot.lane.b32.xlu1 %v2165_v49, %s5008_s30 }
0x1acc   :  { %2168 = vrot.lane.b32.xlu0 %v2164_v61, %s5008_s30 }
0x1ace   :  { %2190 = vrot.lane.b32.xlu1 %v5459_v35, %s5012_s25 }
0x1ad2   :  { %2192 = vrot.lane.b32.xlu1 %v5463_v36, %s5012_s25 }
0x1b3c   :  { %v2171_v62 = vpop.permute.xlu1 %2170 }
0x1b3d   :  { %v2175_v1 = vadd.f32 %v2171_v62, %v2143_v47 }
0x1b3e   :  { %v2169_v63 = vpop.permute.xlu0 %2168 }
0x1b3f   :  { %v2174_v0 = vadd.f32 %v2169_v63, %v2142_v50 }
0x1b40   :  { %v2191_v11 = vpop.permute.xlu1 %2190 }
0x1b41   :  { %4839 = vtanh.f32 %v2174_v0  ;;  %v2196_v23 = vmul.f32 %v4838_v59, %v2191_v11 }
0x1b42   :  { %4841 = vtanh.f32 %v2175_v1 }
0x1b44   :  { %v2193_v14 = vpop.permute.xlu1 %2192 }
0x1b45   :  { %v2197_v18 = vmul.f32 %v4836_v57, %v2193_v14  ;;  %v5571_v57 = vld [vmem:[%s5955_s3 + $0xa0] sm:$0xff] }
0x1b46   :  { %4603 = vmatprep.subr.mxu0 %v5571_v57 }
0x1b47   :  { %4604 = vmatpush3.msra.mxu0 %v5571_v57 }
0x1b48   :  { %4608 = vmatprep.subr.msk.mxu0 %vm60_vm0, %v5433_v16 }
0x1b4e   :  { %v4840_v10 = vpop.eup %4839 }
0x1b4f   :  { %2182 = vrot.lane.b32.xlu0 %v4840_v10, %s5009_s12  ;;  %v4842_v21 = vpop.eup %4841 }
0x1b53   :  { %2184 = vrot.lane.b32.xlu0 %v4842_v21, %s5009_s12 }
0x1bc1   :  { %v2183_v12 = vpop.permute.xlu0 %2182 }
0x1bc2   :  { %v2188_v13 = vmul.f32 %v2183_v12, %v2178_v2 }
0x1bc4   :  { %v5525_v25 = vadd.f32 %v2196_v23, %v2188_v13 }
0x1bc5   :  { %v2185_v17 = vpop.permute.xlu0 %2184 }
0x1bc6   :  { %v2189_v8 = vmul.f32 %v2185_v17, %v2179_v15  ;;  %2202 = vrot.lane.b32.xlu0 %v5525_v25, %s5009_s12 }
0x1bc8   :  { %v5529_v20 = vadd.f32 %v2197_v18, %v2189_v8 }
0x1bca   :  { %2204 = vrot.lane.b32.xlu1 %v5529_v20, %s5009_s12 }
0x1c38   :  { %v2203_v24 = vpop.permute.xlu0 %2202 }
0x1c39   :  { %v2208_v26 = vsel %vm139_vm3, %v2203_v24, %v5459_v35 }
0x1c3a   :  { %4598 = vmatprep.mubr.msk.f32.mxu1 %vm249_vm4, %v2208_v26 }
0x1c3c   :  { %v2205_v27 = vpop.permute.xlu1 %2204 }
0x1c3d   :  { %v2209_v28 = vsel %vm139_vm3, %v2205_v27, %v5463_v36 }
0x1c3e   :  { %4599 = vmatmul.mubr.msk.f32.vlgmr.msra.gmra.mxu1 %vm249_vm4, %v2209_v28 }
0x1c3f   :  { %4618 = vmatpush3.msra.mxu1 %v5497_v4 }
0x1c40   :  { %4619 = vmatprep.subr.mxu1 %v5502_v9 }
0x1c41   :  { %4620 = vmatpush3.msra.mxu1 %v5502_v9 }
0x1c42   :  { %4621 = vmatprep.subr.mxu1 %v5513_v22 }
0x1c43   :  { %4622 = vmatpush3.msra.mxu1 %v5513_v22 }
0x1c44   :  { %4623 = vmatprep.subr.mxu1 %v5519_v7 }
0x1c45   :  { %4624 = vmatpush3.msra.mxu1 %v5519_v7 }
0x1c46   :  { %4635 = vmatprep.subr.msk.mxu1 %vm60_vm0, %v5433_v16 }
0x1cfe   :  { %v4600_v30 = vpop.f32.mrf.mxu1 }
0x1cff   :  { %v2296_v31 = vadd.f32 %v4600_v30, %v5551_v29 }
0x1d00   :  { %v2282_v32 = vpop.f32.mrf.mxu1 }
0x1d01   :  { %v2295_v3 = vadd.f32 %v5551_v29, %v2282_v32  ;;  %2313 = vrot.lane.b32.xlu1 %v2296_v31, %s5007_s29  ;;  %v4216_v33 = vmul.f32 -1.442695, %v2296_v31 }
0x1d03   :  { %2311 = vrot.lane.b32.xlu0 %v2295_v3, %s5007_s29  ;;  %v4215_v34 = vmul.f32 -1.442695, %v2295_v3  ;;  %4843 = vpow2.f32 %v4216_v33 }
0x1d05   :  { %4845 = vpow2.f32 %v4215_v34 }
0x1d10   :  { %v4844_v5 = vpop.eup %4843 }
0x1d11   :  { %v2304_v38 = vadd.f32 1.0, %v4844_v5 }
0x1d12   :  { %v4846_v37 = vpop.eup %4845 }
0x1d13   :  { %v2303_v41 = vadd.f32 1.0, %v4846_v37  ;;  %4847 = vrcp.f32 %v2304_v38 }
0x1d15   :  { %4849 = vrcp.f32 %v2303_v41 }
0x1d20   :  { %v4848_v42 = vpop.eup %4847 }
0x1d21   :  { %v2332_v58 = vsub.f32 1.0, %v4848_v42  ;;  %v2344_v59 = vmul.f32 %v4848_v42, %v5463_v36 }
0x1d22   :  { %v4850_v46 = vpop.eup %4849 }
0x1d23   :  { %v2331_v61 = vsub.f32 1.0, %v4850_v46  ;;  %v2343_v0 = vmul.f32 %v4850_v46, %v5459_v35  ;;  %v5599_v35 = vld [vmem:[%s5956_s4 + $0x6] ss:$0 sm:$0xff] }
0x1d73   :  { %v2314_v43 = vpop.permute.xlu1 %2313 }
0x1d74   :  { %v2318_v44 = vmul.f32 %v4848_v42, %v2314_v43 }
0x1d75   :  { %v2312_v47 = vpop.permute.xlu0 %2311 }
0x1d76   :  { %v2317_v48 = vmul.f32 %v4850_v46, %v2312_v47  ;;  %2323 = vrot.lane.b32.xlu1 %v2318_v44, %s5008_s30 }
0x1d78   :  { %2321 = vrot.lane.b32.xlu0 %v2317_v48, %s5008_s30 }
0x1de8   :  { %v2324_v50 = vpop.permute.xlu1 %2323 }
0x1de9   :  { %v2328_v51 = vadd.f32 %v2324_v50, %v2296_v31 }
0x1dea   :  { %v2322_v52 = vpop.permute.xlu0 %2321 }
0x1deb   :  { %4851 = vtanh.f32 %v2328_v51  ;;  %v2327_v53 = vadd.f32 %v2322_v52, %v2295_v3 }
0x1ded   :  { %4853 = vtanh.f32 %v2327_v53 }
0x1df8   :  { %v4852_v55 = vpop.eup %4851 }
0x1df9   :  { %2337 = vrot.lane.b32.xlu1 %v4852_v55, %s5009_s12 }
0x1dfa   :  { %v4854_v56 = vpop.eup %4853 }
0x1dfb   :  { %2335 = vrot.lane.b32.xlu0 %v4854_v56, %s5009_s12 }
0x1e6b   :  { %v2338_v49 = vpop.permute.xlu1 %2337 }
0x1e6c   :  { %v2342_v60 = vmul.f32 %v2338_v49, %v2332_v58 }
0x1e6d   :  { %v2336_v62 = vpop.permute.xlu0 %2335 }
0x1e6e   :  { %v5578_v63 = vadd.f32 %v2344_v59, %v2342_v60  ;;  %v2341_v1 = vmul.f32 %v2336_v62, %v2331_v61 }
0x1e70   :  { %v5581_v10 = vadd.f32 %v2343_v0, %v2341_v1  ;;  %2351 = vrot.lane.b32.xlu1 %v5578_v63, %s5009_s12 }
0x1e72   :  { %2349 = vrot.lane.b32.xlu0 %v5581_v10, %s5009_s12 }
0x1ee2   :  { %v2352_v11 = vpop.permute.xlu1 %2351 }
0x1ee4   :  { %v2350_v21 = vpop.permute.xlu0 %2349 }
0x1ee5   :  { %4605 = vmatprep.mubr.msk.f32.mxu0 %vm139_vm3, %v2350_v21 }
0x1ee6   :  { %4606 = vmatmul.mubr.msk.f32.vlgmr.msra.gmra.mxu0 %vm139_vm3, %v2352_v11 }
0x1ee7   :  { %4609 = vmatpush3.msk.msra.mxu0 %vm60_vm0, %v5433_v16 }
0x1ee8   :  { %4610 = vmatprep.subr.mxu0 %v5442_v19 }
0x1ee9   :  { %4611 = vmatpush3.msra.mxu0 %v5442_v19 }
0x1eea   :  { %4612 = vmatprep.subr.mxu0 %v5448_v6 }
0x1eeb   :  { %4613 = vmatpush3.msra.mxu0 %v5448_v6 }
0x1eec   :  { %4628 = vmatprep.subr.mxu0 %v5562_v54 }
0x1fa6   :  { %v4607_v36 = vpop.f32.mrf.mxu0 }
0x1fa7   :  { %v2433_v2 = vadd.f32 %v4607_v36, %v5470_v39 }
0x1fa8   :  { %v2423_v12 = vpop.f32.mrf.mxu0 }
0x1fa9   :  { %v2439_v23 = vadd.f32 %v5599_v35, %v2433_v2  ;;  %v2432_v13 = vadd.f32 %v2423_v12, %v5473_v40 }
0x1fab   :  { %v2438_v14 = vadd.f32 %v5599_v35, %v2432_v13  ;;  %v2441_v15 = vmul.f32 %v2439_v23, %v2439_v23 }
0x1fad   :  { %2446 = vrot.lane.b32.xlu1 %v2441_v15, %s5013_s18  ;;  %v2440_v17 = vmul.f32 %v2438_v14, %v2438_v14 }
0x1faf   :  { %2444 = vrot.lane.b32.xlu0 %v2440_v17, %s5013_s18 }
0x1fb1   :  { %2454 = vrot.lane.b32.xlu1 %v2441_v15, %s5014_s19 }
0x1fb3   :  { %2452 = vrot.lane.b32.xlu0 %v2440_v17, %s5014_s19 }
0x201f   :  { %v2447_v39 = vpop.permute.xlu1 %2446 }
0x2020   :  { %v2451_v8 = vadd.f32 %v2447_v39, %v2441_v15 }
0x2021   :  { %v2445_v18 = vpop.permute.xlu0 %2444 }
0x2022   :  { %v2450_v26 = vadd.f32 %v2445_v18, %v2440_v17 }
0x2023   :  { %v2455_v24 = vpop.permute.xlu1 %2454 }
0x2024   :  { %v2459_v40 = vadd.f32 %v2455_v24, %v2451_v8 }
0x2025   :  { %v2453_v27 = vpop.permute.xlu0 %2452 }
0x2026   :  { %4855 = vrsqrt.f32 %v2459_v40  ;;  %v2458_v28 = vadd.f32 %v2453_v27, %v2450_v26 }
0x2028   :  { %4857 = vrsqrt.f32 %v2458_v28 }
0x2033   :  { %v4856_v30 = vpop.eup %4855 }
0x2034   :  { %2469 = vperm.xlu1 %4733, %v4856_v30  }
0x2035   :  { %v4858_v31 = vpop.eup %4857 }
0x2036   :  { %2464 = vperm.xlu0 %4734, %v4858_v31  }
0x2038   :  { %2476 = vrot.lane.b32.xlu1 %v5529_v20, %s5015_s20 }
0x203a   :  { %2474 = vrot.lane.b32.xlu0 %v5525_v25, %s5015_s20 }
0x20af   :  { %v2470_v32 = vpop.permute.xlu1 %2469 }
0x20b0   :  { %v5615_v5 = vmul.f32 %v2470_v32, %v2439_v23 }
0x20b1   :  { %v2465_v3 = vpop.permute.xlu0 %2464 }
0x20b2   :  { %v5613_v33 = vmul.f32 %v2465_v3, %v2438_v14 }
0x20b3   :  { %v2477_v34 = vpop.permute.xlu1 %2476 }
0x20b4   :  { %v2481_v41 = vsel %vm53_vm1, %v5615_v5, %v2477_v34 }
0x20b5   :  { %v2475_v37 = vpop.permute.xlu0 %2474 }
0x20b6   :  { %v2480_v38 = vsel %vm53_vm1, %v5613_v33, %v2475_v37 }
0x20b7   :  { %4614 = vmatprep.mubr.msk.f32.mxu0 %vm2053_vm6, %v2480_v38 }
0x20b8   :  { %4615 = vmatmul.mubr.msk.f32.vlgmr.msra.gmra.mxu0 %vm2053_vm6, %v2481_v41 }
0x20b9   :  { %4629 = vmatpush3.msra.mxu0 %v5562_v54 }
0x20ba   :  { %4630 = vmatprep.subr.mxu0 %v5571_v57 }
0x20bb   :  { %4631 = vmatpush3.msra.mxu0 %v5571_v57 }
0x20bc   :  { %4644 = vmatprep.subr.mxu0 %v5497_v4 }
0x2178   :  { %v4616_v42 = vpop.f32.mrf.mxu0 }
0x2179   :  { %v2564_v43 = vadd.f32 %v4616_v42, %v5484_v45 }
0x217a   :  { %v2554_v44 = vpop.f32.mrf.mxu0 }
0x217b   :  { %v2563_v46 = vadd.f32 %v5484_v45, %v2554_v44  ;;  %2581 = vrot.lane.b32.xlu1 %v2564_v43, %s5007_s29  ;;  %v4224_v47 = vmul.f32 -1.442695, %v2564_v43 }
0x217d   :  { %2579 = vrot.lane.b32.xlu0 %v2563_v46, %s5007_s29  ;;  %v4223_v48 = vmul.f32 -1.442695, %v2563_v46  ;;  %4859 = vpow2.f32 %v4224_v47 }
0x217f   :  { %4861 = vpow2.f32 %v4223_v48 }
0x218a   :  { %v4860_v50 = vpop.eup %4859 }
0x218b   :  { %v2572_v52 = vadd.f32 1.0, %v4860_v50 }
0x218c   :  { %v4862_v51 = vpop.eup %4861 }
0x218d   :  { %v2571_v53 = vadd.f32 1.0, %v4862_v51  ;;  %4863 = vrcp.f32 %v2572_v52 }
0x218f   :  { %4865 = vrcp.f32 %v2571_v53 }
0x219a   :  { %v4864_v55 = vpop.eup %4863 }
0x219b   :  { %v2600_v36 = vsub.f32 1.0, %v4864_v55  ;;  %v2612_v12 = vmul.f32 %v4864_v55, %v5529_v20 }
0x219c   :  { %v4866_v49 = vpop.eup %4865 }
0x219d   :  { %v2599_v13 = vsub.f32 1.0, %v4866_v49  ;;  %v2611_v17 = vmul.f32 %v4866_v49, %v5525_v25 }
0x21ed   :  { %v2582_v56 = vpop.permute.xlu1 %2581 }
0x21ee   :  { %v2586_v58 = vmul.f32 %v4864_v55, %v2582_v56 }
0x21ef   :  { %v2580_v59 = vpop.permute.xlu0 %2579 }
0x21f0   :  { %v2585_v60 = vmul.f32 %v4866_v49, %v2580_v59  ;;  %2591 = vrot.lane.b32.xlu1 %v2586_v58, %s5008_s30 }
0x21f2   :  { %2589 = vrot.lane.b32.xlu0 %v2585_v60, %s5008_s30 }
0x2262   :  { %v2592_v61 = vpop.permute.xlu1 %2591 }
0x2263   :  { %v2596_v62 = vadd.f32 %v2592_v61, %v2564_v43 }
0x2264   :  { %v2590_v0 = vpop.permute.xlu0 %2589 }
0x2265   :  { %4867 = vtanh.f32 %v2596_v62  ;;  %v2595_v1 = vadd.f32 %v2590_v0, %v2563_v46 }
0x2267   :  { %4869 = vtanh.f32 %v2595_v1 }
0x2272   :  { %v4868_v21 = vpop.eup %4867 }
0x2273   :  { %2605 = vrot.lane.b32.xlu1 %v4868_v21, %s5009_s12 }
0x2274   :  { %v4870_v11 = vpop.eup %4869 }
0x2275   :  { %2603 = vrot.lane.b32.xlu0 %v4870_v11, %s5009_s12 }
0x22e5   :  { %v2606_v2 = vpop.permute.xlu1 %2605 }
0x22e6   :  { %v2610_v23 = vmul.f32 %v2606_v2, %v2600_v36 }
0x22e7   :  { %v2604_v14 = vpop.permute.xlu0 %2603 }
0x22e8   :  { %v5636_v15 = vadd.f32 %v2612_v12, %v2610_v23  ;;  %v2609_v39 = vmul.f32 %v2604_v14, %v2599_v13 }
0x22ea   :  { %v5639_v18 = vadd.f32 %v2611_v17, %v2609_v39  ;;  %2619 = vrot.lane.b32.xlu1 %v5636_v15, %s5009_s12 }
0x22ec   :  { %2617 = vrot.lane.b32.xlu0 %v5639_v18, %s5009_s12 }
0x235c   :  { %v2620_v8 = vpop.permute.xlu1 %2619 }
0x235d   :  { %v2624_v26 = vsel %vm139_vm3, %v2620_v8, %v5578_v63 }
0x235e   :  { %v2618_v24 = vpop.permute.xlu0 %2617 }
0x235f   :  { %v2623_v20 = vsel %vm139_vm3, %v2618_v24, %v5581_v10 }
0x2360   :  { %4625 = vmatprep.mubr.msk.f32.mxu1 %vm249_vm4, %v2623_v20 }
0x2361   :  { %4626 = vmatmul.mubr.msk.f32.vlgmr.msra.gmra.mxu1 %vm249_vm4, %v2624_v26 }
0x2362   :  { %4636 = vmatpush3.msk.msra.mxu1 %vm60_vm0, %v5433_v16 }
0x2363   :  { %4637 = vmatprep.subr.mxu1 %v5442_v19 }
0x2364   :  { %4638 = vmatpush3.msra.mxu1 %v5442_v19 }
0x2365   :  { %4639 = vmatprep.subr.mxu1 %v5448_v6 }
0x2366   :  { %4640 = vmatpush3.msra.mxu1 %v5448_v6 }
0x2367   :  { %4655 = vmatprep.subr.mxu1 %v5562_v54 }
0x2421   :  { %v4627_v25 = vpop.f32.mrf.mxu1 }
0x2422   :  { %v2707_v40 = vadd.f32 %v4627_v25, %v5551_v29 }
0x2423   :  { %v2697_v27 = vpop.f32.mrf.mxu1 }
0x2424   :  { %v2706_v28 = vadd.f32 %v5551_v29, %v2697_v27  ;;  %2724 = vrot.lane.b32.xlu1 %v2707_v40, %s5007_s29  ;;  %v4228_v30 = vmul.f32 -1.442695, %v2707_v40 }
0x2426   :  { %2722 = vrot.lane.b32.xlu0 %v2706_v28, %s5007_s29  ;;  %v4227_v31 = vmul.f32 -1.442695, %v2706_v28  ;;  %4871 = vpow2.f32 %v4228_v30 }
0x2428   :  { %4873 = vpow2.f32 %v4227_v31 }
0x2433   :  { %v4872_v32 = vpop.eup %4871 }
0x2434   :  { %v2715_v34 = vadd.f32 1.0, %v4872_v32 }
0x2435   :  { %v4874_v3 = vpop.eup %4873 }
0x2436   :  { %v2714_v37 = vadd.f32 1.0, %v4874_v3  ;;  %4875 = vrcp.f32 %v2715_v34 }
0x2438   :  { %4877 = vrcp.f32 %v2714_v37 }
0x2443   :  { %v4876_v38 = vpop.eup %4875 }
0x2444   :  { %v2743_v55 = vsub.f32 1.0, %v4876_v38  ;;  %v2755_v58 = vmul.f32 %v4876_v38, %v5578_v63 }
0x2445   :  { %v4878_v43 = vpop.eup %4877 }
0x2446   :  { %v2742_v59 = vsub.f32 1.0, %v4878_v43  ;;  %v2754_v62 = vmul.f32 %v4878_v43, %v5581_v10 }
0x2496   :  { %v2725_v41 = vpop.permute.xlu1 %2724 }
0x2497   :  { %v2729_v42 = vmul.f32 %v4876_v38, %v2725_v41 }
0x2498   :  { %v2723_v44 = vpop.permute.xlu0 %2722 }
0x2499   :  { %v2728_v46 = vmul.f32 %v4878_v43, %v2723_v44  ;;  %2734 = vrot.lane.b32.xlu1 %v2729_v42, %s5008_s30 }
0x249b   :  { %2732 = vrot.lane.b32.xlu0 %v2728_v46, %s5008_s30 }
0x250b   :  { %v2735_v47 = vpop.permute.xlu1 %2734 }
0x250c   :  { %v2739_v48 = vadd.f32 %v2735_v47, %v2707_v40 }
0x250d   :  { %v2733_v50 = vpop.permute.xlu0 %2732 }
0x250e   :  { %4879 = vtanh.f32 %v2739_v48  ;;  %v2738_v51 = vadd.f32 %v2733_v50, %v2706_v28 }
0x2510   :  { %4881 = vtanh.f32 %v2738_v51 }
0x251b   :  { %v4880_v52 = vpop.eup %4879 }
0x251c   :  { %2748 = vrot.lane.b32.xlu1 %v4880_v52, %s5009_s12 }
0x251d   :  { %v4882_v53 = vpop.eup %4881 }
0x251e   :  { %2746 = vrot.lane.b32.xlu0 %v4882_v53, %s5009_s12 }
0x258e   :  { %v2749_v56 = vpop.permute.xlu1 %2748 }
0x258f   :  { %v2753_v49 = vmul.f32 %v2749_v56, %v2743_v55 }
0x2590   :  { %v2747_v60 = vpop.permute.xlu0 %2746 }
0x2591   :  { %v5667_v61 = vadd.f32 %v2755_v58, %v2753_v49  ;;  %v2752_v0 = vmul.f32 %v2747_v60, %v2742_v59 }
0x2593   :  { %v5670_v1 = vadd.f32 %v2754_v62, %v2752_v0  ;;  %2762 = vrot.lane.b32.xlu1 %v5667_v61, %s5009_s12 }
0x2595   :  { %2760 = vrot.lane.b32.xlu0 %v5670_v1, %s5009_s12 }
0x2605   :  { %v2763_v11 = vpop.permute.xlu1 %2762 }
0x2607   :  { %v2761_v21 = vpop.permute.xlu0 %2760 }
0x2608   :  { %4632 = vmatprep.mubr.msk.f32.mxu0 %vm139_vm3, %v2761_v21 }
0x2609   :  { %4633 = vmatmul.mubr.msk.f32.vlgmr.msra.gmra.mxu0 %vm139_vm3, %v2763_v11 }
0x260a   :  { %4645 = vmatpush3.msra.mxu0 %v5497_v4 }
0x260b   :  { %4646 = vmatprep.subr.mxu0 %v5502_v9 }
0x260c   :  { %4647 = vmatpush3.msra.mxu0 %v5502_v9 }
0x260d   :  { %4648 = vmatprep.subr.mxu0 %v5513_v22 }
0x260e   :  { %4649 = vmatpush3.msra.mxu0 %v5513_v22 }
0x260f   :  { %4650 = vmatprep.subr.mxu0 %v5519_v7 }
0x2610   :  { %4651 = vmatpush3.msra.mxu0 %v5519_v7 }
0x2611   :  { %4662 = vmatprep.subr.msk.mxu0 %vm60_vm0, %v5433_v16 }
0x26c9   :  { %v4634_v63 = vpop.f32.mrf.mxu0 }
0x26ca   :  { %v2844_v10 = vadd.f32 %v4634_v63, %v5615_v5 }
0x26cb   :  { %v2834_v36 = vpop.f32.mrf.mxu0 }
0x26cc   :  { %v2846_v2 = vadd.f32 %v5599_v35, %v2844_v10  ;;  %v2843_v12 = vadd.f32 %v2834_v36, %v5613_v33 }
0x26ce   :  { %v2848_v23 = vmul.f32 %v2846_v2, %v2846_v2  ;;  %v2845_v13 = vadd.f32 %v5599_v35, %v2843_v12 }
0x26d0   :  { %v2847_v14 = vmul.f32 %v2845_v13, %v2845_v13  ;;  %2853 = vrot.lane.b32.xlu1 %v2848_v23, %s5013_s18 }
0x26d2   :  { %2851 = vrot.lane.b32.xlu0 %v2847_v14, %s5013_s18 }
0x26d4   :  { %2861 = vrot.lane.b32.xlu1 %v2848_v23, %s5014_s19 }
0x26d6   :  { %2859 = vrot.lane.b32.xlu0 %v2847_v14, %s5014_s19 }
0x2742   :  { %v2854_v17 = vpop.permute.xlu1 %2853 }
0x2743   :  { %v2858_v8 = vadd.f32 %v2854_v17, %v2848_v23 }
0x2744   :  { %v2852_v39 = vpop.permute.xlu0 %2851 }
0x2745   :  { %v2857_v20 = vadd.f32 %v2852_v39, %v2847_v14 }
0x2746   :  { %v2862_v24 = vpop.permute.xlu1 %2861 }
0x2747   :  { %v2866_v26 = vadd.f32 %v2862_v24, %v2858_v8 }
0x2748   :  { %v2860_v25 = vpop.permute.xlu0 %2859 }
0x2749   :  { %4883 = vrsqrt.f32 %v2866_v26  ;;  %v2865_v40 = vadd.f32 %v2860_v25, %v2857_v20 }
0x274b   :  { %4885 = vrsqrt.f32 %v2865_v40 }
0x2756   :  { %v4884_v27 = vpop.eup %4883 }
0x2757   :  { %2876 = vperm.xlu1 %4733, %v4884_v27  }
0x2758   :  { %v4886_v28 = vpop.eup %4885 }
0x2759   :  { %2871 = vperm.xlu0 %4734, %v4886_v28  }
0x275b   :  { %2883 = vrot.lane.b32.xlu1 %v5636_v15, %s5015_s20 }
0x275d   :  { %2881 = vrot.lane.b32.xlu0 %v5639_v18, %s5015_s20 }
0x27d2   :  { %v2877_v30 = vpop.permute.xlu1 %2876 }
0x27d3   :  { %v5701_v34 = vmul.f32 %v2877_v30, %v2846_v2 }
0x27d4   :  { %v2872_v31 = vpop.permute.xlu0 %2871 }
0x27d5   :  { %v5699_v32 = vmul.f32 %v2872_v31, %v2845_v13 }
0x27d6   :  { %v2884_v3 = vpop.permute.xlu1 %2883 }
0x27d7   :  { %v2888_v41 = vsel %vm53_vm1, %v5701_v34, %v2884_v3 }
0x27d8   :  { %v2882_v37 = vpop.permute.xlu0 %2881 }
0x27d9   :  { %v2887_v38 = vsel %vm53_vm1, %v5699_v32, %v2882_v37 }
0x27da   :  { %4641 = vmatprep.mubr.msk.f32.mxu1 %vm2053_vm6, %v2887_v38 }
0x27db   :  { %4642 = vmatmul.mubr.msk.f32.vlgmr.msra.gmra.mxu1 %vm2053_vm6, %v2888_v41 }
0x27dc   :  { %4656 = vmatpush3.msra.mxu1 %v5562_v54 }
0x27dd   :  { %4657 = vmatprep.subr.mxu1 %v5571_v57 }
0x27de   :  { %4658 = vmatpush3.msra.mxu1 %v5571_v57 }
0x27df   :  { %4671 = vmatprep.subr.mxu1 %v5497_v4 }
0x289b   :  { %v4643_v42 = vpop.f32.mrf.mxu1 }
0x289c   :  { %v2971_v43 = vadd.f32 %v4643_v42, %v5484_v45 }
0x289d   :  { %v2961_v44 = vpop.f32.mrf.mxu1 }
0x289e   :  { %v2970_v46 = vadd.f32 %v5484_v45, %v2961_v44  ;;  %2988 = vrot.lane.b32.xlu1 %v2971_v43, %s5007_s29  ;;  %v4235_v47 = vmul.f32 -1.442695, %v2971_v43 }
0x28a0   :  { %2986 = vrot.lane.b32.xlu0 %v2970_v46, %s5007_s29  ;;  %v4234_v48 = vmul.f32 -1.442695, %v2970_v46  ;;  %4887 = vpow2.f32 %v4235_v47 }
0x28a2   :  { %4889 = vpow2.f32 %v4234_v48 }
0x28ad   :  { %v4888_v50 = vpop.eup %4887 }
0x28ae   :  { %v2979_v52 = vadd.f32 1.0, %v4888_v50 }
0x28af   :  { %v4890_v51 = vpop.eup %4889 }
0x28b0   :  { %v2978_v53 = vadd.f32 1.0, %v4890_v51  ;;  %4891 = vrcp.f32 %v2979_v52 }
0x28b2   :  { %4893 = vrcp.f32 %v2978_v53 }
0x28bd   :  { %v4892_v55 = vpop.eup %4891 }
0x28be   :  { %v3007_v36 = vsub.f32 1.0, %v4892_v55  ;;  %v3019_v12 = vmul.f32 %v4892_v55, %v5636_v15 }
0x28bf   :  { %v4894_v49 = vpop.eup %4893 }
0x28c0   :  { %v3006_v13 = vsub.f32 1.0, %v4894_v49  ;;  %v3018_v39 = vmul.f32 %v4894_v49, %v5639_v18 }
0x2910   :  { %v2989_v56 = vpop.permute.xlu1 %2988 }
0x2911   :  { %v2993_v58 = vmul.f32 %v4892_v55, %v2989_v56 }
0x2912   :  { %v2987_v59 = vpop.permute.xlu0 %2986 }
0x2913   :  { %v2992_v60 = vmul.f32 %v4894_v49, %v2987_v59  ;;  %2998 = vrot.lane.b32.xlu1 %v2993_v58, %s5008_s30 }
0x2915   :  { %2996 = vrot.lane.b32.xlu0 %v2992_v60, %s5008_s30 }
0x2985   :  { %v2999_v62 = vpop.permute.xlu1 %2998 }
0x2986   :  { %v3003_v0 = vadd.f32 %v2999_v62, %v2971_v43 }
0x2987   :  { %v2997_v21 = vpop.permute.xlu0 %2996 }
0x2988   :  { %4895 = vtanh.f32 %v3003_v0  ;;  %v3002_v11 = vadd.f32 %v2997_v21, %v2970_v46 }
0x298a   :  { %4897 = vtanh.f32 %v3002_v11 }
0x2995   :  { %v4896_v63 = vpop.eup %4895 }
0x2996   :  { %3012 = vrot.lane.b32.xlu1 %v4896_v63, %s5009_s12 }
0x2997   :  { %v4898_v10 = vpop.eup %4897 }
0x2998   :  { %3010 = vrot.lane.b32.xlu0 %v4898_v10, %s5009_s12 }
0x2a08   :  { %v3013_v2 = vpop.permute.xlu1 %3012 }
0x2a09   :  { %v3017_v23 = vmul.f32 %v3013_v2, %v3007_v36 }
0x2a0a   :  { %v3011_v14 = vpop.permute.xlu0 %3010 }
0x2a0b   :  { %v5722_v17 = vadd.f32 %v3019_v12, %v3017_v23  ;;  %v3016_v8 = vmul.f32 %v3011_v14, %v3006_v13 }
0x2a0d   :  { %v5725_v24 = vadd.f32 %v3018_v39, %v3016_v8  ;;  %3026 = vrot.lane.b32.xlu1 %v5722_v17, %s5009_s12 }
0x2a0f   :  { %3024 = vrot.lane.b32.xlu0 %v5725_v24, %s5009_s12 }
0x2a7f   :  { %v3027_v20 = vpop.permute.xlu1 %3026 }
0x2a80   :  { %v3031_v25 = vsel %vm139_vm3, %v3027_v20, %v5667_v61 }
0x2a81   :  { %v3025_v26 = vpop.permute.xlu0 %3024 }
0x2a82   :  { %v3030_v15 = vsel %vm139_vm3, %v3025_v26, %v5670_v1 }
0x2a83   :  { %4652 = vmatprep.mubr.msk.f32.mxu0 %vm249_vm4, %v3030_v15 }
0x2a84   :  { %4653 = vmatmul.mubr.msk.f32.vlgmr.msra.gmra.mxu0 %vm249_vm4, %v3031_v25 }
0x2a85   :  { %4663 = vmatpush3.msk.msra.mxu0 %vm60_vm0, %v5433_v16 }
0x2a86   :  { %4664 = vmatprep.subr.mxu0 %v5442_v19 }
0x2a87   :  { %4665 = vmatpush3.msra.mxu0 %v5442_v19 }
0x2a88   :  { %4666 = vmatprep.subr.mxu0 %v5448_v6 }
0x2a89   :  { %4667 = vmatpush3.msra.mxu0 %v5448_v6 }
0x2a8a   :  { %4682 = vmatprep.subr.mxu0 %v5562_v54 }
0x2b44   :  { %v4654_v18 = vpop.f32.mrf.mxu0 }
0x2b45   :  { %v3114_v40 = vadd.f32 %v4654_v18, %v5551_v29 }
0x2b46   :  { %v3104_v27 = vpop.f32.mrf.mxu0 }
0x2b47   :  { %v3113_v28 = vadd.f32 %v5551_v29, %v3104_v27  ;;  %3131 = vrot.lane.b32.xlu1 %v3114_v40, %s5007_s29  ;;  %v4239_v30 = vmul.f32 -1.442695, %v3114_v40 }
0x2b49   :  { %3129 = vrot.lane.b32.xlu0 %v3113_v28, %s5007_s29  ;;  %v4238_v31 = vmul.f32 -1.442695, %v3113_v28  ;;  %4899 = vpow2.f32 %v4239_v30 }
0x2b4b   :  { %4901 = vpow2.f32 %v4238_v31 }
0x2b56   :  { %v4900_v19 = vpop.eup %4899 }
0x2b57   :  { %v3122_v37 = vadd.f32 1.0, %v4900_v19 }
0x2b58   :  { %v4902_v3 = vpop.eup %4901 }
0x2b59   :  { %v3121_v6 = vadd.f32 1.0, %v4902_v3  ;;  %4903 = vrcp.f32 %v3122_v37 }
0x2b5b   :  { %4905 = vrcp.f32 %v3121_v6 }
0x2b66   :  { %v4904_v38 = vpop.eup %4903 }
0x2b67   :  { %v3150_v55 = vsub.f32 1.0, %v4904_v38  ;;  %v3162_v58 = vmul.f32 %v4904_v38, %v5667_v61 }
0x2b68   :  { %v4906_v43 = vpop.eup %4905 }
0x2b69   :  { %v3149_v59 = vsub.f32 1.0, %v4906_v43  ;;  %v3161_v0 = vmul.f32 %v4906_v43, %v5670_v1 }
0x2bb9   :  { %v3132_v41 = vpop.permute.xlu1 %3131 }
0x2bba   :  { %v3136_v42 = vmul.f32 %v4904_v38, %v3132_v41 }
0x2bbb   :  { %v3130_v44 = vpop.permute.xlu0 %3129 }
0x2bbc   :  { %v3135_v46 = vmul.f32 %v4906_v43, %v3130_v44  ;;  %3141 = vrot.lane.b32.xlu1 %v3136_v42, %s5008_s30 }
0x2bbe   :  { %3139 = vrot.lane.b32.xlu0 %v3135_v46, %s5008_s30 }
0x2c2e   :  { %v3142_v47 = vpop.permute.xlu1 %3141 }
0x2c2f   :  { %v3146_v48 = vadd.f32 %v3142_v47, %v3114_v40 }
0x2c30   :  { %v3140_v50 = vpop.permute.xlu0 %3139 }
0x2c31   :  { %4907 = vtanh.f32 %v3146_v48  ;;  %v3145_v51 = vadd.f32 %v3140_v50, %v3113_v28 }
0x2c33   :  { %4909 = vtanh.f32 %v3145_v51 }
0x2c3e   :  { %v4908_v52 = vpop.eup %4907 }
0x2c3f   :  { %3155 = vrot.lane.b32.xlu1 %v4908_v52, %s5009_s12 }
0x2c40   :  { %v4910_v53 = vpop.eup %4909 }
0x2c41   :  { %3153 = vrot.lane.b32.xlu0 %v4910_v53, %s5009_s12 }
0x2cb1   :  { %v3156_v56 = vpop.permute.xlu1 %3155 }
0x2cb2   :  { %v3160_v49 = vmul.f32 %v3156_v56, %v3150_v55 }
0x2cb3   :  { %v3154_v60 = vpop.permute.xlu0 %3153 }
0x2cb4   :  { %v5753_v62 = vadd.f32 %v3162_v58, %v3160_v49  ;;  %v3159_v21 = vmul.f32 %v3154_v60, %v3149_v59 }
0x2cb6   :  { %v5756_v11 = vadd.f32 %v3161_v0, %v3159_v21  ;;  %3169 = vrot.lane.b32.xlu1 %v5753_v62, %s5009_s12 }
0x2cb8   :  { %3167 = vrot.lane.b32.xlu0 %v5756_v11, %s5009_s12 }
0x2d28   :  { %v3170_v10 = vpop.permute.xlu1 %3169 }
0x2d2a   :  { %v3168_v63 = vpop.permute.xlu0 %3167 }
0x2d2b   :  { %4659 = vmatprep.mubr.msk.f32.mxu1 %vm139_vm3, %v3168_v63 }
0x2d2c   :  { %4660 = vmatmul.mubr.msk.f32.vlgmr.msra.gmra.mxu1 %vm139_vm3, %v3170_v10 }
0x2d2d   :  { %4672 = vmatpush3.msra.mxu1 %v5497_v4 }
0x2d2e   :  { %4673 = vmatprep.subr.mxu1 %v5502_v9 }
0x2d2f   :  { %4674 = vmatpush3.msra.mxu1 %v5502_v9 }
0x2d30   :  { %4675 = vmatprep.subr.mxu1 %v5513_v22 }
0x2d31   :  { %4676 = vmatpush3.msra.mxu1 %v5513_v22 }
0x2d32   :  { %4677 = vmatprep.subr.mxu1 %v5519_v7 }
0x2d33   :  { %4678 = vmatpush3.msra.mxu1 %v5519_v7 }
0x2d34   :  { %4689 = vmatprep.subr.msk.mxu1 %vm60_vm0, %v5433_v16 }
0x2dec   :  { %v4661_v61 = vpop.f32.mrf.mxu1 }
0x2ded   :  { %v3251_v1 = vadd.f32 %v4661_v61, %v5701_v34 }
0x2dee   :  { %v3241_v36 = vpop.f32.mrf.mxu1 }
0x2def   :  { %v3253_v2 = vadd.f32 %v5599_v35, %v3251_v1  ;;  %v3250_v12 = vadd.f32 %v3241_v36, %v5699_v32 }
0x2df1   :  { %v3255_v9 = vmul.f32 %v3253_v2, %v3253_v2  ;;  %v3252_v23 = vadd.f32 %v5599_v35, %v3250_v12 }
0x2df3   :  { %v3254_v13 = vmul.f32 %v3252_v23, %v3252_v23  ;;  %3260 = vrot.lane.b32.xlu1 %v3255_v9, %s5013_s18 }
0x2df5   :  { %3258 = vrot.lane.b32.xlu0 %v3254_v13, %s5013_s18 }
0x2df7   :  { %3268 = vrot.lane.b32.xlu1 %v3255_v9, %s5014_s19 }
0x2df9   :  { %3266 = vrot.lane.b32.xlu0 %v3254_v13, %s5014_s19 }
0x2e65   :  { %v3261_v16 = vpop.permute.xlu1 %3260 }
0x2e66   :  { %v3265_v7 = vadd.f32 %v3261_v16, %v3255_v9  ;;  %v4972_v16 = vld [vmem:[%s5955_s3 + $0x40] sm:$0xff] }
0x2e67   :  { %v3259_v22 = vpop.permute.xlu0 %3258 }
0x2e68   :  { %v3264_v39 = vadd.f32 %v3259_v22, %v3254_v13  ;;  %v4973_v22 = vld [vmem:[%s5955_s3 + $0x38] sm:$0xff] }
0x2e69   :  { %v3269_v14 = vpop.permute.xlu1 %3268 }
0x2e6a   :  { %v3273_v8 = vadd.f32 %v3269_v14, %v3265_v7 }
0x2e6b   :  { %v3267_v20 = vpop.permute.xlu0 %3266 }
0x2e6c   :  { %4911 = vrsqrt.f32 %v3273_v8  ;;  %v3272_v26 = vadd.f32 %v3267_v20, %v3264_v39 }
0x2e6e   :  { %4913 = vrsqrt.f32 %v3272_v26 }
0x2e79   :  { %v4912_v15 = vpop.eup %4911 }
0x2e7a   :  { %3283 = vperm.xlu1 %4733, %v4912_v15  }
0x2e7b   :  { %v4914_v25 = vpop.eup %4913 }
0x2e7c   :  { %3278 = vperm.xlu0 %4734, %v4914_v25  }
0x2e7e   :  { %3290 = vrot.lane.b32.xlu1 %v5722_v17, %s5015_s20 }
0x2e80   :  { %3288 = vrot.lane.b32.xlu0 %v5725_v24, %s5015_s20 }
0x2ef5   :  { %v3284_v18 = vpop.permute.xlu1 %3283 }
0x2ef6   :  { %v5787_v30 = vmul.f32 %v3284_v18, %v3253_v2 }
0x2ef7   :  { %v3279_v40 = vpop.permute.xlu0 %3278 }
0x2ef8   :  { %v5785_v27 = vmul.f32 %v3279_v40, %v3252_v23 }
0x2ef9   :  { %v3291_v28 = vpop.permute.xlu1 %3290 }
0x2efa   :  { %v3295_v3 = vsel %vm53_vm1, %v5787_v30, %v3291_v28 }
0x2efb   :  { %v3289_v31 = vpop.permute.xlu0 %3288 }
0x2efc   :  { %v3294_v19 = vsel %vm53_vm1, %v5785_v27, %v3289_v31 }
0x2efd   :  { %4668 = vmatprep.mubr.msk.f32.mxu0 %vm2053_vm6, %v3294_v19 }
0x2efe   :  { %4669 = vmatmul.mubr.msk.f32.vlgmr.msra.gmra.mxu0 %vm2053_vm6, %v3295_v3 }
0x2eff   :  { %4683 = vmatpush3.msra.mxu0 %v5562_v54 }
0x2f00   :  { %4684 = vmatprep.subr.mxu0 %v5571_v57 }
0x2f01   :  { %4685 = vmatpush3.msra.mxu0 %v5571_v57 }
0x2f02   :  { %4698 = vmatprep.subr.mxu0 %v5497_v4 }
0x2fbe   :  { %v4670_v37 = vpop.f32.mrf.mxu0 }
0x2fbf   :  { %v3378_v6 = vadd.f32 %v4670_v37, %v5484_v45 }
0x2fc0   :  { %v3368_v38 = vpop.f32.mrf.mxu0 }
0x2fc1   :  { %v3377_v41 = vadd.f32 %v5484_v45, %v3368_v38  ;;  %3395 = vrot.lane.b32.xlu1 %v3378_v6, %s5007_s29  ;;  %v4246_v42 = vmul.f32 -1.442695, %v3378_v6 }
0x2fc3   :  { %3393 = vrot.lane.b32.xlu0 %v3377_v41, %s5007_s29  ;;  %v4245_v43 = vmul.f32 -1.442695, %v3377_v41  ;;  %4915 = vpow2.f32 %v4246_v42 }
0x2fc5   :  { %4917 = vpow2.f32 %v4245_v43 }
0x2fd0   :  { %v4916_v44 = vpop.eup %4915 }
0x2fd1   :  { %v3386_v47 = vadd.f32 1.0, %v4916_v44 }
0x2fd2   :  { %v4918_v46 = vpop.eup %4917 }
0x2fd3   :  { %v3385_v57 = vadd.f32 1.0, %v4918_v46  ;;  %4919 = vrcp.f32 %v3386_v47 }
0x2fd5   :  { %4921 = vrcp.f32 %v3385_v57 }
0x2fe0   :  { %v4920_v4 = vpop.eup %4919 }
0x2fe1   :  { %v3414_v60 = vsub.f32 1.0, %v4920_v4  ;;  %v3426_v21 = vmul.f32 %v4920_v4, %v5722_v17 }
0x2fe2   :  { %v4922_v51 = vpop.eup %4921 }
0x2fe3   :  { %v3413_v10 = vsub.f32 1.0, %v4922_v51  ;;  %v3425_v36 = vmul.f32 %v4922_v51, %v5725_v24  ;;  %v4971_v24 = vld [vmem:[%s5955_s3 + $0x48] sm:$0x7] }
0x3033   :  { %v3396_v48 = vpop.permute.xlu1 %3395 }
0x3034   :  { %v3400_v50 = vmul.f32 %v4920_v4, %v3396_v48 }
0x3035   :  { %v3394_v52 = vpop.permute.xlu0 %3393 }
0x3036   :  { %v3399_v45 = vmul.f32 %v4922_v51, %v3394_v52  ;;  %3405 = vrot.lane.b32.xlu1 %v3400_v50, %s5008_s30 }
0x3038   :  { %3403 = vrot.lane.b32.xlu0 %v3399_v45, %s5008_s30 }
0x30a8   :  { %v3406_v53 = vpop.permute.xlu1 %3405 }
0x30a9   :  { %v3410_v55 = vadd.f32 %v3406_v53, %v3378_v6 }
0x30aa   :  { %v3404_v56 = vpop.permute.xlu0 %3403 }
0x30ab   :  { %4923 = vtanh.f32 %v3410_v55  ;;  %v3409_v58 = vadd.f32 %v3404_v56, %v3377_v41  ;;  %v4976_v56 = vld [vmem:[%s5955_s3 + $0x58] sm:$0xff] }
0x30ad   :  { %4925 = vtanh.f32 %v3409_v58  ;;  %v4977_v58 = vld [vmem:[%s5955_s3 + $0x50] sm:$0xff] }
0x30b8   :  { %v4924_v49 = vpop.eup %4923 }
0x30b9   :  { %3419 = vrot.lane.b32.xlu1 %v4924_v49, %s5009_s12 }
0x30ba   :  { %v4926_v59 = vpop.eup %4925 }
0x30bb   :  { %3417 = vrot.lane.b32.xlu0 %v4926_v59, %s5009_s12 }
0x312b   :  { %v3420_v0 = vpop.permute.xlu1 %3419 }
0x312c   :  { %v3424_v63 = vmul.f32 %v3420_v0, %v3414_v60 }
0x312d   :  { %v3418_v61 = vpop.permute.xlu0 %3417 }
0x312e   :  { %v5808_v1 = vadd.f32 %v3426_v21, %v3424_v63  ;;  %v3423_v2 = vmul.f32 %v3418_v61, %v3413_v10 }
0x3130   :  { %v5811_v12 = vadd.f32 %v3425_v36, %v3423_v2  ;;  %3433 = vrot.lane.b32.xlu1 %v5808_v1, %s5009_s12 }
0x3132   :  { %3431 = vrot.lane.b32.xlu0 %v5811_v12, %s5009_s12 }
0x31a2   :  { %v3434_v9 = vpop.permute.xlu1 %3433 }
0x31a3   :  { %v3438_v13 = vsel %vm139_vm3, %v3434_v9, %v5753_v62 }
0x31a4   :  { %v3432_v23 = vpop.permute.xlu0 %3431 }
0x31a5   :  { %v3437_v17 = vsel %vm139_vm3, %v3432_v23, %v5756_v11 }
0x31a6   :  { %4679 = vmatprep.mubr.msk.f32.mxu1 %vm249_vm4, %v3437_v17 }
0x31a7   :  { %4680 = vmatmul.mubr.msk.f32.vlgmr.msra.gmra.mxu1 %vm249_vm4, %v3438_v13 }
0x31a8   :  { %4690 = vmatpush3.msk.msra.mxu1 %vm60_vm0, %v4971_v24 }
0x31a9   :  { %4691 = vmatprep.subr.mxu1 %v4972_v16 }
0x31aa   :  { %4692 = vmatpush3.msra.mxu1 %v4972_v16 }
0x31ab   :  { %4693 = vmatprep.subr.mxu1 %v4973_v22 }
0x31ac   :  { %4694 = vmatpush3.msra.mxu1 %v4973_v22 }
0x31ad   :  { %4709 = vmatprep.subr.mxu1 %v5562_v54 }
0x3267   :  { %v4681_v7 = vpop.f32.mrf.mxu1 }
0x3268   :  { %v3521_v14 = vadd.f32 %v4681_v7, %v5551_v29 }
0x3269   :  { %v3511_v39 = vpop.f32.mrf.mxu1 }
0x326a   :  { %v3520_v8 = vadd.f32 %v5551_v29, %v3511_v39  ;;  %3538 = vrot.lane.b32.xlu1 %v3521_v14, %s5007_s29  ;;  %v4250_v20 = vmul.f32 -1.442695, %v3521_v14 }
0x326c   :  { %3536 = vrot.lane.b32.xlu0 %v3520_v8, %s5007_s29  ;;  %v4249_v26 = vmul.f32 -1.442695, %v3520_v8  ;;  %4927 = vpow2.f32 %v4250_v20 }
0x326e   :  { %4929 = vpow2.f32 %v4249_v26 }
0x3279   :  { %v4928_v15 = vpop.eup %4927 }
0x327a   :  { %v3529_v18 = vadd.f32 1.0, %v4928_v15 }
0x327b   :  { %v4930_v25 = vpop.eup %4929 }
0x327c   :  { %v3528_v40 = vadd.f32 1.0, %v4930_v25  ;;  %4931 = vrcp.f32 %v3529_v18  ;;  %v4978_v18 = vld [vmem:[%s5955_s3 + $0xa8] sm:$0xff] }
0x327e   :  { %4933 = vrcp.f32 %v3528_v40  ;;  %v4979_v40 = vld [vmem:[%s5955_s3 + $0xa0] sm:$0xff] }
0x3289   :  { %v4932_v54 = vpop.eup %4931 }
0x328a   :  { %v3557_v44 = vsub.f32 1.0, %v4932_v54  ;;  %v3569_v47 = vmul.f32 %v4932_v54, %v5753_v62  ;;  %v4974_v62 = vld [vmem:[%s5955_s3 + $0x68] sm:$0xff] }
0x328b   :  { %v4934_v19 = vpop.eup %4933 }
0x328c   :  { %v3556_v4 = vsub.f32 1.0, %v4934_v19  ;;  %v3568_v51 = vmul.f32 %v4934_v19, %v5756_v11  ;;  %v4975_v11 = vld [vmem:[%s5955_s3 + $0x60] sm:$0xff] }
0x32dc   :  { %v3539_v28 = vpop.permute.xlu1 %3538 }
0x32dd   :  { %v3543_v31 = vmul.f32 %v4932_v54, %v3539_v28  ;;  %v4980_v28 = vld [vmem:[%s5956_s4 + $0x2] ss:$0 sm:$0xff] }
0x32de   :  { %v3537_v3 = vpop.permute.xlu0 %3536 }
0x32df   :  { %v3542_v29 = vmul.f32 %v4934_v19, %v3537_v3  ;;  %3548 = vrot.lane.b32.xlu1 %v3543_v31, %s5008_s30 }
0x32e1   :  { %3546 = vrot.lane.b32.xlu0 %v3542_v29, %s5008_s30 }
0x3351   :  { %v3549_v37 = vpop.permute.xlu1 %3548 }
0x3352   :  { %v3553_v6 = vadd.f32 %v3549_v37, %v3521_v14 }
0x3353   :  { %v3547_v38 = vpop.permute.xlu0 %3546 }
0x3354   :  { %4935 = vtanh.f32 %v3553_v6  ;;  %v3552_v41 = vadd.f32 %v3547_v38, %v3520_v8 }
0x3356   :  { %4937 = vtanh.f32 %v3552_v41 }
0x3361   :  { %v4936_v42 = vpop.eup %4935 }
0x3362   :  { %3562 = vrot.lane.b32.xlu1 %v4936_v42, %s5009_s12 }
0x3363   :  { %v4938_v43 = vpop.eup %4937 }
0x3364   :  { %3560 = vrot.lane.b32.xlu0 %v4938_v43, %s5009_s12 }
0x33d4   :  { %v3563_v46 = vpop.permute.xlu1 %3562 }
0x33d5   :  { %v3567_v57 = vmul.f32 %v3563_v46, %v3557_v44 }
0x33d6   :  { %v3561_v48 = vpop.permute.xlu0 %3560 }
0x33d7   :  { %v5843_v50 = vadd.f32 %v3569_v47, %v3567_v57  ;;  %v3566_v52 = vmul.f32 %v3561_v48, %v3556_v4 }
0x33d9   :  { %v5846_v45 = vadd.f32 %v3568_v51, %v3566_v52  ;;  %3576 = vrot.lane.b32.xlu1 %v5843_v50, %s5009_s12 }
0x33db   :  { %3574 = vrot.lane.b32.xlu0 %v5846_v45, %s5009_s12 }
0x344b   :  { %v3577_v55 = vpop.permute.xlu1 %3576 }
0x344d   :  { %v3575_v53 = vpop.permute.xlu0 %3574 }
0x344e   :  { %4686 = vmatprep.mubr.msk.f32.mxu0 %vm139_vm3, %v3575_v53 }
0x344f   :  { %4687 = vmatmul.mubr.msk.f32.vlgmr.msra.gmra.mxu0 %vm139_vm3, %v3577_v55 }
0x3450   :  { %4699 = vmatpush3.msra.mxu0 %v4974_v62 }
0x3451   :  { %4700 = vmatprep.subr.mxu0 %v4975_v11 }
0x3452   :  { %4701 = vmatpush3.msra.mxu0 %v4975_v11 }
0x3453   :  { %4702 = vmatprep.subr.mxu0 %v4976_v56 }
0x3454   :  { %4703 = vmatpush3.msra.mxu0 %v4976_v56 }
0x3455   :  { %4704 = vmatprep.subr.mxu0 %v4977_v58 }
0x3456   :  { %4705 = vmatpush3.msra.mxu0 %v4977_v58 }
0x350f   :  { %v4688_v49 = vpop.f32.mrf.mxu0 }
0x3510   :  { %v3658_v59 = vadd.f32 %v4688_v49, %v5787_v30 }
0x3511   :  { %v3648_v60 = vpop.f32.mrf.mxu0 }
0x3512   :  { %v3660_v0 = vadd.f32 %v5599_v35, %v3658_v59  ;;  %v3657_v21 = vadd.f32 %v3648_v60, %v5785_v27 }
0x3514   :  { %v3662_v63 = vmul.f32 %v3660_v0, %v3660_v0  ;;  %v3659_v10 = vadd.f32 %v5599_v35, %v3657_v21 }
0x3516   :  { %v3661_v61 = vmul.f32 %v3659_v10, %v3659_v10  ;;  %3667 = vrot.lane.b32.xlu1 %v3662_v63, %s5013_s18 }
0x3518   :  { %3665 = vrot.lane.b32.xlu0 %v3661_v61, %s5013_s18 }
0x351a   :  { %3675 = vrot.lane.b32.xlu1 %v3662_v63, %s5014_s19 }
0x351c   :  { %3673 = vrot.lane.b32.xlu0 %v3661_v61, %s5014_s19 }
0x3588   :  { %v3668_v36 = vpop.permute.xlu1 %3667 }
0x3589   :  { %v3672_v9 = vadd.f32 %v3668_v36, %v3662_v63 }
0x358a   :  { %v3666_v2 = vpop.permute.xlu0 %3665 }
0x358b   :  { %v3671_v17 = vadd.f32 %v3666_v2, %v3661_v61 }
0x358c   :  { %v3676_v23 = vpop.permute.xlu1 %3675 }
0x358d   :  { %v3680_v13 = vadd.f32 %v3676_v23, %v3672_v9 }
0x358e   :  { %v3674_v24 = vpop.permute.xlu0 %3673 }
0x358f   :  { %4939 = vrsqrt.f32 %v3680_v13  ;;  %v3679_v16 = vadd.f32 %v3674_v24, %v3671_v17 }
0x3591   :  { %4941 = vrsqrt.f32 %v3679_v16 }
0x359c   :  { %v4940_v35 = vpop.eup %4939 }
0x359d   :  { %3690 = vperm.xlu1 %4733, %v4940_v35  }
0x359e   :  { %v4942_v22 = vpop.eup %4941 }
0x359f   :  { %3685 = vperm.xlu0 %4734, %v4942_v22  }
0x35a1   :  { %3697 = vrot.lane.b32.xlu1 %v5808_v1, %s5015_s20 }
0x35a3   :  { %3695 = vrot.lane.b32.xlu0 %v5811_v12, %s5015_s20 }
0x3618   :  { %v3691_v7 = vpop.permute.xlu1 %3690 }
0x3619   :  { %v5880_v20 = vmul.f32 %v3691_v7, %v3660_v0 }
0x361a   :  { %v3686_v14 = vpop.permute.xlu0 %3685 }
0x361b   :  { %v5878_v39 = vmul.f32 %v3686_v14, %v3659_v10 }
0x361c   :  { %v3698_v8 = vpop.permute.xlu1 %3697 }
0x361d   :  { %v3702_v25 = vsel %vm53_vm1, %v5880_v20, %v3698_v8 }
0x361e   :  { %v3696_v26 = vpop.permute.xlu0 %3695 }
0x361f   :  { %v3701_v15 = vsel %vm53_vm1, %v5878_v39, %v3696_v26 }
0x3620   :  { %4695 = vmatprep.mubr.msk.f32.mxu1 %vm2053_vm6, %v3701_v15 }
0x3621   :  { %4696 = vmatmul.mubr.msk.f32.vlgmr.msra.gmra.mxu1 %vm2053_vm6, %v3702_v25 }
0x3622   :  { %4710 = vmatpush3.msra.mxu1 %v4978_v18 }
0x3623   :  { %4711 = vmatprep.subr.mxu1 %v4979_v40 }
0x3624   :  { %4712 = vmatpush3.msra.mxu1 %v4979_v40 }
0x36e1   :  { %v4697_v54 = vpop.f32.mrf.mxu1 }
0x36e2   :  { %v3785_v31 = vadd.f32 %v4980_v28, %v4697_v54 }
0x36e3   :  { %v3775_v19 = vpop.f32.mrf.mxu1 }
0x36e4   :  { %v3784_v3 = vadd.f32 %v4980_v28, %v3775_v19  ;;  %3802 = vrot.lane.b32.xlu1 %v3785_v31, %s5007_s29  ;;  %v4257_v29 = vmul.f32 -1.442695, %v3785_v31 }
0x36e6   :  { %3800 = vrot.lane.b32.xlu0 %v3784_v3, %s5007_s29  ;;  %v4256_v37 = vmul.f32 -1.442695, %v3784_v3  ;;  %4943 = vpow2.f32 %v4257_v29 }
0x36e8   :  { %4945 = vpow2.f32 %v4256_v37 }
0x36f3   :  { %v4944_v6 = vpop.eup %4943 }
0x36f4   :  { %v3793_v41 = vadd.f32 1.0, %v4944_v6 }
0x36f5   :  { %v4946_v38 = vpop.eup %4945 }
0x36f6   :  { %v3792_v42 = vadd.f32 1.0, %v4946_v38  ;;  %4947 = vrcp.f32 %v3793_v41 }
0x36f8   :  { %4949 = vrcp.f32 %v3792_v42 }
0x3703   :  { %v4948_v43 = vpop.eup %4947 }
0x3704   :  { %v3821_v11 = vsub.f32 1.0, %v4948_v43  ;;  %v3833_v58 = vmul.f32 %v4948_v43, %v5808_v1 }
0x3705   :  { %v4950_v47 = vpop.eup %4949 }
0x3706   :  { %v3820_v59 = vsub.f32 1.0, %v4950_v47  ;;  %v3832_v21 = vmul.f32 %v4950_v47, %v5811_v12  ;;  %v4981_v12 = vld [vmem:[%s5956_s4 + $0x3] ss:$0 sm:$0xff] }
0x3756   :  { %v3803_v44 = vpop.permute.xlu1 %3802 }
0x3757   :  { %v3807_v46 = vmul.f32 %v4948_v43, %v3803_v44 }
0x3758   :  { %v3801_v57 = vpop.permute.xlu0 %3800 }
0x3759   :  { %v3806_v4 = vmul.f32 %v4950_v47, %v3801_v57  ;;  %3812 = vrot.lane.b32.xlu1 %v3807_v46, %s5008_s30 }
0x375b   :  { %3810 = vrot.lane.b32.xlu0 %v3806_v4, %s5008_s30 }
0x37cb   :  { %v3813_v48 = vpop.permute.xlu1 %3812 }
0x37cc   :  { %v3817_v51 = vadd.f32 %v3813_v48, %v3785_v31 }
0x37cd   :  { %v3811_v52 = vpop.permute.xlu0 %3810 }
0x37ce   :  { %4951 = vtanh.f32 %v3817_v51  ;;  %v3816_v53 = vadd.f32 %v3811_v52, %v3784_v3 }
0x37d0   :  { %4953 = vtanh.f32 %v3816_v53 }
0x37db   :  { %v4952_v55 = vpop.eup %4951 }
0x37dc   :  { %3826 = vrot.lane.b32.xlu1 %v4952_v55, %s5009_s12 }
0x37dd   :  { %v4954_v62 = vpop.eup %4953 }
0x37de   :  { %3824 = vrot.lane.b32.xlu0 %v4954_v62, %s5009_s12 }
0x384e   :  { %v3827_v56 = vpop.permute.xlu1 %3826 }
0x384f   :  { %v3831_v49 = vmul.f32 %v3827_v56, %v3821_v11 }
0x3850   :  { %v3825_v60 = vpop.permute.xlu0 %3824 }
0x3851   :  { %v3835_v0 = vadd.f32 %v3833_v58, %v3831_v49  ;;  %v3830_v63 = vmul.f32 %v3825_v60, %v3820_v59 }
0x3853   :  { %v3834_v10 = vadd.f32 %v3832_v21, %v3830_v63  ;;  %3840 = vrot.lane.b32.xlu1 %v3835_v0, %s5009_s12 }
0x3855   :  { %3838 = vrot.lane.b32.xlu0 %v3834_v10, %s5009_s12 }
0x38c5   :  { %v3841_v61 = vpop.permute.xlu1 %3840 }
0x38c6   :  { %v3845_v1 = vsel %vm139_vm3, %v3841_v61, %v5843_v50 }
0x38c7   :  { %v3839_v36 = vpop.permute.xlu0 %3838 }
0x38c8   :  { %v3844_v2 = vsel %vm139_vm3, %v3839_v36, %v5846_v45 }
0x38c9   :  { %4706 = vmatprep.mubr.msk.f32.mxu0 %vm249_vm4, %v3844_v2 }
0x38ca   :  { %4707 = vmatmul.mubr.msk.f32.vlgmr.msra.gmra.mxu0 %vm249_vm4, %v3845_v1 }
0x398a   :  { %v4708_v9 = vpop.f32.mrf.mxu0 }
0x398b   :  { %v3928_v23 = vadd.f32 %v4981_v12, %v4708_v9 }
0x398c   :  { %v3918_v17 = vpop.f32.mrf.mxu0 }
0x398d   :  { %v3927_v13 = vadd.f32 %v4981_v12, %v3918_v17  ;;  %3945 = vrot.lane.b32.xlu1 %v3928_v23, %s5007_s29  ;;  %v4261_v24 = vmul.f32 -1.442695, %v3928_v23 }
0x398f   :  { %3943 = vrot.lane.b32.xlu0 %v3927_v13, %s5007_s29  ;;  %v4260_v16 = vmul.f32 -1.442695, %v3927_v13  ;;  %4955 = vpow2.f32 %v4261_v24 }
0x3991   :  { %4957 = vpow2.f32 %v4260_v16 }
0x399c   :  { %v4956_v35 = vpop.eup %4955 }
0x399d   :  { %v3936_v7 = vadd.f32 1.0, %v4956_v35 }
0x399e   :  { %v4958_v22 = vpop.eup %4957 }
0x399f   :  { %v3935_v14 = vadd.f32 1.0, %v4958_v22  ;;  %4959 = vrcp.f32 %v3936_v7 }
0x39a1   :  { %4961 = vrcp.f32 %v3935_v14 }
0x39ac   :  { %v4960_v8 = vpop.eup %4959 }
0x39ad   :  { %v3964_v37 = vsub.f32 1.0, %v4960_v8  ;;  %v3976_v38 = vmul.f32 %v4960_v8, %v5843_v50 }
0x39ae   :  { %v4962_v25 = vpop.eup %4961 }
0x39af   :  { %v3963_v42 = vsub.f32 1.0, %v4962_v25  ;;  %v3975_v46 = vmul.f32 %v4962_v25, %v5846_v45  ;;  %v4982_v45 = vld [vmem:[%s5956_s4 + $0x6] ss:$0 sm:$0xff]  ;;  %s5016_s4 = smov 6  }
0x39ff   :  { %v3946_v26 = vpop.permute.xlu1 %3945 }
0x3a00   :  { %v3950_v15 = vmul.f32 %v4960_v8, %v3946_v26 }
0x3a01   :  { %v3944_v18 = vpop.permute.xlu0 %3943 }
0x3a02   :  { %v3949_v40 = vmul.f32 %v4962_v25, %v3944_v18  ;;  %3955 = vrot.lane.b32.xlu1 %v3950_v15, %s5008_s30 }
0x3a04   :  { %3953 = vrot.lane.b32.xlu0 %v3949_v40, %s5008_s30 }
0x3a74   :  { %v3956_v54 = vpop.permute.xlu1 %3955 }
0x3a75   :  { %v3960_v28 = vadd.f32 %v3956_v54, %v3928_v23 }
0x3a76   :  { %v3954_v31 = vpop.permute.xlu0 %3953 }
0x3a77   :  { %4963 = vtanh.f32 %v3960_v28  ;;  %v3959_v19 = vadd.f32 %v3954_v31, %v3927_v13 }
0x3a79   :  { %4965 = vtanh.f32 %v3959_v19 }
0x3a84   :  { %v4964_v3 = vpop.eup %4963 }
0x3a85   :  { %3969 = vrot.lane.b32.xlu1 %v4964_v3, %s5009_s12 }
0x3a86   :  { %v4966_v29 = vpop.eup %4965 }
0x3a87   :  { %3967 = vrot.lane.b32.xlu0 %v4966_v29, %s5009_s12 }
0x3af7   :  { %v3970_v6 = vpop.permute.xlu1 %3969 }
0x3af8   :  { %v3974_v41 = vmul.f32 %v3970_v6, %v3964_v37 }
0x3af9   :  { %v3968_v43 = vpop.permute.xlu0 %3967 }
0x3afa   :  { %v3978_v44 = vadd.f32 %v3976_v38, %v3974_v41  ;;  %v3973_v47 = vmul.f32 %v3968_v43, %v3963_v42 }
0x3afc   :  { %v3977_v57 = vadd.f32 %v3975_v46, %v3973_v47  ;;  %3983 = vrot.lane.b32.xlu1 %v3978_v44, %s5009_s12 }
0x3afe   :  { %3981 = vrot.lane.b32.xlu0 %v3977_v57, %s5009_s12  ;;  %s5017_s12 = smov 9  }
0x3b6e   :  { %v3984_v48 = vpop.permute.xlu1 %3983 }
0x3b70   :  { %v3982_v4 = vpop.permute.xlu0 %3981 }
0x3b71   :  { %4713 = vmatprep.mubr.msk.f32.mxu1 %vm139_vm3, %v3982_v4 }
0x3b72   :  { %4714 = vmatmul.mubr.msk.f32.vlgmr.msra.gmra.mxu1 %vm139_vm3, %v3984_v48 }
0x3c32   :  { %v4715_v51 = vpop.f32.mrf.mxu1 }
0x3c33   :  { %v4065_v50 = vadd.f32 %v4715_v51, %v5880_v20 }
0x3c34   :  { %v4055_v52 = vpop.f32.mrf.mxu1 }
0x3c35   :  { %v4067_v53 = vadd.f32 %v4982_v45, %v4065_v50  ;;  %v4064_v55 = vadd.f32 %v4055_v52, %v5878_v39 }
0x3c37   :  { %v4069_v62 = vmul.f32 %v4067_v53, %v4067_v53  ;;  %v4066_v11 = vadd.f32 %v4982_v45, %v4064_v55 }
0x3c39   :  { %v4068_v56 = vmul.f32 %v4066_v11, %v4066_v11  ;;  %4074 = vrot.lane.b32.xlu1 %v4069_v62, %s5013_s18 }
0x3c3b   :  { %4072 = vrot.lane.b32.xlu0 %v4068_v56, %s5013_s18  ;;  %s5018_s18 = smov 12  }
0x3c3d   :  { %4082 = vrot.lane.b32.xlu1 %v4069_v62, %s5014_s19 }
0x3c3f   :  { %4080 = vrot.lane.b32.xlu0 %v4068_v56, %s5014_s19 }
0x3cab   :  { %v4075_v58 = vpop.permute.xlu1 %4074 }
0x3cac   :  { %v4079_v59 = vadd.f32 %v4075_v58, %v4069_v62 }
0x3cad   :  { %v4073_v49 = vpop.permute.xlu0 %4072 }
0x3cae   :  { %v4078_v0 = vadd.f32 %v4073_v49, %v4068_v56 }
0x3caf   :  { %v4083_v60 = vpop.permute.xlu1 %4082 }
0x3cb0   :  { %v4087_v21 = vadd.f32 %v4083_v60, %v4079_v59 }
0x3cb1   :  { %v4081_v63 = vpop.permute.xlu0 %4080 }
0x3cb2   :  { %4967 = vrsqrt.f32 %v4087_v21  ;;  %v4086_v10 = vadd.f32 %v4081_v63, %v4078_v0 }
0x3cb4   :  { %4969 = vrsqrt.f32 %v4086_v10 }
0x3cbf   :  { %v4968_v61 = vpop.eup %4967 }
0x3cc0   :  { %4097 = vperm.xlu1 %4733, %v4968_v61  }
0x3cc1   :  { %v4970_v36 = vpop.eup %4969 }
0x3cc2   :  { %4092 = vperm.xlu0 %4734, %v4970_v36  }
0x3cc4   :  { %4106 = vrot.lane.b32.xlu1 %v5701_v34, %s5011_s21 }
0x3cc6   :  { %4104 = vrot.lane.b32.xlu0 %v5699_v32, %s5011_s21  ;;  %s5019_s21 = smov [#allocation2]  }
0x3cc7   :  { %s4154_s19 = sshll.u32 %s5019_s21, 4  ;;  %s4155_s19 = int_to_ptr.vmem [resolvable:$true] %s4154_s19 }
0x3cc8   :  { %4114 = vrot.lane.b32.xlu1 %v5787_v30, %s5016_s4  ;;  %s4983_s20 = scalar_lea.vmem %s4155_s19, 256  ;;  %p4988_p1 = scmp.lt.s32.totalorder %s4155_s19, %s4155_s19 }
0x3cc9   :  { %p4984_p0 = scmp.ne.s32.totalorder %s4155_s19, %s4983_s20  ;;  %p4989_p2 = scmp.lt.s32.totalorder %s4983_s20, %s4983_s20 }
0x3cca   :  { %4112 = vrot.lane.b32.xlu0 %v5785_v27, %s5016_s4 }
0x3ccb   :  { %p4990_p3 = por %p4989_p2, %p4988_p1 }
0x3ccc   :  { %4122 = vrot.lane.b32.xlu1 %v5880_v20, %s5017_s12 }
0x3ccd   :  { %p4991_p4 = pnand %p4990_p3, %p4984_p0 }
0x3cce   :  { %4120 = vrot.lane.b32.xlu0 %v5878_v39, %s5017_s12 }
0x3d3b   :  { %v4098_v2 = vpop.permute.xlu1 %4097 }
0x3d3c   :  { %v4101_v1 = vmul.f32 %v4098_v2, %v4067_v53 }
0x3d3d   :  { %v4093_v9 = vpop.permute.xlu0 %4092 }
0x3d3e   :  { %v4100_v12 = vmul.f32 %v4093_v9, %v4066_v11  ;;  %4130 = vrot.lane.b32.xlu1 %v4101_v1, %s5018_s18 }
0x3d3f   :  { %v4107_v34 = vpop.permute.xlu1 %4106 }
0x3d40   :  { %4128 = vrot.lane.b32.xlu0 %v4100_v12, %s5018_s18  ;;  %v4135_v27 = vsel %vm53_vm1, %v5615_v5, %v4107_v34 }
0x3d41   :  { %v4105_v23 = vpop.permute.xlu0 %4104 }
0x3d42   :  { %v4134_v13 = vsel %vm53_vm1, %v5613_v33, %v4105_v23 }
0x3d43   :  { %v4115_v32 = vpop.permute.xlu1 %4114 }
0x3d44   :  { %v4138_v39 = vsel %vm4136_vm7, %v4135_v27, %v4115_v32 }
0x3d45   :  { %v4113_v17 = vpop.permute.xlu0 %4112 }
0x3d46   :  { %v4137_v35 = vsel %vm4136_vm7, %v4134_v13, %v4113_v17 }
0x3d47   :  { %v4123_v30 = vpop.permute.xlu1 %4122 }
0x3d48   :  { %v4141_v24 = vsel %vm4139_vm8, %v4138_v39, %v4123_v30 }
0x3d49   :  { %v4121_v20 = vpop.permute.xlu0 %4120 }
0x3d4a   :  { %v4140_v7 = vsel %vm4139_vm8, %v4137_v35, %v4121_v20 }
0x3db0   :  { %v4131_v16 = vpop.permute.xlu1 %4130 }
0x3db1   :  { %v4144_v22 = vsel %vm4142_vm9, %v4141_v24, %v4131_v16 }
0x3db2   :  { %4148 = vst.msk [vmem:[#allocation2 + $0x8] sm:$0x3] %vm4147_vm10, %v4144_v22  ;;  %v4129_v14 = vpop.permute.xlu0 %4128 }
0x3db3   :  { %v4143_v8 = vsel %vm4142_vm9, %v4140_v7, %v4129_v14 }
0x3db4   :  { %4146 = vst.msk [vmem:[#allocation2] sm:$0xff] %vm4145_vm11, %v4143_v8 }
0x3db5   :  { %4994 = shalt.err (!%p4991_p4)
}
0x3db6   :  { %s5020_s22 = smov 128   ;;  %s5021_s23 = smov 8  }
0x3db7   :  { %4160 = dma.vmem_to_hbm [thread:$0]  %s4155_s19, 256, %s5957_s5, [#allocation3], %s5020_s22, %s5020_s22, %s5021_s23  }
0x3db8   :  { %5003 = dma.done.wait [#allocation3], 256  }
0x3db9   :  { %5004 = vsyncadd [#allocation3], 4294967040 }
0x3dba   :  { %4164 = vsyncpa [#allocation3], 1 }

</bundles_post_ra>
